<compile_context>
chip_gen: v7x
topology: tpu7x:2x2x1
jax: 0.10.0
libtpu: 0.0.40
codegen_flags: <defaults>
</compile_context>

<pallas_src>
import functools

import jax
import jax.numpy as jnp
from jax import lax
from jax.experimental import pallas as pl
from jax.experimental.pallas import tpu as pltpu


# -----------------------------------------------------------------------------
# Pallas kernel: fused (conv_h | conv_g) per-tap matmul accumulation + bias + gate
# -----------------------------------------------------------------------------
def _gated_conv_transpose_kernel(x_ref, w_ref, b_ref, o_ref, *,
                                 kd, kh, kw, dil, dt, ho, wo, cout, activation):
    """x_ref: (Cin, Dt+(kd-1)*dil, Hp, Wp)   w_ref: (kd*kh*kw, 2*Cout, Cin)
       b_ref: (2*Cout, 1) f32                o_ref: (Cout, Dt, HWp)."""
    cin = x_ref.shape[0]
    hw = ho * wo
    hwp = o_ref.shape[-1]
    bias = b_ref[...]                                        # (2*Cout, 1), f32

    def body(d, carry):
        acc = None
        for a in range(kd):
            # One padded-input depth slice for this output depth and depth tap.
            slab = x_ref[:, pl.ds(d + a * dil, 1), :, :][:, 0]        # (Cin, Hp, Wp)
            for b in range(kh):
                rows = slab[:, b * dil:b * dil + ho, :]               # (Cin, ho, Wp)
                for c in range(kw):
                    win = rows[:, :, c * dil:c * dil + wo].reshape(cin, hw)
                    t = (a * kh + b) * kw + c
                    contrib = jnp.dot(w_ref[t], win,
                                      preferred_element_type=jnp.float32)
                    acc = contrib if acc is None else acc + contrib
        acc = acc + bias                                     # (2*Cout, hw), f32
        h = acc[:cout]
        g = acc[cout:]
        if activation is not None:
            h = activation(h)                                # None in this module config
        gated = h * pl.reciprocal(1.0 + jnp.exp(-g), approx=True)
        gated = gated.astype(o_ref.dtype)
        if hwp != hw:                                        # keep the store lane-dense
            gated = jnp.pad(gated, ((0, 0), (0, hwp - hw)))
        o_ref[:, pl.ds(d, 1), :] = gated[:, None, :]
        return carry

    lax.fori_loop(0, dt, body, 0)


# -----------------------------------------------------------------------------
# Weight prep (hoisted: do this ONCE at module init, not per forward)
# -----------------------------------------------------------------------------
def prepare_gated_weights(wt_h, b_h, wt_g, b_g, *, compute_dtype=jnp.float32):
    """wt_*: (Cin, Cout, kd, kh, kw) PyTorch ConvTranspose3d layout; b_*: (Cout,).
    Returns per-tap fused weights (kd*kh*kw, 2*Cout, Cin) and bias column (2*Cout, 1)."""
    cin, cout, kd, kh, kw = wt_h.shape
    assert wt_g.shape == wt_h.shape and b_h.shape == b_g.shape == (cout,)

    def to_fwd(wt):   # flip taps, channel-swap: -> (Cout, kd, kh, kw, Cin)
        return jnp.transpose(jnp.flip(wt, axis=(2, 3, 4)), (1, 2, 3, 4, 0))

    wf = jnp.concatenate([to_fwd(wt_h), to_fwd(wt_g)], axis=0)   # (2*Cout, kd, kh, kw, Cin)
    w_taps = jnp.transpose(wf, (1, 2, 3, 0, 4)).reshape(kd * kh * kw, 2 * cout, cin)
    bcol = jnp.concatenate([b_h, b_g]).reshape(2 * cout, 1)
    return w_taps.astype(compute_dtype), bcol.astype(jnp.float32)


# -----------------------------------------------------------------------------
# Forward wrapper
# -----------------------------------------------------------------------------
def gated_conv_transpose3d(x, w_taps, bcol, *, kernel_size, stride=1, padding=0,
                           output_padding=0, dilation=1, activation=None,
                           vmem_budget_bytes=10 * 1024 * 1024):
    """x: (N, Cin, D, H, W). w_taps/bcol from prepare_gated_weights.
    Returns (N, Cout, Do, Ho, Wo) in x.dtype (NCDHW)."""
    N, Cin, D, H, W = x.shape
    if isinstance(kernel_size, int):
        kd = kh = kw = kernel_size
    else:
        kd, kh, kw = kernel_size
    T, F, Cin_w = w_taps.shape
    assert T == kd * kh * kw and Cin_w == Cin
    Cout = F // 2

    def out_dim(i, k):
        return (i - 1) * stride - 2 * padding + dilation * (k - 1) + output_padding + 1

    Do, Ho, Wo = out_dim(D, kd), out_dim(H, kh), out_dim(W, kw)
    HW = Ho * Wo
    HWp = HW if HW % 128 == 0 else pl.cdiv(HW, 128) * 128    # lane-dense output slab

    # --- glue: ConvTranspose == stride-1 conv over zero-inserted, edge-padded input ---
    # TODO(synk): polyphase (sub-pixel) decomposition for stride>1 would avoid streaming
    #             and multiplying the inserted zeros; kept as plain XLA glue here.
    if stride > 1:
        Dz, Hz, Wz = (D - 1) * stride + 1, (H - 1) * stride + 1, (W - 1) * stride + 1
        xz = jnp.zeros((N, Cin, Dz, Hz, Wz), x.dtype)
        xz = xz.at[:, :, ::stride, ::stride, ::stride].set(x)
    else:
        xz = x

    def lo(k):
        return dilation * (k - 1) - padding

    if min(lo(kd), lo(kh), lo(kw)) < 0:
        # TODO(synk): padding > dilation*(kernel-1) would need input cropping; unsupported.
        raise NotImplementedError("padding > dilation*(kernel_size-1) not supported")

    pads = tuple((lo(k), lo(k) + output_padding) for k in (kd, kh, kw))
    xp = jnp.pad(xz, ((0, 0), (0, 0)) + pads)                # keeps x.dtype (no forced f32)
    _, _, Dp, Hp, Wp = xp.shape
    isz = jnp.dtype(x.dtype).itemsize

    # --- depth tile: as large as the (double-buffered) VMEM budget allows ------------
    def tile_bytes(dt_):
        dwin_ = dt_ + (kd - 1) * dilation
        return 2 * (Cin * dwin_ * Hp * Wp + Cout * dt_ * HWp) * isz

    w_bytes = T * F * Cin * isz + F * 4
    divisors = [dd for dd in range(Do, 0, -1)
                if Do % dd == 0 and (dd == Do or dd % 8 == 0)]
    Dt = next((dd for dd in divisors if tile_bytes(dd) + w_bytes <= vmem_budget_bytes),
              divisors[-1])
    if N == 1 and Dt == Do:   # keep >=2 parallel grid chunks (v7x has 2 TensorCores)
        Dt = next((dd for dd in divisors
                   if dd < Do and tile_bytes(dd) + w_bytes <= vmem_budget_bytes), Dt)
    nblk = Do // Dt
    Dwin = Dt + (kd - 1) * dilation

    # --- input: passed ONCE; one windowed DMA per grid step --------------------------
    if nblk == 1:
        x_in = xp                                            # (N, Cin, Dp, Hp, Wp), Dp == Dwin
        in_spec = pl.BlockSpec((pl.Squeezed(), Cin, Dp, Hp, Wp),
                               lambda n, db: (n, 0, 0, 0, 0))
    else:
        # Overlapping depth windows materialized once in XLA so a single blocked DMA per
        # step delivers all kd depth taps (no per-tap refetch of overlapping slabs).
        x_in = jnp.stack([xp[:, :, i * Dt:i * Dt + Dwin] for i in range(nblk)], axis=1)
        in_spec = pl.BlockSpec((pl.Squeezed(), pl.Squeezed(), Cin, Dwin, Hp, Wp),
                               lambda n, db: (n, db, 0, 0, 0, 0))

    out_shape = jax.ShapeDtypeStruct((N, Cout, Do, HWp), x.dtype)
    out_spec = pl.BlockSpec((pl.Squeezed(), Cout, Dt, HWp),
                            lambda n, db: (n, 0, db, 0))

    kernel = functools.partial(
        _gated_conv_transpose_kernel,
        kd=kd, kh=kh, kw=kw, dil=dilation, dt=Dt, ho=Ho, wo=Wo, cout=Cout,
        activation=activation)

    out = pl.pallas_call(
        kernel,
        out_shape=out_shape,
        grid_spec=pltpu.PrefetchScalarGridSpec(
            num_scalar_prefetch=0,
            grid=(N, nblk),
            in_specs=[
                in_spec,
                pl.BlockSpec((T, F, Cin), lambda n, db: (0, 0, 0)),   # resident weights
                pl.BlockSpec((F, 1), lambda n, db: (0, 0)),           # resident bias
            ],
            out_specs=out_spec,
        ),
        compiler_params=pltpu.CompilerParams(
            dimension_semantics=("parallel", "parallel")),
    )(x_in, w_taps, bcol)

    if HWp != HW:
        out = out[..., :HW]                                  # crop lane padding (wrapper side)
    return out.reshape(N, Cout, Do, Ho, Wo)                  # free reshape, channel-major


# -----------------------------------------------------------------------------
# Pure-JAX reference (correctness check)
# -----------------------------------------------------------------------------
def _conv_transpose3d_ref(x, wt, bias, *, stride, padding, output_padding, dilation):
    _, _, kd, kh, kw = wt.shape
    w = jnp.transpose(jnp.flip(wt, axis=(2, 3, 4)), (1, 0, 2, 3, 4))  # (Cout, Cin, kd, kh, kw)
    pads = [(dilation * (k - 1) - padding, dilation * (k - 1) - padding + output_padding)
            for k in (kd, kh, kw)]
    y = jax.lax.conv_general_dilated(
        x, w, window_strides=(1, 1, 1), padding=pads,
        lhs_dilation=(stride,) * 3, rhs_dilation=(dilation,) * 3,
        dimension_numbers=("NCDHW", "OIDHW", "NCDHW"))
    return y + bias[None, :, None, None, None]


def reference_forward(x, wt_h, b_h, wt_g, b_g, *, stride, padding, output_padding,
                      dilation, activation=None):
    h = _conv_transpose3d_ref(x, wt_h, b_h, stride=stride, padding=padding,
                              output_padding=output_padding, dilation=dilation)
    if activation is not None:
        h = activation(h)
    g = jax.nn.sigmoid(_conv_transpose3d_ref(x, wt_g, b_g, stride=stride, padding=padding,
                                             output_padding=output_padding, dilation=dilation))
    return h * g


# -----------------------------------------------------------------------------
# Main
# -----------------------------------------------------------------------------
if __name__ == "__main__":
    key = jax.random.PRNGKey(0)
    kx, kwh, kbh, kwg, kbg = jax.random.split(key, 5)

    N, Cin, Cout = 2, 4, 8
    D = H = W = 8
    ksz, stride, padding, output_padding, dilation = 3, 2, 1, 1, 1   # 8^3 -> 16^3 decoder step

    x = jax.random.normal(kx, (N, Cin, D, H, W), dtype=jnp.float32)
    wt_h = 0.1 * jax.random.normal(kwh, (Cin, Cout, ksz, ksz, ksz), dtype=jnp.float32)
    wt_g = 0.1 * jax.random.normal(kwg, (Cin, Cout, ksz, ksz, ksz), dtype=jnp.float32)
    b_h = 0.1 * jax.random.normal(kbh, (Cout,), dtype=jnp.float32)
    b_g = 0.1 * jax.random.normal(kbg, (Cout,), dtype=jnp.float32)

    # Weight prep hoisted out of the forward path (module-init time).
    w_taps, bcol = prepare_gated_weights(wt_h, b_h, wt_g, b_g, compute_dtype=x.dtype)

    out = gated_conv_transpose3d(x, w_taps, bcol, kernel_size=ksz,
                                 stride=stride, padding=padding,
                                 output_padding=output_padding, dilation=dilation)
    out = jax.block_until_ready(out)

    ref = reference_forward(x, wt_h, b_h, wt_g, b_g,
                            stride=stride, padding=padding,
                            output_padding=output_padding, dilation=dilation)

    assert out.shape == ref.shape == (N, Cout, 16, 16, 16), (out.shape, ref.shape)
    max_err = float(jnp.max(jnp.abs(out - ref)))
    assert jnp.allclose(out, ref, atol=5e-3, rtol=5e-3), max_err

    print("KERNEL_OK")
</pallas_src>

<mosaic_0001>
module attributes {stable_mosaic.version = 11 : i64} {
  func.func @_gated_conv_transpose_kernel(%arg0: i32, %arg1: i32, %arg2: memref<1x4x18x18x18xf32, #tpu.memory_space<vmem>>, %arg3: memref<27x16x4xf32, #tpu.memory_space<vmem>>, %arg4: memref<16x1xf32, #tpu.memory_space<vmem>>, %arg5: memref<1x8x16x256xf32, #tpu.memory_space<vmem>>) attributes {dimension_semantics = [#tpu.dimension_semantics<parallel>, #tpu.dimension_semantics<parallel>], iteration_bounds = array<i64: 2, 1>, scalar_prefetch = 0 : i64, scratch_operands = 0 : i64, tpu.core_type = #tpu.core_type<tc>, window_params = [{transform_indices = @transform_0, window_bounds = array<i64: 1, 4, 18, 18, 18>}, {pipeline_mode = #tpu.pipeline_mode<synchronous>, transform_indices = @transform_1, window_bounds = array<i64: 27, 16, 4>}, {pipeline_mode = #tpu.pipeline_mode<synchronous>, transform_indices = @transform_2, window_bounds = array<i64: 16, 1>}, {transform_indices = @transform_3, window_bounds = array<i64: 1, 8, 16, 256>}]} {
    %c0 = arith.constant 0 : index
    %c0_0 = arith.constant 0 : index
    %0 = vector.load %arg4[%c0, %c0_0] : memref<16x1xf32, #tpu.memory_space<vmem>>, vector<16x1xf32>
    %c0_i32 = arith.constant 0 : i32
    %c16_i32 = arith.constant 16 : i32
    %1 = arith.addi %c0_i32, %c16_i32 : i32
    %c1_i32 = arith.constant 1 : i32
    scf.for %arg6 = %c0_i32 to %1 step %c1_i32  : i32 {
      %c0_i32_2 = arith.constant 0 : i32
      %2 = arith.addi %arg6, %c0_i32_2 : i32
      %c0_3 = arith.constant 0 : index
      %c0_4 = arith.constant 0 : index
      %3 = arith.index_cast %2 : i32 to index
      %c0_5 = arith.constant 0 : index
      %c0_6 = arith.constant 0 : index
      %4 = vector.load %arg2[%c0_3, %c0_4, %3, %c0_5, %c0_6] : memref<1x4x18x18x18xf32, #tpu.memory_space<vmem>>, vector<1x4x1x18x18xf32>
      %5 = vector.shape_cast %4 : vector<1x4x1x18x18xf32> to vector<4x1x18x18xf32>
      %6 = vector.shape_cast %5 : vector<4x1x18x18xf32> to vector<4x18x18xf32>
      %7 = vector.extract_strided_slice %6 {offsets = [0, 0, 0], sizes = [4, 16, 18], strides = [1, 1, 1]} : vector<4x18x18xf32> to vector<4x16x18xf32>
      %8 = vector.extract_strided_slice %7 {offsets = [0, 0, 0], sizes = [4, 16, 16], strides = [1, 1, 1]} : vector<4x16x18xf32> to vector<4x16x16xf32>
      %9 = vector.shape_cast %8 : vector<4x16x16xf32> to vector<4x256xf32>
      %c0_7 = arith.constant 0 : index
      %c0_8 = arith.constant 0 : index
      %c0_9 = arith.constant 0 : index
      %10 = vector.load %arg3[%c0_7, %c0_8, %c0_9] : memref<27x16x4xf32, #tpu.memory_space<vmem>>, vector<1x16x4xf32>
      %11 = vector.shape_cast %10 : vector<1x16x4xf32> to vector<16x4xf32>
      %cst = arith.constant dense<0.000000e+00> : vector<16x256xf32>
      %12 = tpu.matmul %11, %9, %cst {dimension_numbers = #tpu.dot_dimension_numbers<[1], [0], [0], [1], [0, 0, 1, 1], [], []>} : vector<16x4xf32>, vector<4x256xf32>, vector<16x256xf32> -> vector<16x256xf32>
      %13 = vector.extract_strided_slice %7 {offsets = [0, 0, 1], sizes = [4, 16, 16], strides = [1, 1, 1]} : vector<4x16x18xf32> to vector<4x16x16xf32>
      %14 = vector.shape_cast %13 : vector<4x16x16xf32> to vector<4x256xf32>
      %c1 = arith.constant 1 : index
      %c0_10 = arith.constant 0 : index
      %c0_11 = arith.constant 0 : index
      %15 = vector.load %arg3[%c1, %c0_10, %c0_11] : memref<27x16x4xf32, #tpu.memory_space<vmem>>, vector<1x16x4xf32>
      %16 = vector.shape_cast %15 : vector<1x16x4xf32> to vector<16x4xf32>
      %cst_12 = arith.constant dense<0.000000e+00> : vector<16x256xf32>
      %17 = tpu.matmul %16, %14, %cst_12 {dimension_numbers = #tpu.dot_dimension_numbers<[1], [0], [0], [1], [0, 0, 1, 1], [], []>} : vector<16x4xf32>, vector<4x256xf32>, vector<16x256xf32> -> vector<16x256xf32>
      %18 = arith.addf %12, %17 : vector<16x256xf32>
      %19 = vector.extract_strided_slice %7 {offsets = [0, 0, 2], sizes = [4, 16, 16], strides = [1, 1, 1]} : vector<4x16x18xf32> to vector<4x16x16xf32>
      %20 = vector.shape_cast %19 : vector<4x16x16xf32> to vector<4x256xf32>
      %c2 = arith.constant 2 : index
      %c0_13 = arith.constant 0 : index
      %c0_14 = arith.constant 0 : index
      %21 = vector.load %arg3[%c2, %c0_13, %c0_14] : memref<27x16x4xf32, #tpu.memory_space<vmem>>, vector<1x16x4xf32>
      %22 = vector.shape_cast %21 : vector<1x16x4xf32> to vector<16x4xf32>
      %cst_15 = arith.constant dense<0.000000e+00> : vector<16x256xf32>
      %23 = tpu.matmul %22, %20, %cst_15 {dimension_numbers = #tpu.dot_dimension_numbers<[1], [0], [0], [1], [0, 0, 1, 1], [], []>} : vector<16x4xf32>, vector<4x256xf32>, vector<16x256xf32> -> vector<16x256xf32>
      %24 = arith.addf %18, %23 : vector<16x256xf32>
      %25 = vector.extract_strided_slice %6 {offsets = [0, 1, 0], sizes = [4, 16, 18], strides = [1, 1, 1]} : vector<4x18x18xf32> to vector<4x16x18xf32>
      %26 = vector.extract_strided_slice %25 {offsets = [0, 0, 0], sizes = [4, 16, 16], strides = [1, 1, 1]} : vector<4x16x18xf32> to vector<4x16x16xf32>
      %27 = vector.shape_cast %26 : vector<4x16x16xf32> to vector<4x256xf32>
      %c3 = arith.constant 3 : index
      %c0_16 = arith.constant 0 : index
      %c0_17 = arith.constant 0 : index
      %28 = vector.load %arg3[%c3, %c0_16, %c0_17] : memref<27x16x4xf32, #tpu.memory_space<vmem>>, vector<1x16x4xf32>
      %29 = vector.shape_cast %28 : vector<1x16x4xf32> to vector<16x4xf32>
      %cst_18 = arith.constant dense<0.000000e+00> : vector<16x256xf32>
      %30 = tpu.matmul %29, %27, %cst_18 {dimension_numbers = #tpu.dot_dimension_numbers<[1], [0], [0], [1], [0, 0, 1, 1], [], []>} : vector<16x4xf32>, vector<4x256xf32>, vector<16x256xf32> -> vector<16x256xf32>
      %31 = arith.addf %24, %30 : vector<16x256xf32>
      %32 = vector.extract_strided_slice %25 {offsets = [0, 0, 1], sizes = [4, 16, 16], strides = [1, 1, 1]} : vector<4x16x18xf32> to vector<4x16x16xf32>
      %33 = vector.shape_cast %32 : vector<4x16x16xf32> to vector<4x256xf32>
      %c4 = arith.constant 4 : index
      %c0_19 = arith.constant 0 : index
      %c0_20 = arith.constant 0 : index
      %34 = vector.load %arg3[%c4, %c0_19, %c0_20] : memref<27x16x4xf32, #tpu.memory_space<vmem>>, vector<1x16x4xf32>
      %35 = vector.shape_cast %34 : vector<1x16x4xf32> to vector<16x4xf32>
      %cst_21 = arith.constant dense<0.000000e+00> : vector<16x256xf32>
      %36 = tpu.matmul %35, %33, %cst_21 {dimension_numbers = #tpu.dot_dimension_numbers<[1], [0], [0], [1], [0, 0, 1, 1], [], []>} : vector<16x4xf32>, vector<4x256xf32>, vector<16x256xf32> -> vector<16x256xf32>
      %37 = arith.addf %31, %36 : vector<16x256xf32>
      %38 = vector.extract_strided_slice %25 {offsets = [0, 0, 2], sizes = [4, 16, 16], strides = [1, 1, 1]} : vector<4x16x18xf32> to vector<4x16x16xf32>
      %39 = vector.shape_cast %38 : vector<4x16x16xf32> to vector<4x256xf32>
      %c5 = arith.constant 5 : index
      %c0_22 = arith.constant 0 : index
      %c0_23 = arith.constant 0 : index
      %40 = vector.load %arg3[%c5, %c0_22, %c0_23] : memref<27x16x4xf32, #tpu.memory_space<vmem>>, vector<1x16x4xf32>
      %41 = vector.shape_cast %40 : vector<1x16x4xf32> to vector<16x4xf32>
      %cst_24 = arith.constant dense<0.000000e+00> : vector<16x256xf32>
      %42 = tpu.matmul %41, %39, %cst_24 {dimension_numbers = #tpu.dot_dimension_numbers<[1], [0], [0], [1], [0, 0, 1, 1], [], []>} : vector<16x4xf32>, vector<4x256xf32>, vector<16x256xf32> -> vector<16x256xf32>
      %43 = arith.addf %37, %42 : vector<16x256xf32>
      %44 = vector.extract_strided_slice %6 {offsets = [0, 2, 0], sizes = [4, 16, 18], strides = [1, 1, 1]} : vector<4x18x18xf32> to vector<4x16x18xf32>
      %45 = vector.extract_strided_slice %44 {offsets = [0, 0, 0], sizes = [4, 16, 16], strides = [1, 1, 1]} : vector<4x16x18xf32> to vector<4x16x16xf32>
      %46 = vector.shape_cast %45 : vector<4x16x16xf32> to vector<4x256xf32>
      %c6 = arith.constant 6 : index
      %c0_25 = arith.constant 0 : index
      %c0_26 = arith.constant 0 : index
      %47 = vector.load %arg3[%c6, %c0_25, %c0_26] : memref<27x16x4xf32, #tpu.memory_space<vmem>>, vector<1x16x4xf32>
      %48 = vector.shape_cast %47 : vector<1x16x4xf32> to vector<16x4xf32>
      %cst_27 = arith.constant dense<0.000000e+00> : vector<16x256xf32>
      %49 = tpu.matmul %48, %46, %cst_27 {dimension_numbers = #tpu.dot_dimension_numbers<[1], [0], [0], [1], [0, 0, 1, 1], [], []>} : vector<16x4xf32>, vector<4x256xf32>, vector<16x256xf32> -> vector<16x256xf32>
      %50 = arith.addf %43, %49 : vector<16x256xf32>
      %51 = vector.extract_strided_slice %44 {offsets = [0, 0, 1], sizes = [4, 16, 16], strides = [1, 1, 1]} : vector<4x16x18xf32> to vector<4x16x16xf32>
      %52 = vector.shape_cast %51 : vector<4x16x16xf32> to vector<4x256xf32>
      %c7 = arith.constant 7 : index
      %c0_28 = arith.constant 0 : index
      %c0_29 = arith.constant 0 : index
      %53 = vector.load %arg3[%c7, %c0_28, %c0_29] : memref<27x16x4xf32, #tpu.memory_space<vmem>>, vector<1x16x4xf32>
      %54 = vector.shape_cast %53 : vector<1x16x4xf32> to vector<16x4xf32>
      %cst_30 = arith.constant dense<0.000000e+00> : vector<16x256xf32>
      %55 = tpu.matmul %54, %52, %cst_30 {dimension_numbers = #tpu.dot_dimension_numbers<[1], [0], [0], [1], [0, 0, 1, 1], [], []>} : vector<16x4xf32>, vector<4x256xf32>, vector<16x256xf32> -> vector<16x256xf32>
      %56 = arith.addf %50, %55 : vector<16x256xf32>
      %57 = vector.extract_strided_slice %44 {offsets = [0, 0, 2], sizes = [4, 16, 16], strides = [1, 1, 1]} : vector<4x16x18xf32> to vector<4x16x16xf32>
      %58 = vector.shape_cast %57 : vector<4x16x16xf32> to vector<4x256xf32>
      %c8 = arith.constant 8 : index
      %c0_31 = arith.constant 0 : index
      %c0_32 = arith.constant 0 : index
      %59 = vector.load %arg3[%c8, %c0_31, %c0_32] : memref<27x16x4xf32, #tpu.memory_space<vmem>>, vector<1x16x4xf32>
      %60 = vector.shape_cast %59 : vector<1x16x4xf32> to vector<16x4xf32>
      %cst_33 = arith.constant dense<0.000000e+00> : vector<16x256xf32>
      %61 = tpu.matmul %60, %58, %cst_33 {dimension_numbers = #tpu.dot_dimension_numbers<[1], [0], [0], [1], [0, 0, 1, 1], [], []>} : vector<16x4xf32>, vector<4x256xf32>, vector<16x256xf32> -> vector<16x256xf32>
      %62 = arith.addf %56, %61 : vector<16x256xf32>
      %c1_i32_34 = arith.constant 1 : i32
      %63 = arith.addi %arg6, %c1_i32_34 : i32
      %c0_35 = arith.constant 0 : index
      %c0_36 = arith.constant 0 : index
      %64 = arith.index_cast %63 : i32 to index
      %c0_37 = arith.constant 0 : index
      %c0_38 = arith.constant 0 : index
      %65 = vector.load %arg2[%c0_35, %c0_36, %64, %c0_37, %c0_38] : memref<1x4x18x18x18xf32, #tpu.memory_space<vmem>>, vector<1x4x1x18x18xf32>
      %66 = vector.shape_cast %65 : vector<1x4x1x18x18xf32> to vector<4x1x18x18xf32>
      %67 = vector.shape_cast %66 : vector<4x1x18x18xf32> to vector<4x18x18xf32>
      %68 = vector.extract_strided_slice %67 {offsets = [0, 0, 0], sizes = [4, 16, 18], strides = [1, 1, 1]} : vector<4x18x18xf32> to vector<4x16x18xf32>
      %69 = vector.extract_strided_slice %68 {offsets = [0, 0, 0], sizes = [4, 16, 16], strides = [1, 1, 1]} : vector<4x16x18xf32> to vector<4x16x16xf32>
      %70 = vector.shape_cast %69 : vector<4x16x16xf32> to vector<4x256xf32>
      %c9 = arith.constant 9 : index
      %c0_39 = arith.constant 0 : index
      %c0_40 = arith.constant 0 : index
      %71 = vector.load %arg3[%c9, %c0_39, %c0_40] : memref<27x16x4xf32, #tpu.memory_space<vmem>>, vector<1x16x4xf32>
      %72 = vector.shape_cast %71 : vector<1x16x4xf32> to vector<16x4xf32>
      %cst_41 = arith.constant dense<0.000000e+00> : vector<16x256xf32>
      %73 = tpu.matmul %72, %70, %cst_41 {dimension_numbers = #tpu.dot_dimension_numbers<[1], [0], [0], [1], [0, 0, 1, 1], [], []>} : vector<16x4xf32>, vector<4x256xf32>, vector<16x256xf32> -> vector<16x256xf32>
      %74 = arith.addf %62, %73 : vector<16x256xf32>
      %75 = vector.extract_strided_slice %68 {offsets = [0, 0, 1], sizes = [4, 16, 16], strides = [1, 1, 1]} : vector<4x16x18xf32> to vector<4x16x16xf32>
      %76 = vector.shape_cast %75 : vector<4x16x16xf32> to vector<4x256xf32>
      %c10 = arith.constant 10 : index
      %c0_42 = arith.constant 0 : index
      %c0_43 = arith.constant 0 : index
      %77 = vector.load %arg3[%c10, %c0_42, %c0_43] : memref<27x16x4xf32, #tpu.memory_space<vmem>>, vector<1x16x4xf32>
      %78 = vector.shape_cast %77 : vector<1x16x4xf32> to vector<16x4xf32>
      %cst_44 = arith.constant dense<0.000000e+00> : vector<16x256xf32>
      %79 = tpu.matmul %78, %76, %cst_44 {dimension_numbers = #tpu.dot_dimension_numbers<[1], [0], [0], [1], [0, 0, 1, 1], [], []>} : vector<16x4xf32>, vector<4x256xf32>, vector<16x256xf32> -> vector<16x256xf32>
      %80 = arith.addf %74, %79 : vector<16x256xf32>
      %81 = vector.extract_strided_slice %68 {offsets = [0, 0, 2], sizes = [4, 16, 16], strides = [1, 1, 1]} : vector<4x16x18xf32> to vector<4x16x16xf32>
      %82 = vector.shape_cast %81 : vector<4x16x16xf32> to vector<4x256xf32>
      %c11 = arith.constant 11 : index
      %c0_45 = arith.constant 0 : index
      %c0_46 = arith.constant 0 : index
      %83 = vector.load %arg3[%c11, %c0_45, %c0_46] : memref<27x16x4xf32, #tpu.memory_space<vmem>>, vector<1x16x4xf32>
      %84 = vector.shape_cast %83 : vector<1x16x4xf32> to vector<16x4xf32>
      %cst_47 = arith.constant dense<0.000000e+00> : vector<16x256xf32>
      %85 = tpu.matmul %84, %82, %cst_47 {dimension_numbers = #tpu.dot_dimension_numbers<[1], [0], [0], [1], [0, 0, 1, 1], [], []>} : vector<16x4xf32>, vector<4x256xf32>, vector<16x256xf32> -> vector<16x256xf32>
      %86 = arith.addf %80, %85 : vector<16x256xf32>
      %87 = vector.extract_strided_slice %67 {offsets = [0, 1, 0], sizes = [4, 16, 18], strides = [1, 1, 1]} : vector<4x18x18xf32> to vector<4x16x18xf32>
      %88 = vector.extract_strided_slice %87 {offsets = [0, 0, 0], sizes = [4, 16, 16], strides = [1, 1, 1]} : vector<4x16x18xf32> to vector<4x16x16xf32>
      %89 = vector.shape_cast %88 : vector<4x16x16xf32> to vector<4x256xf32>
      %c12 = arith.constant 12 : index
      %c0_48 = arith.constant 0 : index
      %c0_49 = arith.constant 0 : index
      %90 = vector.load %arg3[%c12, %c0_48, %c0_49] : memref<27x16x4xf32, #tpu.memory_space<vmem>>, vector<1x16x4xf32>
      %91 = vector.shape_cast %90 : vector<1x16x4xf32> to vector<16x4xf32>
      %cst_50 = arith.constant dense<0.000000e+00> : vector<16x256xf32>
      %92 = tpu.matmul %91, %89, %cst_50 {dimension_numbers = #tpu.dot_dimension_numbers<[1], [0], [0], [1], [0, 0, 1, 1], [], []>} : vector<16x4xf32>, vector<4x256xf32>, vector<16x256xf32> -> vector<16x256xf32>
      %93 = arith.addf %86, %92 : vector<16x256xf32>
      %94 = vector.extract_strided_slice %87 {offsets = [0, 0, 1], sizes = [4, 16, 16], strides = [1, 1, 1]} : vector<4x16x18xf32> to vector<4x16x16xf32>
      %95 = vector.shape_cast %94 : vector<4x16x16xf32> to vector<4x256xf32>
      %c13 = arith.constant 13 : index
      %c0_51 = arith.constant 0 : index
      %c0_52 = arith.constant 0 : index
      %96 = vector.load %arg3[%c13, %c0_51, %c0_52] : memref<27x16x4xf32, #tpu.memory_space<vmem>>, vector<1x16x4xf32>
      %97 = vector.shape_cast %96 : vector<1x16x4xf32> to vector<16x4xf32>
      %cst_53 = arith.constant dense<0.000000e+00> : vector<16x256xf32>
      %98 = tpu.matmul %97, %95, %cst_53 {dimension_numbers = #tpu.dot_dimension_numbers<[1], [0], [0], [1], [0, 0, 1, 1], [], []>} : vector<16x4xf32>, vector<4x256xf32>, vector<16x256xf32> -> vector<16x256xf32>
      %99 = arith.addf %93, %98 : vector<16x256xf32>
      %100 = vector.extract_strided_slice %87 {offsets = [0, 0, 2], sizes = [4, 16, 16], strides = [1, 1, 1]} : vector<4x16x18xf32> to vector<4x16x16xf32>
      %101 = vector.shape_cast %100 : vector<4x16x16xf32> to vector<4x256xf32>
      %c14 = arith.constant 14 : index
      %c0_54 = arith.constant 0 : index
      %c0_55 = arith.constant 0 : index
      %102 = vector.load %arg3[%c14, %c0_54, %c0_55] : memref<27x16x4xf32, #tpu.memory_space<vmem>>, vector<1x16x4xf32>
      %103 = vector.shape_cast %102 : vector<1x16x4xf32> to vector<16x4xf32>
      %cst_56 = arith.constant dense<0.000000e+00> : vector<16x256xf32>
      %104 = tpu.matmul %103, %101, %cst_56 {dimension_numbers = #tpu.dot_dimension_numbers<[1], [0], [0], [1], [0, 0, 1, 1], [], []>} : vector<16x4xf32>, vector<4x256xf32>, vector<16x256xf32> -> vector<16x256xf32>
      %105 = arith.addf %99, %104 : vector<16x256xf32>
      %106 = vector.extract_strided_slice %67 {offsets = [0, 2, 0], sizes = [4, 16, 18], strides = [1, 1, 1]} : vector<4x18x18xf32> to vector<4x16x18xf32>
      %107 = vector.extract_strided_slice %106 {offsets = [0, 0, 0], sizes = [4, 16, 16], strides = [1, 1, 1]} : vector<4x16x18xf32> to vector<4x16x16xf32>
      %108 = vector.shape_cast %107 : vector<4x16x16xf32> to vector<4x256xf32>
      %c15 = arith.constant 15 : index
      %c0_57 = arith.constant 0 : index
      %c0_58 = arith.constant 0 : index
      %109 = vector.load %arg3[%c15, %c0_57, %c0_58] : memref<27x16x4xf32, #tpu.memory_space<vmem>>, vector<1x16x4xf32>
      %110 = vector.shape_cast %109 : vector<1x16x4xf32> to vector<16x4xf32>
      %cst_59 = arith.constant dense<0.000000e+00> : vector<16x256xf32>
      %111 = tpu.matmul %110, %108, %cst_59 {dimension_numbers = #tpu.dot_dimension_numbers<[1], [0], [0], [1], [0, 0, 1, 1], [], []>} : vector<16x4xf32>, vector<4x256xf32>, vector<16x256xf32> -> vector<16x256xf32>
      %112 = arith.addf %105, %111 : vector<16x256xf32>
      %113 = vector.extract_strided_slice %106 {offsets = [0, 0, 1], sizes = [4, 16, 16], strides = [1, 1, 1]} : vector<4x16x18xf32> to vector<4x16x16xf32>
      %114 = vector.shape_cast %113 : vector<4x16x16xf32> to vector<4x256xf32>
      %c16 = arith.constant 16 : index
      %c0_60 = arith.constant 0 : index
      %c0_61 = arith.constant 0 : index
      %115 = vector.load %arg3[%c16, %c0_60, %c0_61] : memref<27x16x4xf32, #tpu.memory_space<vmem>>, vector<1x16x4xf32>
      %116 = vector.shape_cast %115 : vector<1x16x4xf32> to vector<16x4xf32>
      %cst_62 = arith.constant dense<0.000000e+00> : vector<16x256xf32>
      %117 = tpu.matmul %116, %114, %cst_62 {dimension_numbers = #tpu.dot_dimension_numbers<[1], [0], [0], [1], [0, 0, 1, 1], [], []>} : vector<16x4xf32>, vector<4x256xf32>, vector<16x256xf32> -> vector<16x256xf32>
      %118 = arith.addf %112, %117 : vector<16x256xf32>
      %119 = vector.extract_strided_slice %106 {offsets = [0, 0, 2], sizes = [4, 16, 16], strides = [1, 1, 1]} : vector<4x16x18xf32> to vector<4x16x16xf32>
      %120 = vector.shape_cast %119 : vector<4x16x16xf32> to vector<4x256xf32>
      %c17 = arith.constant 17 : index
      %c0_63 = arith.constant 0 : index
      %c0_64 = arith.constant 0 : index
      %121 = vector.load %arg3[%c17, %c0_63, %c0_64] : memref<27x16x4xf32, #tpu.memory_space<vmem>>, vector<1x16x4xf32>
      %122 = vector.shape_cast %121 : vector<1x16x4xf32> to vector<16x4xf32>
      %cst_65 = arith.constant dense<0.000000e+00> : vector<16x256xf32>
      %123 = tpu.matmul %122, %120, %cst_65 {dimension_numbers = #tpu.dot_dimension_numbers<[1], [0], [0], [1], [0, 0, 1, 1], [], []>} : vector<16x4xf32>, vector<4x256xf32>, vector<16x256xf32> -> vector<16x256xf32>
      %124 = arith.addf %118, %123 : vector<16x256xf32>
      %c2_i32 = arith.constant 2 : i32
      %125 = arith.addi %arg6, %c2_i32 : i32
      %c0_66 = arith.constant 0 : index
      %c0_67 = arith.constant 0 : index
      %126 = arith.index_cast %125 : i32 to index
      %c0_68 = arith.constant 0 : index
      %c0_69 = arith.constant 0 : index
      %127 = vector.load %arg2[%c0_66, %c0_67, %126, %c0_68, %c0_69] : memref<1x4x18x18x18xf32, #tpu.memory_space<vmem>>, vector<1x4x1x18x18xf32>
      %128 = vector.shape_cast %127 : vector<1x4x1x18x18xf32> to vector<4x1x18x18xf32>
      %129 = vector.shape_cast %128 : vector<4x1x18x18xf32> to vector<4x18x18xf32>
      %130 = vector.extract_strided_slice %129 {offsets = [0, 0, 0], sizes = [4, 16, 18], strides = [1, 1, 1]} : vector<4x18x18xf32> to vector<4x16x18xf32>
      %131 = vector.extract_strided_slice %130 {offsets = [0, 0, 0], sizes = [4, 16, 16], strides = [1, 1, 1]} : vector<4x16x18xf32> to vector<4x16x16xf32>
      %132 = vector.shape_cast %131 : vector<4x16x16xf32> to vector<4x256xf32>
      %c18 = arith.constant 18 : index
      %c0_70 = arith.constant 0 : index
      %c0_71 = arith.constant 0 : index
      %133 = vector.load %arg3[%c18, %c0_70, %c0_71] : memref<27x16x4xf32, #tpu.memory_space<vmem>>, vector<1x16x4xf32>
      %134 = vector.shape_cast %133 : vector<1x16x4xf32> to vector<16x4xf32>
      %cst_72 = arith.constant dense<0.000000e+00> : vector<16x256xf32>
      %135 = tpu.matmul %134, %132, %cst_72 {dimension_numbers = #tpu.dot_dimension_numbers<[1], [0], [0], [1], [0, 0, 1, 1], [], []>} : vector<16x4xf32>, vector<4x256xf32>, vector<16x256xf32> -> vector<16x256xf32>
      %136 = arith.addf %124, %135 : vector<16x256xf32>
      %137 = vector.extract_strided_slice %130 {offsets = [0, 0, 1], sizes = [4, 16, 16], strides = [1, 1, 1]} : vector<4x16x18xf32> to vector<4x16x16xf32>
      %138 = vector.shape_cast %137 : vector<4x16x16xf32> to vector<4x256xf32>
      %c19 = arith.constant 19 : index
      %c0_73 = arith.constant 0 : index
      %c0_74 = arith.constant 0 : index
      %139 = vector.load %arg3[%c19, %c0_73, %c0_74] : memref<27x16x4xf32, #tpu.memory_space<vmem>>, vector<1x16x4xf32>
      %140 = vector.shape_cast %139 : vector<1x16x4xf32> to vector<16x4xf32>
      %cst_75 = arith.constant dense<0.000000e+00> : vector<16x256xf32>
      %141 = tpu.matmul %140, %138, %cst_75 {dimension_numbers = #tpu.dot_dimension_numbers<[1], [0], [0], [1], [0, 0, 1, 1], [], []>} : vector<16x4xf32>, vector<4x256xf32>, vector<16x256xf32> -> vector<16x256xf32>
      %142 = arith.addf %136, %141 : vector<16x256xf32>
      %143 = vector.extract_strided_slice %130 {offsets = [0, 0, 2], sizes = [4, 16, 16], strides = [1, 1, 1]} : vector<4x16x18xf32> to vector<4x16x16xf32>
      %144 = vector.shape_cast %143 : vector<4x16x16xf32> to vector<4x256xf32>
      %c20 = arith.constant 20 : index
      %c0_76 = arith.constant 0 : index
      %c0_77 = arith.constant 0 : index
      %145 = vector.load %arg3[%c20, %c0_76, %c0_77] : memref<27x16x4xf32, #tpu.memory_space<vmem>>, vector<1x16x4xf32>
      %146 = vector.shape_cast %145 : vector<1x16x4xf32> to vector<16x4xf32>
      %cst_78 = arith.constant dense<0.000000e+00> : vector<16x256xf32>
      %147 = tpu.matmul %146, %144, %cst_78 {dimension_numbers = #tpu.dot_dimension_numbers<[1], [0], [0], [1], [0, 0, 1, 1], [], []>} : vector<16x4xf32>, vector<4x256xf32>, vector<16x256xf32> -> vector<16x256xf32>
      %148 = arith.addf %142, %147 : vector<16x256xf32>
      %149 = vector.extract_strided_slice %129 {offsets = [0, 1, 0], sizes = [4, 16, 18], strides = [1, 1, 1]} : vector<4x18x18xf32> to vector<4x16x18xf32>
      %150 = vector.extract_strided_slice %149 {offsets = [0, 0, 0], sizes = [4, 16, 16], strides = [1, 1, 1]} : vector<4x16x18xf32> to vector<4x16x16xf32>
      %151 = vector.shape_cast %150 : vector<4x16x16xf32> to vector<4x256xf32>
      %c21 = arith.constant 21 : index
      %c0_79 = arith.constant 0 : index
      %c0_80 = arith.constant 0 : index
      %152 = vector.load %arg3[%c21, %c0_79, %c0_80] : memref<27x16x4xf32, #tpu.memory_space<vmem>>, vector<1x16x4xf32>
      %153 = vector.shape_cast %152 : vector<1x16x4xf32> to vector<16x4xf32>
      %cst_81 = arith.constant dense<0.000000e+00> : vector<16x256xf32>
      %154 = tpu.matmul %153, %151, %cst_81 {dimension_numbers = #tpu.dot_dimension_numbers<[1], [0], [0], [1], [0, 0, 1, 1], [], []>} : vector<16x4xf32>, vector<4x256xf32>, vector<16x256xf32> -> vector<16x256xf32>
      %155 = arith.addf %148, %154 : vector<16x256xf32>
      %156 = vector.extract_strided_slice %149 {offsets = [0, 0, 1], sizes = [4, 16, 16], strides = [1, 1, 1]} : vector<4x16x18xf32> to vector<4x16x16xf32>
      %157 = vector.shape_cast %156 : vector<4x16x16xf32> to vector<4x256xf32>
      %c22 = arith.constant 22 : index
      %c0_82 = arith.constant 0 : index
      %c0_83 = arith.constant 0 : index
      %158 = vector.load %arg3[%c22, %c0_82, %c0_83] : memref<27x16x4xf32, #tpu.memory_space<vmem>>, vector<1x16x4xf32>
      %159 = vector.shape_cast %158 : vector<1x16x4xf32> to vector<16x4xf32>
      %cst_84 = arith.constant dense<0.000000e+00> : vector<16x256xf32>
      %160 = tpu.matmul %159, %157, %cst_84 {dimension_numbers = #tpu.dot_dimension_numbers<[1], [0], [0], [1], [0, 0, 1, 1], [], []>} : vector<16x4xf32>, vector<4x256xf32>, vector<16x256xf32> -> vector<16x256xf32>
      %161 = arith.addf %155, %160 : vector<16x256xf32>
      %162 = vector.extract_strided_slice %149 {offsets = [0, 0, 2], sizes = [4, 16, 16], strides = [1, 1, 1]} : vector<4x16x18xf32> to vector<4x16x16xf32>
      %163 = vector.shape_cast %162 : vector<4x16x16xf32> to vector<4x256xf32>
      %c23 = arith.constant 23 : index
      %c0_85 = arith.constant 0 : index
      %c0_86 = arith.constant 0 : index
      %164 = vector.load %arg3[%c23, %c0_85, %c0_86] : memref<27x16x4xf32, #tpu.memory_space<vmem>>, vector<1x16x4xf32>
      %165 = vector.shape_cast %164 : vector<1x16x4xf32> to vector<16x4xf32>
      %cst_87 = arith.constant dense<0.000000e+00> : vector<16x256xf32>
      %166 = tpu.matmul %165, %163, %cst_87 {dimension_numbers = #tpu.dot_dimension_numbers<[1], [0], [0], [1], [0, 0, 1, 1], [], []>} : vector<16x4xf32>, vector<4x256xf32>, vector<16x256xf32> -> vector<16x256xf32>
      %167 = arith.addf %161, %166 : vector<16x256xf32>
      %168 = vector.extract_strided_slice %129 {offsets = [0, 2, 0], sizes = [4, 16, 18], strides = [1, 1, 1]} : vector<4x18x18xf32> to vector<4x16x18xf32>
      %169 = vector.extract_strided_slice %168 {offsets = [0, 0, 0], sizes = [4, 16, 16], strides = [1, 1, 1]} : vector<4x16x18xf32> to vector<4x16x16xf32>
      %170 = vector.shape_cast %169 : vector<4x16x16xf32> to vector<4x256xf32>
      %c24 = arith.constant 24 : index
      %c0_88 = arith.constant 0 : index
      %c0_89 = arith.constant 0 : index
      %171 = vector.load %arg3[%c24, %c0_88, %c0_89] : memref<27x16x4xf32, #tpu.memory_space<vmem>>, vector<1x16x4xf32>
      %172 = vector.shape_cast %171 : vector<1x16x4xf32> to vector<16x4xf32>
      %cst_90 = arith.constant dense<0.000000e+00> : vector<16x256xf32>
      %173 = tpu.matmul %172, %170, %cst_90 {dimension_numbers = #tpu.dot_dimension_numbers<[1], [0], [0], [1], [0, 0, 1, 1], [], []>} : vector<16x4xf32>, vector<4x256xf32>, vector<16x256xf32> -> vector<16x256xf32>
      %174 = arith.addf %167, %173 : vector<16x256xf32>
      %175 = vector.extract_strided_slice %168 {offsets = [0, 0, 1], sizes = [4, 16, 16], strides = [1, 1, 1]} : vector<4x16x18xf32> to vector<4x16x16xf32>
      %176 = vector.shape_cast %175 : vector<4x16x16xf32> to vector<4x256xf32>
      %c25 = arith.constant 25 : index
      %c0_91 = arith.constant 0 : index
      %c0_92 = arith.constant 0 : index
      %177 = vector.load %arg3[%c25, %c0_91, %c0_92] : memref<27x16x4xf32, #tpu.memory_space<vmem>>, vector<1x16x4xf32>
      %178 = vector.shape_cast %177 : vector<1x16x4xf32> to vector<16x4xf32>
      %cst_93 = arith.constant dense<0.000000e+00> : vector<16x256xf32>
      %179 = tpu.matmul %178, %176, %cst_93 {dimension_numbers = #tpu.dot_dimension_numbers<[1], [0], [0], [1], [0, 0, 1, 1], [], []>} : vector<16x4xf32>, vector<4x256xf32>, vector<16x256xf32> -> vector<16x256xf32>
      %180 = arith.addf %174, %179 : vector<16x256xf32>
      %181 = vector.extract_strided_slice %168 {offsets = [0, 0, 2], sizes = [4, 16, 16], strides = [1, 1, 1]} : vector<4x16x18xf32> to vector<4x16x16xf32>
      %182 = vector.shape_cast %181 : vector<4x16x16xf32> to vector<4x256xf32>
      %c26 = arith.constant 26 : index
      %c0_94 = arith.constant 0 : index
      %c0_95 = arith.constant 0 : index
      %183 = vector.load %arg3[%c26, %c0_94, %c0_95] : memref<27x16x4xf32, #tpu.memory_space<vmem>>, vector<1x16x4xf32>
      %184 = vector.shape_cast %183 : vector<1x16x4xf32> to vector<16x4xf32>
      %cst_96 = arith.constant dense<0.000000e+00> : vector<16x256xf32>
      %185 = tpu.matmul %184, %182, %cst_96 {dimension_numbers = #tpu.dot_dimension_numbers<[1], [0], [0], [1], [0, 0, 1, 1], [], []>} : vector<16x4xf32>, vector<4x256xf32>, vector<16x256xf32> -> vector<16x256xf32>
      %186 = arith.addf %180, %185 : vector<16x256xf32>
      %187 = vector.broadcast %0 : vector<16x1xf32> to vector<16x256xf32>
      %188 = arith.addf %186, %187 : vector<16x256xf32>
      %189 = vector.extract_strided_slice %188 {offsets = [0, 0], sizes = [8, 256], strides = [1, 1]} : vector<16x256xf32> to vector<8x256xf32>
      %190 = vector.extract_strided_slice %188 {offsets = [8, 0], sizes = [8, 256], strides = [1, 1]} : vector<16x256xf32> to vector<8x256xf32>
      %cst_97 = arith.constant 0.000000e+00 : f32
      %191 = vector.broadcast %cst_97 : f32 to vector<8x256xf32>
      %192 = arith.subf %191, %190 : vector<8x256xf32>
      %193 = math.exp %192 : vector<8x256xf32>
      %cst_98 = arith.constant 1.000000e+00 : f32
      %194 = vector.broadcast %cst_98 : f32 to vector<8x256xf32>
      %195 = arith.addf %194, %193 : vector<8x256xf32>
      %196 = tpu.reciprocal %195 {approx = true} : vector<8x256xf32> -> vector<8x256xf32>
      %197 = arith.mulf %189, %196 : vector<8x256xf32>
      %198 = vector.shape_cast %197 : vector<8x256xf32> to vector<8x1x256xf32>
      %c0_99 = arith.constant 0 : index
      %c0_100 = arith.constant 0 : index
      %199 = arith.index_cast %arg6 : i32 to index
      %c0_101 = arith.constant 0 : index
      %200 = vector.load %arg5[%c0_99, %c0_100, %199, %c0_101] : memref<1x8x16x256xf32, #tpu.memory_space<vmem>>, vector<1x8x1x256xf32>
      %201 = vector.shape_cast %200 : vector<1x8x1x256xf32> to vector<8x1x256xf32>
      %202 = vector.shape_cast %198 : vector<8x1x256xf32> to vector<1x8x1x256xf32>
      tpu.vector_store %arg5[%c0_99, %c0_100, %199, %c0_101], %202 {strides = array<i32>} : memref<1x8x16x256xf32, #tpu.memory_space<vmem>>, vector<1x8x1x256xf32>,
    }
    %c16_i32_1 = arith.constant 16 : i32
    return
  }
  func.func @transform_0(%arg0: i32, %arg1: i32) -> (i32, i32, i32, i32, i32) {
    %c0_i32 = arith.constant 0 : i32
    %c0_i32_0 = arith.constant 0 : i32
    %c0_i32_1 = arith.constant 0 : i32
    %c0_i32_2 = arith.constant 0 : i32
    %c0_i32_3 = arith.constant 0 : i32
    return %arg0, %c0_i32, %c0_i32_0, %c0_i32_1, %c0_i32_2 : i32, i32, i32, i32, i32
  }
  func.func @transform_1(%arg0: i32, %arg1: i32) -> (i32, i32, i32) {
    %c0_i32 = arith.constant 0 : i32
    %c0_i32_0 = arith.constant 0 : i32
    %c0_i32_1 = arith.constant 0 : i32
    %c0_i32_2 = arith.constant 0 : i32
    return %c0_i32, %c0_i32_0, %c0_i32_1 : i32, i32, i32
  }
  func.func @transform_2(%arg0: i32, %arg1: i32) -> (i32, i32) {
    %c0_i32 = arith.constant 0 : i32
    %c0_i32_0 = arith.constant 0 : i32
    %c0_i32_1 = arith.constant 0 : i32
    return %c0_i32, %c0_i32_0 : i32, i32
  }
  func.func @transform_3(%arg0: i32, %arg1: i32) -> (i32, i32, i32, i32) {
    %c0_i32 = arith.constant 0 : i32
    %c0_i32_0 = arith.constant 0 : i32
    %c0_i32_1 = arith.constant 0 : i32
    return %arg0, %c0_i32, %arg1, %c0_i32_0 : i32, i32, i32, i32
  }
}

</mosaic_0001>

<bundles_post_ra>
// kernel: tpu_custom_call.1
= control target key start
LH: loop header
LB: loop body
LE: loop exit
PB: predicated region body
PF: predicated region fallthrough
CT: control target
= control target key end

     0   :  { %8 = vsyncpa [#allocation3], 0  ;;  %s13167_s0 = inlined_call_operand.vmem [shape: f32[2,4,18,18,18], index: 0, kind: input, shape index: {}]   ;;  %s13168_s1 = inlined_call_operand.vmem [shape: f32[27,16,4], index: 1, kind: input, shape index: {}]   ;;  %s13169_s2 = inlined_call_operand.vmem [shape: f32[16,1], index: 2, kind: input, shape index: {}]   ;;  %s13170_s3 = inlined_call_operand.hbm [shape: f32[2,8,16,256], index: 3, kind: output, shape index: {}]  }
   0x1   :  { %10 = vsyncpa [#allocation3 + $0x1], 0  ;;  %s9845_s12 = smov 0   ;;  %s9847_s13 = smov 0  }
   0x2   :  { %s9849_s14 = smov 0   ;;  %s9851_s15 = smov 0  }
   0x3   :  { %s9853_s16 = smov 0   ;;  %s9855_s17 = smov 0  }
   0x4 LB: > { %s9290_s18 = sadd.s32 4294967295, %s9802_s17   ;;  %s9291_s19 = sadd.s32 4294967294, %s9802_s17   ;;  %s9802_s17 = sphi %s9855_s17, %s16_s17   ;;  %s9798_s16 = sphi %s9853_s16, %s13308_s16   ;;  %s9794_s15 = sphi %s9851_s15, %s13307_s15   ;;  %s9790_s14 = sphi %s9849_s14, %s13306_s14   ;;  %s9786_s13 = sphi %s9847_s13, %s13305_s13   ;;  %s9782_s12 = sphi %s9845_s12, %s13304_s12  }
   0x5   : > { %s28_s20 = sadd.s32 1, %s9798_s16  ;;  %s105_s21 = sadd.s32 1, %s9790_s14 }
   0x6   : > { %p30_p0 = scmp.ge.s32.totalorder %s28_s20, 2  ;;  %p115_p1 = scmp.ne.s32.totalorder %s9790_s14, %s9786_s13 }
   0x7   : > { %p116_p2 = scmp.eq.s32.totalorder %s9290_s18, 1  ;;  %p121_p3 = scmp.ne.s32.totalorder %s9786_s13, %s9782_s12 }
   0x8   : > { %s13310_s20 = smov (%p30_p0, %s28_s20), 0  ;;  %p122_p5 = scmp.eq.s32.totalorder %s9291_s19, 1 }
   0x9   : > { %p9885_p4 = por %p116_p2, %p115_p1  ;;  %s100_s23 = ssub.s32 %s9798_s16, %s13310_s20 }
   0xa   : > { %p9294_p6 = scmp.ge.s32.totalorder %s9802_s17, 1  ;;  %p103_p7 = scmp.eq.s32.totalorder %s100_s23, 0 }
   0xb   : > { %p9892_p8 = por %p122_p5, %p121_p3  ;;  %p154_p9 = scmp.lt.s32.totalorder %s9802_s17, 3 }
   0xc   : > { %s9898_s25 = scalar_select %p103_p7, %s9790_s14, %s105_s21  }
   0xd   : > { %p155_p10 = pnand %p9294_p6, %p154_p9 }
   0xf   : > { %158 = sbr.rel (%p155_p10) target bundleno = 2543 (0x9ef), region = 32 }
  0x16   : > { %s13175_s26 = sand.u32 1, %s9786_s13   ;;  %p178_p11 = scmp.lt.s32.totalorder %s9794_s15, 1  ;;  %v9905_v0 = vld [vmem:[%s13169_s2] sm:$0xff]  ;;  %v9910_v1 = vld [vmem:[%s13169_s2 + $0x8] sm:$0xff] }
  0x17   : > { %13223 = vst [vmem:[#allocation5_spill] sm:$0xff] %v9905_v0  ;;  %13224 = vst [vmem:[#allocation6_spill] sm:$0xff] %v9910_v1  ;;  %s9914_s4 = sshll.u32 %s13175_s26, 8  ;;  %s9923_s11 = smov 0  }
  0x18   : > { %s179_s5 = scalar_select %p178_p11, %s9794_s15, 1 }
  0x1a   : > { %s9610_s6 = smul.u32 1728, %s179_s5 }
  0x1c   : > { %s9920_s9 = scalar_lea.vmem %s13167_s0, %s9610_s6 }
  0x1d LB: >> { %v13171_v2 = vlaneseq  ;;  %v9808_v3 = vmov 1983009808   ;;  %v9809_v5 = vmov 1934713408   ;;  %v13172_v7 = vmov 0.0   ;;  %s192_s18 = smul.u32 24, %s9806_s11  ;;  %s9806_s11 = sphi %s9923_s11, %s191_s11  }
  0x1e   : >> { %v209_v4 = vunpack.c.l.s4 %v9808_v3  ;;  %v241_v6 = vunpack.c.l.s4 %v9809_v5  ;;  %740 = vmatprep.mubr.f32.mxu1 %v13172_v7  ;;  %4758 = vmatprep.mubr.f32.mxu0 %v13172_v7  ;;  %s9811_s21 = smov 64   ;;  %s9812_s23 = smov 32   ;;  %vm1172_vm0 = vcmask 1046528   ;;  %vm398_vm1 = vcmask 130048  }
  0x1f   : >> { %v9932_v8 = vshrl.u32 %v13171_v2, 7  ;;  %s9935_s19 = scalar_lea.vmem %s9920_s9, %s192_s18  ;;  %s9813_s27 = smov 96   ;;  %vm400_vm2 = vcmask 261120   ;;  %vm402_vm3 = vcmask 392192   ;;  %vm404_vm4 = vcmask 523264  }
  0x20   : >> { %v210_v9 = vunpack.c.0.s8 %v209_v4  ;;  %v9938_v10 = vld [vmem:[%s9935_s19] sm:$0xff]  ;;  %v9941_v11 = vld [vmem:[%s9935_s19 + $0x1b0] sm:$0xff]  ;;  %v242_v14 = vunpack.c.0.s8 %v241_v6  ;;  %v9957_v18 = vld [vmem:[%s9935_s19 + $0x8] sm:$0xff]  ;;  %s9814_s28 = smov 48   ;;  %s9815_s29 = smov 16   ;;  %vm406_vm5 = vcmask 654336  }
  0x21   : >> { %13225 = vst [vmem:[#allocation7_spill] sm:$0xff] %v9932_v8  ;;  %v9944_v12 = vld [vmem:[%s9935_s19 + $0x360] sm:$0xff]  ;;  %v9950_v15 = vld [vmem:[%s9935_s19 + $0x510] sm:$0xff]  ;;  %v9960_v19 = vld [vmem:[%s9935_s19 + $0x1b8] sm:$0xff]  ;;  %s9816_s30 = smov 80   ;;  %s9817_s5 = smov 112  }
  0x22   : >> { %v9947_v13 = vsub.s32 %v210_v9, %v9932_v8  ;;  %v207_v16 = vcombine.high %v9938_v10, %v9944_v12  ;;  %v206_v17 = vcombine.low %v9938_v10, %v9944_v12  ;;  %v223_v20 = vcombine.high %v9941_v11, %v9950_v15  ;;  %v9967_v22 = vld [vmem:[%s9935_s19 + $0x368] sm:$0xff]  ;;  %v9970_v23 = vld [vmem:[%s9935_s19 + $0x518] sm:$0xff]  ;;  %s9818_s6 = smov 127   ;;  %s9819_s7 = smov 126  }
  0x23   : >> { %v222_v21 = vcombine.low %v9941_v11, %v9950_v15  ;;  %v274_v26 = vcombine.low %v9957_v18, %v9967_v22  ;;  %v290_v27 = vcombine.low %v9960_v19, %v9970_v23  ;;  %v9980_v29 = vsub.s32 %v242_v14, %v9932_v8  ;;  %s9121_s10 = sand.u32 7, %s9806_s11 }
  0x24   : >> { %v221_v24 = vrot.slane %v207_v16, %v9947_v13  ;;  %v214_v25 = vrot.slane %v206_v17, %v9947_v13  ;;  %v237_v28 = vrot.slane %v223_v20, %v9947_v13  ;;  %v275_v41 = vcombine.high %v9957_v18, %v9967_v22 }
  0x25   : >> { %v230_v30 = vrot.slane %v222_v21, %v9947_v13  ;;  %v282_v31 = vrot.slane %v274_v26, %v9947_v13  ;;  %v298_v32 = vrot.slane %v290_v27, %v9947_v13  ;;  %v291_v42 = vcombine.high %v9960_v19, %v9970_v23  ;;  %v199_v26 = vld [vmem:[%s9935_s19 + $0x1c0] sm:$0x3]  ;;  %v202_v27 = vld [vmem:[%s9935_s19 + $0x370] sm:$0x3] }
  0x26   : >> { %v254_v33 = vcombine.low %v221_v24, %v237_v28  ;;  %v255_v36 = vcombine.high %v221_v24, %v237_v28  ;;  %v289_v46 = vrot.slane %v275_v41, %v9947_v13  ;;  %v1173_v61 = vrot.slane %v9938_v10, 1  ;;  %v205_v28 = vld [vmem:[%s9935_s19 + $0x520] sm:$0x3] }
  0x27   : >> { %v239_v34 = vcombine.high %v214_v25, %v230_v30  ;;  %v238_v35 = vcombine.low %v214_v25, %v230_v30  ;;  %v307_v37 = vcombine.high %v282_v31, %v298_v32  ;;  %v306_v40 = vcombine.low %v282_v31, %v298_v32  ;;  %v196_v25 = vld [vmem:[%s9935_s19 + $0x10] sm:$0x3] }
  0x28   : >> { %v262_v38 = vrot.slane %v254_v33, %v9980_v29  ;;  %v269_v43 = vrot.slane %v255_v36, %v9980_v29  ;;  %v305_v47 = vrot.slane %v291_v42, %v9947_v13  ;;  %v1174_v62 = vrot.slane %v9957_v18, 1 }
  0x29   : >> { %v253_v39 = vrot.slane %v239_v34, %v9980_v29  ;;  %v321_v44 = vrot.slane %v307_v37, %v9980_v29  ;;  %v9996_v45 = vrot.slane %v238_v35, %v9980_v29  ;;  %v10006_v50 = vrot.slane %v306_v40, %v9980_v29 }
  0x2a   : >> { %355 = vrot.lane.b32.xlu1 %v262_v38, %s9811_s21  ;;  %v272_v51 = vcombine.high %v262_v38, %v13172_v7  ;;  %v322_v53 = vcombine.low %v289_v46, %v305_v47  ;;  %v323_v54 = vcombine.high %v289_v46, %v305_v47  ;;  %v273_v56 = vcombine.high %v269_v43, %v13172_v7 }
  0x2b   : >> { %347 = vrot.lane.b32.xlu0 %v253_v39, %s9812_s23  ;;  %v271_v48 = vcombine.high %v253_v39, %v13172_v7  ;;  %v270_v49 = vcombine.high %v9996_v45, %v13172_v7  ;;  %v338_v52 = vcombine.high %v10006_v50, %v13172_v7  ;;  %v339_v55 = vcombine.high %v321_v44, %v13172_v7 }
  0x2c   : >> { %v330_v57 = vrot.slane %v322_v53, %v9980_v29  ;;  %v337_v59 = vrot.slane %v323_v54, %v9980_v29  ;;  %v1178_v63 = vrot.slane %v9941_v11, 1  ;;  %v1179_v3 = vrot.slane %v9960_v19, 1 }
  0x2d   : >> { %v1183_v4 = vrot.slane %v9944_v12, 1  ;;  %v1184_v5 = vrot.slane %v9967_v22, 1  ;;  %v1188_v6 = vrot.slane %v9950_v15, 1  ;;  %v1189_v9 = vrot.slane %v9970_v23, 1 }
  0x2e   : >> { %363 = vrot.lane.b32.xlu1 %v269_v43, %s9813_s27  ;;  %v340_v58 = vcombine.high %v330_v57, %v13172_v7  ;;  %v341_v60 = vcombine.high %v337_v59, %v13172_v7  ;;  %v10044_v14 = vsel %vm1172_vm0, %v1173_v61, %v1174_v62  ;;  %v10051_v16 = vsel %vm1172_vm0, %v1178_v63, %v1179_v3 }
  0x2f   : >> { %375 = vrot.lane.b32.xlu0 %v321_v44, %s9812_s23  ;;  %v10054_v17 = vsel %vm1172_vm0, %v1183_v4, %v1184_v5  ;;  %v10057_v20 = vsel %vm1172_vm0, %v1188_v6, %v1189_v9  ;;  %v1176_v32 = vrot.slane %v196_v25, 1  ;;  %v1181_v33 = vrot.slane %v199_v26, 1 }
  0x30   : >> { %v1201_v21 = vcombine.low %v10044_v14, %v10054_v17  ;;  %v1217_v24 = vcombine.low %v10051_v16, %v10057_v20  ;;  %v1186_v34 = vrot.slane %v202_v27, 1  ;;  %v1191_v35 = vrot.slane %v205_v28, 1 }
  0x31   : >> { %v1202_v37 = vcombine.high %v10044_v14, %v10054_v17  ;;  %v10086_v38 = vsel %vm1172_vm0, %v1174_v62, %v1176_v32  ;;  %vm408_vm6 = vcmask 785408   ;;  %vm410_vm7 = vcmask 916480  }
  0x32   : >> { %351 = vrot.lane.b32.xlu1 %v271_v48, %s9814_s28  ;;  %v1209_v30 = vrot.slane %v1201_v21, %v9947_v13  ;;  %v1225_v31 = vrot.slane %v1217_v24, %v9947_v13  ;;  %v10092_v39 = vsel %vm1172_vm0, %v1184_v5, %v1186_v34  ;;  %v10095_v40 = vsel %vm1172_vm0, %v1189_v9, %v1191_v35 }
  0x33   : >> { %343 = vrot.lane.b32.xlu0 %v270_v49, %s9815_s29  ;;  %v1269_v43 = vcombine.low %v10086_v38, %v10092_v39  ;;  %vm669_vm8 = vcmask 1043456   ;;  %vm662_vm9 = vcmask 31744   ;;  %vm2155_vm10 = vcmask 1045504  }
  0x34   : >> { %v1233_v36 = vcombine.low %v1209_v30, %v1225_v31  ;;  %v1234_v41 = vcombine.high %v1209_v30, %v1225_v31 }
  0x36   : >> { %371 = vrot.lane.b32.xlu1 %v338_v52, %s9815_s29  ;;  %v1248_v47 = vrot.slane %v1234_v41, %v9980_v29 }
  0x37   : >> { %359 = vrot.lane.b32.xlu0 %v272_v51, %s9816_s30 }
  0x38   : >> { %v1266_v49 = vcombine.high %v1248_v47, %v13172_v7 }
  0x3a   : >> { %379 = vrot.lane.b32.xlu1 %v339_v55, %s9814_s28 }
  0x3b   : >> { %367 = vrot.lane.b32.xlu0 %v273_v56, %s9817_s5 }
  0x3e   : >> { %387 = vrot.lane.b32.xlu1 %v340_v58, %s9816_s30 }
  0x3f   : >> { %383 = vrot.lane.b32.xlu0 %v330_v57, %s9811_s21 }
  0x42   : >> { %395 = vrot.lane.b32.xlu1 %v341_v60, %s9817_s5 }
  0x43   : >> { %391 = vrot.lane.b32.xlu0 %v337_v59, %s9813_s27 }
  0x46   : >> { %431 = vrot.lane.b32.xlu1 %v9957_v18, %s9818_s6 }
  0x47   : >> { %429 = vrot.lane.b32.xlu0 %v9938_v10, %s9818_s6 }
  0x4a   : >> { %435 = vrot.lane.b32.xlu1 %v9960_v19, %s9818_s6 }
  0x4b   : >> { %433 = vrot.lane.b32.xlu0 %v9941_v11, %s9818_s6 }
  0x4e   : >> { %439 = vrot.lane.b32.xlu1 %v9967_v22, %s9818_s6 }
  0x4f   : >> { %437 = vrot.lane.b32.xlu0 %v9944_v12, %s9818_s6 }
  0x52   : >> { %443 = vrot.lane.b32.xlu1 %v9970_v23, %s9818_s6 }
  0x53   : >> { %441 = vrot.lane.b32.xlu0 %v9950_v15, %s9818_s6 }
  0x56   : >> { %844 = vrot.lane.b32.xlu1 %v9957_v18, %s9819_s7  ;;  %v1218_v18 = vcombine.high %v10051_v16, %v10057_v20 }
  0x57   : >> { %842 = vrot.lane.b32.xlu0 %v9938_v10, %s9819_s7  ;;  %v10089_v10 = vsel %vm1172_vm0, %v1179_v3, %v1181_v33 }
  0x58   : >> { %v1232_v42 = vrot.slane %v1218_v18, %v9947_v13  ;;  %v1285_v44 = vcombine.low %v10089_v10, %v10095_v40 }
  0x5a   : >> { %848 = vrot.lane.b32.xlu1 %v9960_v19, %s9819_s7  ;;  %v10098_v19 = vrot.slane %v1233_v36, %v9980_v29  ;;  %v10121_v48 = vrot.slane %v1285_v44, %v9947_v13 }
  0x5b   : >> { %846 = vrot.lane.b32.xlu0 %v9941_v11, %s9819_s7  ;;  %v1216_v11 = vrot.slane %v1202_v37, %v9947_v13 }
  0x5c   : >> { %v1265_v46 = vcombine.high %v10098_v19, %v13172_v7 }
  0x5d   : >> { %v1250_v52 = vcombine.high %v1216_v11, %v1232_v42 }
  0x5e   : >> { %852 = vrot.lane.b32.xlu1 %v9967_v22, %s9819_s7  ;;  %v10118_v22 = vrot.slane %v1269_v43, %v9947_v13 }
  0x5f   : >> { %850 = vrot.lane.b32.xlu0 %v9944_v12, %s9819_s7  ;;  %v1249_v12 = vcombine.low %v1216_v11, %v1232_v42  ;;  %v1264_v53 = vrot.slane %v1250_v52, %v9980_v29 }
  0x61   : >> { %v1257_v51 = vrot.slane %v1249_v12, %v9980_v29  ;;  %v1268_v55 = vcombine.high %v1264_v53, %v13172_v7 }
  0x62   : >> { %856 = vrot.lane.b32.xlu1 %v9970_v23, %s9819_s7  ;;  %v1301_v23 = vcombine.low %v10118_v22, %v10121_v48 }
  0x63   : >> { %854 = vrot.lane.b32.xlu0 %v9950_v15, %s9819_s7  ;;  %v1267_v15 = vcombine.high %v1257_v51, %v13172_v7 }
  0x64   : >> { %v10134_v54 = vrot.slane %v1301_v23, %v9980_v29 }
  0x66   : >> { %1342 = vrot.lane.b32.xlu1 %v1248_v47, %s9812_s23  ;;  %v1333_v56 = vcombine.high %v10134_v54, %v13172_v7 }
  0x67   : >> { %1338 = vrot.lane.b32.xlu0 %v1265_v46, %s9815_s29 }
  0x6a   : >> { %1350 = vrot.lane.b32.xlu1 %v1257_v51, %s9811_s21 }
  0x6b   : >> { %1346 = vrot.lane.b32.xlu0 %v1266_v49, %s9814_s28 }
  0x6e   : >> { %1358 = vrot.lane.b32.xlu1 %v1264_v53, %s9813_s27 }
  0x6f   : >> { %1354 = vrot.lane.b32.xlu0 %v1267_v15, %s9816_s30 }
  0x72   : >> { %1366 = vrot.lane.b32.xlu1 %v1333_v56, %s9815_s29 }
  0x73   : >> { %1362 = vrot.lane.b32.xlu0 %v1268_v55, %s9817_s5 }
  0x9c   : >> { %v10143_v57 = vpop.permute.xlu1 %355 }
  0x9d   : >> { %v10145_v58 = vpop.permute.xlu0 %347 }
  0xa0   : >> { %v10147_v59 = vpop.permute.xlu1 %363 }
  0xa1   : >> { %v10149_v60 = vpop.permute.xlu0 %375 }
  0xa4   : >> { %v10151_v61 = vpop.permute.xlu1 %351 }
  0xa5   : >> { %v10153_v62 = vpop.permute.xlu0 %343 }
  0xa8   : >> { %v10155_v63 = vpop.permute.xlu1 %371 }
  0xa9   : >> { %v10157_v3 = vpop.permute.xlu0 %359 }
  0xac   : >> { %v10159_v4 = vpop.permute.xlu1 %379 }
  0xad   : >> { %v10161_v5 = vpop.permute.xlu0 %367 }
  0xb0   : >> { %v10163_v6 = vpop.permute.xlu1 %387 }
  0xb1   : >> { %v10165_v9 = vpop.permute.xlu0 %383 }
  0xb4   : >> { %v10167_v21 = vpop.permute.xlu1 %395 }
  0xb5   : >> { %v10169_v24 = vpop.permute.xlu0 %391 }
  0xb8   : >> { %v432_v25 = vpop.permute.xlu1 %431 }
  0xb9   : >> { %v430_v26 = vpop.permute.xlu0 %429 }
  0xbc   : >> { %v436_v27 = vpop.permute.xlu1 %435 }
  0xbd   : >> { %v434_v28 = vpop.permute.xlu0 %433 }
  0xc0   : >> { %v440_v30 = vpop.permute.xlu1 %439 }
  0xc1   : >> { %v438_v31 = vpop.permute.xlu0 %437  ;;  %v521_v33 = vcombine.low %v432_v25, %v440_v30  ;;  %v522_v35 = vcombine.high %v432_v25, %v440_v30 }
  0xc2   : >> { %v453_v32 = vcombine.low %v430_v26, %v438_v31  ;;  %v454_v34 = vcombine.high %v430_v26, %v438_v31 }
  0xc3   : >> { %v10175_v44 = vrot.slane %v521_v33, %v9947_v13  ;;  %v536_v15 = vrot.slane %v522_v35, %v9947_v13 }
  0xc4   : >> { %v10172_v36 = vrot.slane %v453_v32, %v9947_v13  ;;  %v444_v37 = vpop.permute.xlu1 %443  ;;  %v468_v46 = vrot.slane %v454_v34, %v9947_v13 }
  0xc5   : >> { %v442_v18 = vpop.permute.xlu0 %441  ;;  %v537_v41 = vcombine.low %v436_v27, %v444_v37  ;;  %v538_v11 = vcombine.high %v436_v27, %v444_v37 }
  0xc6   : >> { %v469_v42 = vcombine.low %v434_v28, %v442_v18  ;;  %v470_v43 = vcombine.high %v434_v28, %v442_v18 }
  0xc7   : >> { %v10179_v47 = vrot.slane %v537_v41, %v9947_v13  ;;  %v552_v12 = vrot.slane %v538_v11, %v9947_v13 }
  0xc8   : >> { %v10183_v49 = vrot.slane %v469_v42, %v9947_v13  ;;  %v484_v51 = vrot.slane %v470_v43, %v9947_v13  ;;  %v845_v52 = vpop.permute.xlu1 %844 }
  0xc9   : >> { %v843_v23 = vpop.permute.xlu0 %842  ;;  %v554_v53 = vcombine.high %v10175_v44, %v10179_v47  ;;  %v569_v27 = vcombine.low %v536_v15, %v552_v12  ;;  %v570_v33 = vcombine.high %v536_v15, %v552_v12 }
  0xca   : >> { %v486_v55 = vcombine.high %v10172_v36, %v10183_v49  ;;  %v501_v56 = vcombine.low %v468_v46, %v484_v51  ;;  %v502_v37 = vcombine.high %v468_v46, %v484_v51 }
  0xcb   : >> { %v10192_v25 = vrot.slane %v554_v53, %v9980_v29  ;;  %v577_v32 = vrot.slane %v569_v27, %v9980_v29  ;;  %v584_v42 = vrot.slane %v570_v33, %v9980_v29 }
  0xcc   : >> { %v500_v26 = vrot.slane %v486_v55, %v9980_v29  ;;  %v849_v28 = vpop.permute.xlu1 %848  ;;  %v509_v31 = vrot.slane %v501_v56, %v9980_v29  ;;  %v516_v27 = vrot.slane %v502_v37, %v9980_v29 }
  0xcd   : >> { %v847_v30 = vpop.permute.xlu0 %846  ;;  %622 = vrot.lane.b32.xlu0 %v10192_v25, %s9812_s23 }
  0xce   : >> { %594 = vrot.lane.b32.xlu1 %v500_v26, %s9812_s23 }
  0xd0   : >> { %v853_v34 = vpop.permute.xlu1 %852 }
  0xd1   : >> { %v851_v35 = vpop.permute.xlu0 %850  ;;  %630 = vrot.lane.b32.xlu0 %v577_v32, %s9811_s21  ;;  %v934_v41 = vcombine.low %v845_v52, %v853_v34  ;;  %v935_v43 = vcombine.high %v845_v52, %v853_v34 }
  0xd2   : >> { %v866_v18 = vcombine.low %v843_v23, %v851_v35  ;;  %v867_v11 = vcombine.high %v843_v23, %v851_v35  ;;  %602 = vrot.lane.b32.xlu1 %v509_v31, %s9811_s21 }
  0xd3   : >> { %v942_v51 = vrot.slane %v934_v41, %v9947_v13 }
  0xd4   : >> { %v874_v53 = vrot.slane %v866_v18, %v9947_v13  ;;  %v857_v55 = vpop.permute.xlu1 %856  ;;  %v881_v23 = vrot.slane %v867_v11, %v9947_v13 }
  0xd5   : >> { %v855_v56 = vpop.permute.xlu0 %854  ;;  %v950_v12 = vcombine.low %v849_v28, %v857_v55  ;;  %v951_v15 = vcombine.high %v849_v28, %v857_v55  ;;  %638 = vrot.lane.b32.xlu0 %v584_v42, %s9813_s27  ;;  %v949_v28 = vrot.slane %v935_v43, %v9947_v13  ;;  %v485_v43 = vcombine.low %v10172_v36, %v10183_v49 }
  0xd6   : >> { %v882_v2 = vcombine.low %v847_v30, %v855_v56  ;;  %v883_v46 = vcombine.high %v847_v30, %v855_v56  ;;  %610 = vrot.lane.b32.xlu1 %v516_v27, %s9813_s27  ;;  %v518_v49 = vcombine.high %v500_v26, %v13172_v7  ;;  %v588_v26 = vcombine.high %v584_v42, %v13172_v7 }
  0xd7   : >> { %v958_v52 = vrot.slane %v950_v12, %v9947_v13  ;;  %v965_v33 = vrot.slane %v951_v15, %v9947_v13  ;;  %v1270_v42 = vcombine.high %v10086_v38, %v10092_v39 }
  0xd8   : >> { %v890_v34 = vrot.slane %v882_v2, %v9947_v13  ;;  %v897_v35 = vrot.slane %v883_v46, %v9947_v13  ;;  %v553_v2 = vcombine.low %v10175_v44, %v10179_v47 }
  0xd9   : >> { %v967_v37 = vcombine.high %v942_v51, %v958_v52  ;;  %v982_v11 = vcombine.low %v949_v28, %v965_v33  ;;  %v983_v15 = vcombine.high %v949_v28, %v965_v33  ;;  %v966_v33 = vcombine.low %v942_v51, %v958_v52 }
  0xda   : >> { %v899_v30 = vcombine.high %v874_v53, %v890_v34  ;;  %v914_v18 = vcombine.low %v881_v23, %v897_v35  ;;  %v915_v46 = vcombine.high %v881_v23, %v897_v35  ;;  %v10232_v44 = vrot.slane %v553_v2, %v9980_v29 }
  0xdb   : >> { %v981_v55 = vrot.slane %v967_v37, %v9980_v29  ;;  %v990_v12 = vrot.slane %v982_v11, %v9980_v29  ;;  %v997_v37 = vrot.slane %v983_v15, %v9980_v29  ;;  %v586_v23 = vcombine.high %v10192_v25, %v13172_v7 }
  0xdc   : >> { %v913_v41 = vrot.slane %v899_v30, %v9980_v29  ;;  %v922_v56 = vrot.slane %v914_v18, %v9980_v29  ;;  %v929_v30 = vrot.slane %v915_v46, %v9980_v29  ;;  %v10229_v18 = vrot.slane %v485_v43, %v9980_v29 }
  0xdd   : >> { %1035 = vrot.lane.b32.xlu0 %v981_v55, %s9812_s23  ;;  %v585_v47 = vcombine.high %v10232_v44, %v13172_v7  ;;  %v898_v35 = vcombine.low %v874_v53, %v890_v34  ;;  %v519_v28 = vcombine.high %v509_v31, %v13172_v7  ;;  %v587_v11 = vcombine.high %v577_v32, %v13172_v7 }
  0xde   : >> { %1007 = vrot.lane.b32.xlu1 %v913_v41, %s9812_s23  ;;  %v517_v36 = vcombine.high %v10229_v18, %v13172_v7  ;;  %v520_v2 = vcombine.high %v516_v27, %v13172_v7  ;;  %v10254_v25 = vrot.slane %v966_v33, %v9980_v29  ;;  %v1286_v53 = vcombine.high %v10089_v10, %v10095_v40  ;;  %v10317_v33 = vpop.permute.xlu0 %1338 }
  0xdf   : >> { %v10257_v43 = vrot.slane %v898_v35, %v9980_v29  ;;  %v999_v27 = vcombine.high %v981_v55, %v13172_v7  ;;  %v931_v51 = vcombine.high %v913_v41, %v13172_v7  ;;  %v1302_v52 = vcombine.high %v10118_v22, %v10121_v48 }
  0xe0   : >> { %v998_v31 = vcombine.high %v10254_v25, %v13172_v7  ;;  %v1284_v34 = vrot.slane %v1270_v42, %v9947_v13  ;;  %v1300_v15 = vrot.slane %v1286_v53, %v9947_v13  ;;  %v1000_v46 = vcombine.high %v990_v12, %v13172_v7 }
  0xe1   : >> { %1043 = vrot.lane.b32.xlu0 %v990_v12, %s9811_s21  ;;  %v930_v32 = vcombine.high %v10257_v43, %v13172_v7  ;;  %v1316_v55 = vrot.slane %v1302_v52, %v9980_v29 }
  0xe2   : >> { %1015 = vrot.lane.b32.xlu1 %v922_v56, %s9811_s21  ;;  %v1317_v41 = vcombine.low %v1284_v34, %v1300_v15 }
  0xe3   : >> { %v1334_v22 = vcombine.high %v1316_v55, %v13172_v7 }
  0xe4   : >> { %v1325_v48 = vrot.slane %v1317_v41, %v9980_v29 }
  0xe5   : >> { %1051 = vrot.lane.b32.xlu0 %v997_v37, %s9813_s27 }
  0xe6   : >> { %1023 = vrot.lane.b32.xlu1 %v929_v30, %s9813_s27  ;;  %v1335_v12 = vcombine.high %v1325_v48, %v13172_v7 }
  0xe9   : >> { %590 = vrot.lane.b32.xlu0 %v517_v36, %s9815_s29  ;;  %v932_v36 = vcombine.high %v922_v56, %v13172_v7  ;;  %v1318_v56 = vcombine.high %v1284_v34, %v1300_v15 }
  0xea   : >> { %618 = vrot.lane.b32.xlu1 %v585_v47, %s9815_s29  ;;  %v1001_v47 = vcombine.high %v997_v37, %v13172_v7 }
  0xed   : >> { %598 = vrot.lane.b32.xlu0 %v518_v49, %s9814_s28  ;;  %v933_v49 = vcombine.high %v929_v30, %v13172_v7  ;;  %v10315_v30 = vpop.permute.xlu1 %1342 }
  0xee   : >> { %626 = vrot.lane.b32.xlu1 %v586_v23, %s9814_s28  ;;  %v1332_v23 = vrot.slane %v1318_v56, %v9980_v29 }
  0xf0   : >> { %v1336_v37 = vcombine.high %v1332_v23, %v13172_v7 }
  0xf1   : >> { %606 = vrot.lane.b32.xlu0 %v519_v28, %s9816_s30  ;;  %v10319_v35 = vpop.permute.xlu1 %1350  ;;  %v10321_v28 = vpop.permute.xlu0 %1346 }
  0xf2   : >> { %634 = vrot.lane.b32.xlu1 %v587_v11, %s9816_s30 }
  0xf5   : >> { %614 = vrot.lane.b32.xlu0 %v520_v2, %s9817_s5  ;;  %v10323_v11 = vpop.permute.xlu1 %1358  ;;  %v10325_v2 = vpop.permute.xlu0 %1354 }
  0xf6   : >> { %642 = vrot.lane.b32.xlu1 %v588_v26, %s9817_s5 }
  0xf9   : >> { %1003 = vrot.lane.b32.xlu0 %v930_v32, %s9815_s29  ;;  %v10327_v26 = vpop.permute.xlu1 %1366 }
  0xfa   : >> { %1031 = vrot.lane.b32.xlu1 %v998_v31, %s9815_s29  ;;  %v10329_v31 = vpop.permute.xlu0 %1362 }
  0xfd   : >> { %1011 = vrot.lane.b32.xlu0 %v931_v51, %s9814_s28 }
  0xfe   : >> { %1039 = vrot.lane.b32.xlu1 %v999_v27, %s9814_s28 }
 0x101   : >> { %1019 = vrot.lane.b32.xlu0 %v932_v36, %s9816_s30 }
 0x102   : >> { %1047 = vrot.lane.b32.xlu1 %v1000_v46, %s9816_s30 }
 0x105   : >> { %1027 = vrot.lane.b32.xlu0 %v933_v49, %s9817_s5 }
 0x106   : >> { %1055 = vrot.lane.b32.xlu1 %v1001_v47, %s9817_s5  ;;  %v399_v47 = vsel %vm398_vm1, %v9996_v45, %v10153_v62 }
 0x109   : >> { %1370 = vrot.lane.b32.xlu0 %v1316_v55, %s9812_s23 }
 0x10a   : >> { %1374 = vrot.lane.b32.xlu1 %v1334_v22, %s9814_s28 }
 0x10d   : >> { %1378 = vrot.lane.b32.xlu0 %v1325_v48, %s9811_s21 }
 0x10e   : >> { %1382 = vrot.lane.b32.xlu1 %v1335_v12, %s9816_s30  ;;  %v401_v12 = vsel %vm400_vm2, %v399_v47, %v10145_v58 }
 0x111   : >> { %1386 = vrot.lane.b32.xlu0 %v1332_v23, %s9813_s27  ;;  %v412_v23 = vsel %vm398_vm1, %v10006_v50, %v10155_v63 }
 0x112   : >> { %1390 = vrot.lane.b32.xlu1 %v1336_v37, %s9817_s5  ;;  %v413_v58 = vsel %vm400_vm2, %v412_v23, %v10149_v60 }
 0x113   : >> { %v414_v50 = vsel %vm402_vm3, %v413_v58, %v10159_v4 }
 0x114   : >> { %v415_v63 = vsel %vm404_vm4, %v414_v50, %v10165_v9 }
 0x115   : >> { %1503 = vrot.lane.b32.xlu0 %v10044_v14, %s9818_s6  ;;  %v416_v4 = vsel %vm406_vm5, %v415_v63, %v10163_v6  ;;  %v9297_v6 = vld [vmem:[%s13168_s1 + $0x10] sm:$0xff]  ;;  %v1393_v63 = vsel %vm398_vm1, %v10098_v19, %v10317_v33 }
 0x116   : >> { %1505 = vrot.lane.b32.xlu1 %v10086_v38, %s9818_s6 }
 0x119   : >> { %1507 = vrot.lane.b32.xlu0 %v10051_v16, %s9818_s6 }
 0x11a   : >> { %1509 = vrot.lane.b32.xlu1 %v10089_v10, %s9818_s6 }
 0x11d   : >> { %1511 = vrot.lane.b32.xlu0 %v10054_v17, %s9818_s6 }
 0x11e   : >> { %1513 = vrot.lane.b32.xlu1 %v10092_v39, %s9818_s6 }
 0x121   : >> { %1515 = vrot.lane.b32.xlu0 %v10057_v20, %s9818_s6 }
 0x122   : >> { %1517 = vrot.lane.b32.xlu1 %v10095_v40, %s9818_s6 }
 0x13f   : >> { %v623_v42 = vpop.permute.xlu0 %622 }
 0x140   : >> { %v595_v32 = vpop.permute.xlu1 %594 }
 0x143   : >> { %v631_v27 = vpop.permute.xlu0 %630 }
 0x144   : >> { %v603_v53 = vpop.permute.xlu1 %602 }
 0x147   : >> { %v639_v52 = vpop.permute.xlu0 %638 }
 0x148   : >> { %v611_v51 = vpop.permute.xlu1 %610 }
 0x14f   : >> { %v10333_v15 = vpop.permute.xlu0 %1035 }
 0x150   : >> { %v10331_v34 = vpop.permute.xlu1 %1007 }
 0x153   : >> { %v10337_v36 = vpop.permute.xlu0 %1043 }
 0x154   : >> { %v10335_v46 = vpop.permute.xlu1 %1015 }
 0x157   : >> { %v10341_v41 = vpop.permute.xlu0 %1051 }
 0x158   : >> { %v10339_v55 = vpop.permute.xlu1 %1023 }
 0x15b   : >> { %v591_v22 = vpop.permute.xlu0 %590 }
 0x15c   : >> { %v619_v49 = vpop.permute.xlu1 %618  ;;  %v645_v56 = vsel %vm398_vm1, %v10229_v18, %v591_v22  ;;  %v403_v18 = vsel %vm402_vm3, %v401_v12, %v10151_v61 }
 0x15d   : >> { %v652_v48 = vsel %vm398_vm1, %v10232_v44, %v619_v49  ;;  %v646_v45 = vsel %vm400_vm2, %v645_v56, %v595_v32  ;;  %v405_v61 = vsel %vm404_vm4, %v403_v18, %v10143_v57  ;;  %v419_v18 = vld [vmem:[%s13168_s1] sm:$0xff] }
 0x15e   : >> { %v653_v7 = vsel %vm400_vm2, %v652_v48, %v623_v42  ;;  %v407_v9 = vsel %vm406_vm5, %v405_v61, %v10157_v3 }
 0x15f   : >> { %v599_v62 = vpop.permute.xlu0 %598  ;;  %v409_v3 = vsel %vm408_vm6, %v407_v9, %v10147_v59 }
 0x160   : >> { %v627_v37 = vpop.permute.xlu1 %626  ;;  %v647_v44 = vsel %vm402_vm3, %v646_v45, %v599_v62 }
 0x161   : >> { %v654_v8 = vsel %vm402_vm3, %v653_v7, %v627_v37  ;;  %v648_v7 = vsel %vm404_vm4, %v647_v44, %v603_v53  ;;  %v13226_v37 = vmov 0.0  }
 0x162   : >> { %v655_v42 = vsel %vm404_vm4, %v654_v8, %v631_v27  ;;  %v417_v8 = vsel %vm408_vm6, %v416_v4, %v10169_v24 }
 0x163   : >> { %v607_v47 = vpop.permute.xlu0 %606  ;;  %v418_v24 = vsel %vm410_vm7, %v417_v8, %v10167_v21 }
 0x164   : >> { %v635_v32 = vpop.permute.xlu1 %634  ;;  %v649_v60 = vsel %vm406_vm5, %v648_v7, %v607_v47 }
 0x165   : >> { %v656_v49 = vsel %vm406_vm5, %v655_v42, %v635_v32  ;;  %v650_v22 = vsel %vm408_vm6, %v649_v60, %v611_v51  ;;  %v411_v51 = vsel %vm410_vm7, %v409_v3, %v10161_v5  ;;  %v9298_v5 = vld [vmem:[%s13168_s1 + $0x18] sm:$0xff] }
 0x166   : >> { %v657_v57 = vsel %vm408_vm6, %v656_v49, %v639_v52 }
 0x167   : >> { %v615_v27 = vpop.permute.xlu0 %614 }
 0x168   : >> { %v643_v53 = vpop.permute.xlu1 %642  ;;  %v651_v56 = vsel %vm410_vm7, %v650_v22, %v615_v27 }
 0x169   : >> { %v658_v48 = vsel %vm410_vm7, %v657_v57, %v643_v53 }
 0x16a   : >> { %9299 = vmatprep.subr.msk.mxu1 %vm669_vm8, %v658_v48 }
 0x16b   : >> { %9300 = vmatpush1.msk.msra.mxu1 %vm669_vm8, %v651_v56  ;;  %v1004_v12 = vpop.permute.xlu0 %1003 }
 0x16c   : >> { %v1032_v52 = vpop.permute.xlu1 %1031  ;;  %9303 = vmatprep.subr.msk.mxu1 %vm669_vm8, %v418_v24  ;;  %9301 = vmatmul.mubr.msk.f32.vlgmr.msra.gmra.mrb[0].mxu1 %vm662_vm9, %v9297_v6  ;;  %v1058_v59 = vsel %vm398_vm1, %v10257_v43, %v1004_v12 }
 0x16d   : >> { %v1065_v23 = vsel %vm398_vm1, %v10254_v25, %v1032_v52  ;;  %9304 = vmatpush1.msk.msra.mxu1 %vm669_vm8, %v411_v51  ;;  %746 = vmatprep.mubr.f32.mxu1 %v13226_v37  ;;  %v1059_v62 = vsel %vm400_vm2, %v1058_v59, %v10331_v34 }
 0x16e   : >> { %v1066_v45 = vsel %vm400_vm2, %v1065_v23, %v10333_v15 }
 0x16f   : >> { %v1012_v44 = vpop.permute.xlu0 %1011 }
 0x170   : >> { %v1040_v21 = vpop.permute.xlu1 %1039  ;;  %9302 = vmatmul.mubr.msk.f32.gmra.mrb[2].mxu1 %vm662_vm9, %v9298_v5  ;;  %v1060_v43 = vsel %vm402_vm3, %v1059_v62, %v1012_v44 }
 0x171   : >> { %v1067_v25 = vsel %vm402_vm3, %v1066_v45, %v1040_v21  ;;  %829 = vmatprep.mubr.f32.mxu1 %v13226_v37  ;;  %v1061_v34 = vsel %vm404_vm4, %v1060_v43, %v10335_v46  ;;  %v1394_v46 = vsel %vm400_vm2, %v1393_v63, %v10315_v30  ;;  %v9307_v30 = vld [vmem:[%s13168_s1 + $0x20] sm:$0xff] }
 0x172   : >> { %v1068_v15 = vsel %vm404_vm4, %v1067_v25, %v10337_v36  ;;  %v420_v36 = vld [vmem:[%s13168_s1 + $0x8] sm:$0xff] }
 0x173   : >> { %v1020_v50 = vpop.permute.xlu0 %1019 }
 0x174   : >> { %v1048_v58 = vpop.permute.xlu1 %1047  ;;  %9305 = vmatmul.mubr.msk.f32.vlgmr.msra.gmra.mrb[0].mxu1 %vm662_vm9, %v419_v18  ;;  %v1062_v42 = vsel %vm406_vm5, %v1061_v34, %v1020_v50 }
 0x175   : >> { %v1069_v32 = vsel %vm406_vm5, %v1068_v15, %v1048_v58  ;;  %835 = vmatprep.mubr.f32.mxu1 %v13226_v37  ;;  %v1063_v19 = vsel %vm408_vm6, %v1062_v42, %v10339_v55  ;;  %v1400_v55 = vsel %vm398_vm1, %v10134_v54, %v10327_v26 }
 0x176   : >> { %v1070_v47 = vsel %vm408_vm6, %v1069_v32, %v10341_v41  ;;  %v1395_v41 = vsel %vm402_vm3, %v1394_v46, %v10321_v28 }
 0x177   : >> { %v1028_v33 = vpop.permute.xlu0 %1027  ;;  %v1396_v8 = vsel %vm404_vm4, %v1395_v41, %v10319_v35 }
 0x178   : >> { %v1056_v7 = vpop.permute.xlu1 %1055  ;;  %9306 = vmatmul.mubr.msk.f32.gmra.mrb[2].mxu1 %vm662_vm9, %v420_v36  ;;  %v1064_v49 = vsel %vm410_vm7, %v1063_v19, %v1028_v33  ;;  %v1397_v57 = vsel %vm406_vm5, %v1396_v8, %v10325_v2 }
 0x179   : >> { %v1071_v61 = vsel %vm410_vm7, %v1070_v47, %v1056_v7  ;;  %1151 = vmatprep.mubr.f32.mxu1 %v13226_v37  ;;  %v1398_v26 = vsel %vm408_vm6, %v1397_v57, %v10323_v11 }
 0x17a   : >> { %9309 = vmatprep.subr.msk.mxu1 %vm669_vm8, %v1071_v61  ;;  %v1399_v3 = vsel %vm410_vm7, %v1398_v26, %v10329_v31 }
 0x17b   : >> { %9310 = vmatpush1.msk.msra.mxu1 %vm669_vm8, %v1064_v49  ;;  %v1371_v60 = vpop.permute.xlu0 %1370 }
 0x17c   : >> { %v1375_v4 = vpop.permute.xlu1 %1374  ;;  %9311 = vmatmul.mubr.msk.f32.vlgmr.msra.gmra.mrb[0].mxu1 %vm662_vm9, %v9307_v30  ;;  %v1401_v9 = vsel %vm400_vm2, %v1400_v55, %v1371_v60 }
 0x17d   : >> { %1157 = vmatprep.mubr.f32.mxu1 %v13226_v37  ;;  %v1402_v53 = vsel %vm402_vm3, %v1401_v9, %v1375_v4 }
 0x17f   : >> { %v1379_v28 = vpop.permute.xlu0 %1378 }
 0x180   : >> { %v1383_v27 = vpop.permute.xlu1 %1382  ;;  %v1403_v54 = vsel %vm404_vm4, %v1402_v53, %v1379_v28 }
 0x181   : >> { %v1404_v22 = vsel %vm406_vm5, %v1403_v54, %v1383_v27  ;;  %v9308_v27 = vld [vmem:[%s13168_s1 + $0x28] sm:$0xff] }
 0x182   : >> { %9312 = vmatmul.mubr.msk.f32.gmra.mrb[2].mxu1 %vm662_vm9, %v9308_v27 }
 0x183   : >> { %v1387_v48 = vpop.permute.xlu0 %1386  ;;  %1486 = vmatprep.mubr.f32.mxu1 %v13226_v37 }
 0x184   : >> { %v1391_v56 = vpop.permute.xlu1 %1390  ;;  %v1405_v6 = vsel %vm408_vm6, %v1404_v22, %v1387_v48  ;;  %v9313_v48 = vld [vmem:[%s13168_s1 + $0x30] sm:$0xff] }
 0x185   : >> { %v1406_v35 = vsel %vm410_vm7, %v1405_v6, %v1391_v56 }
 0x186   : >> { %9315 = vmatprep.subr.msk.mxu1 %vm669_vm8, %v1406_v35 }
 0x187   : >> { %9316 = vmatpush1.msk.msra.mxu1 %vm669_vm8, %v1399_v3  ;;  %v1504_v2 = vpop.permute.xlu0 %1503 }
 0x188   : >> { %v1506_v24 = vpop.permute.xlu1 %1505  ;;  %9317 = vmatmul.mubr.msk.f32.vlgmr.msra.gmra.mrb[0].mxu1 %vm662_vm9, %v9313_v48 }
 0x189   : >> { %1492 = vmatprep.mubr.f32.mxu1 %v13226_v37 }
 0x18b   : >> { %v1508_v51 = vpop.permute.xlu0 %1507 }
 0x18c   : >> { %v1510_v52 = vpop.permute.xlu1 %1509 }
 0x18f   : >> { %v1512_v11 = vpop.permute.xlu0 %1511 }
 0x190   : >> { %v1514_v12 = vpop.permute.xlu1 %1513  ;;  %v1527_v23 = vcombine.low %v1504_v2, %v1512_v11  ;;  %v1528_v62 = vcombine.high %v1504_v2, %v1512_v11 }
 0x191   : >> { %v1595_v43 = vcombine.low %v1506_v24, %v1514_v12  ;;  %v1596_v7 = vcombine.high %v1506_v24, %v1514_v12 }
 0x192   : >> { %v1535_v44 = vrot.slane %v1527_v23, %v9947_v13  ;;  %v1542_v15 = vrot.slane %v1528_v62, %v9947_v13 }
 0x193   : >> { %v1516_v59 = vpop.permute.xlu0 %1515  ;;  %v1603_v63 = vrot.slane %v1595_v43, %v9947_v13  ;;  %v1610_v30 = vrot.slane %v1596_v7, %v9947_v13 }
 0x194   : >> { %v1543_v5 = vcombine.low %v1508_v51, %v1516_v59  ;;  %v1544_v21 = vcombine.high %v1508_v51, %v1516_v59  ;;  %v1518_v45 = vpop.permute.xlu1 %1517 }
 0x195   : >> { %v1611_v18 = vcombine.low %v1510_v52, %v1518_v45  ;;  %v1612_v47 = vcombine.high %v1510_v52, %v1518_v45 }
 0x196   : >> { %v1551_v31 = vrot.slane %v1543_v5, %v9947_v13  ;;  %v1558_v25 = vrot.slane %v1544_v21, %v9947_v13 }
 0x197   : >> { %v1619_v32 = vrot.slane %v1611_v18, %v9947_v13  ;;  %v1626_v41 = vrot.slane %v1612_v47, %v9947_v13 }
 0x198   : >> { %v1559_v58 = vcombine.low %v1535_v44, %v1551_v31  ;;  %v1560_v34 = vcombine.high %v1535_v44, %v1551_v31  ;;  %v1575_v36 = vcombine.low %v1542_v15, %v1558_v25  ;;  %v1576_v61 = vcombine.high %v1542_v15, %v1558_v25 }
 0x199   : >> { %v1627_v19 = vcombine.low %v1603_v63, %v1619_v32  ;;  %v1628_v55 = vcombine.high %v1603_v63, %v1619_v32  ;;  %v1643_v8 = vcombine.low %v1610_v30, %v1626_v41  ;;  %v1644_v54 = vcombine.high %v1610_v30, %v1626_v41 }
 0x19a   : >> { %v10473_v50 = vrot.slane %v1559_v58, %v9980_v29  ;;  %v1574_v42 = vrot.slane %v1560_v34, %v9980_v29  ;;  %v1583_v33 = vrot.slane %v1575_v36, %v9980_v29  ;;  %v1590_v60 = vrot.slane %v1576_v61, %v9980_v29 }
 0x19b   : >> { %v1635_v4 = vrot.slane %v1627_v19, %v9980_v29  ;;  %v1642_v28 = vrot.slane %v1628_v55, %v9980_v29  ;;  %v1651_v22 = vrot.slane %v1643_v8, %v9980_v29  ;;  %v1658_v6 = vrot.slane %v1644_v54, %v9980_v29 }
 0x19c   : >> { %v1591_v46 = vcombine.high %v10473_v50, %v13226_v37  ;;  %1668 = vrot.lane.b32.xlu1 %v1574_v42, %s9812_s23  ;;  %v1592_v49 = vcombine.high %v1574_v42, %v13226_v37  ;;  %v1593_v9 = vcombine.high %v1583_v33, %v13226_v37  ;;  %v1594_v57 = vcombine.high %v1590_v60, %v13226_v37 }
 0x19d   : >> { %v1659_v53 = vcombine.high %v1635_v4, %v13226_v37  ;;  %v1660_v26 = vcombine.high %v1642_v28, %v13226_v37  ;;  %v1661_v56 = vcombine.high %v1651_v22, %v13226_v37  ;;  %v1662_v35 = vcombine.high %v1658_v6, %v13226_v37 }
 0x19e   : >> { %1664 = vrot.lane.b32.xlu0 %v1591_v46, %s9815_s29 }
 0x1a0   : >> { %1676 = vrot.lane.b32.xlu1 %v1583_v33, %s9811_s21 }
 0x1a2   : >> { %1672 = vrot.lane.b32.xlu0 %v1592_v49, %s9814_s28 }
 0x1a4   : >> { %1684 = vrot.lane.b32.xlu1 %v1590_v60, %s9813_s27 }
 0x1a6   : >> { %1680 = vrot.lane.b32.xlu0 %v1593_v9, %s9816_s30 }
 0x1a8   : >> { %1692 = vrot.lane.b32.xlu1 %v1659_v53, %s9815_s29 }
 0x1aa   : >> { %1688 = vrot.lane.b32.xlu0 %v1594_v57, %s9817_s5 }
 0x1ac   : >> { %1700 = vrot.lane.b32.xlu1 %v1660_v26, %s9814_s28 }
 0x1ae   : >> { %1696 = vrot.lane.b32.xlu0 %v1642_v28, %s9812_s23 }
 0x1b0   : >> { %1708 = vrot.lane.b32.xlu1 %v1661_v56, %s9816_s30  ;;  %v10567_v56 = vld [vmem:[%s9935_s19 + $0x8] sm:$0xff] }
 0x1b2   : >> { %1704 = vrot.lane.b32.xlu0 %v1651_v22, %s9811_s21  ;;  %v9700_v22 = vld [vmem:[%s9935_s19] sm:$0xff] }
 0x1b3   : >> { %v2156_v48 = vrot.slane %v9700_v22, 2 }
 0x1b4   : >> { %1716 = vrot.lane.b32.xlu1 %v1662_v35, %s9817_s5 }
 0x1b6   : >> { %1712 = vrot.lane.b32.xlu0 %v1658_v6, %s9813_s27  ;;  %v2157_v6 = vrot.slane %v10567_v56, 2 }
 0x1b8   : >> { %1831 = vrot.lane.b32.xlu1 %v10086_v38, %s9819_s7 }
 0x1ba   : >> { %1829 = vrot.lane.b32.xlu0 %v10044_v14, %s9819_s7 }
 0x1bc   : >> { %1835 = vrot.lane.b32.xlu1 %v10089_v10, %s9819_s7 }
 0x1be   : >> { %1833 = vrot.lane.b32.xlu0 %v10051_v16, %s9819_s7 }
 0x1c0   : >> { %1839 = vrot.lane.b32.xlu1 %v10092_v39, %s9819_s7 }
 0x1c2   : >> { %1837 = vrot.lane.b32.xlu0 %v10054_v17, %s9819_s7 }
 0x1c4   : >> { %1843 = vrot.lane.b32.xlu1 %v10095_v40, %s9819_s7 }
 0x1c6   : >> { %1841 = vrot.lane.b32.xlu0 %v10057_v20, %s9819_s7 }
 0x20e   : >> { %v1669_v38 = vpop.permute.xlu1 %1668 }
 0x210   : >> { %v1665_v14 = vpop.permute.xlu0 %1664 }
 0x211   : >> { %v1719_v39 = vsel %vm398_vm1, %v10473_v50, %v1665_v14 }
 0x212   : >> { %v1677_v3 = vpop.permute.xlu1 %1676  ;;  %v1720_v12 = vsel %vm400_vm2, %v1719_v39, %v1669_v38  ;;  %v9702_v38 = vld [vmem:[%s9935_s19 + $0x360] sm:$0xff]  ;;  %v9704_v39 = vld [vmem:[%s9935_s19 + $0x1b0] sm:$0xff] }
 0x213   : >> { %v2166_v14 = vrot.slane %v9702_v38, 2 }
 0x214   : >> { %v1673_v2 = vpop.permute.xlu0 %1672 }
 0x215   : >> { %v1721_v20 = vsel %vm402_vm3, %v1720_v12, %v1673_v2 }
 0x216   : >> { %v1685_v10 = vpop.permute.xlu1 %1684  ;;  %v1722_v45 = vsel %vm404_vm4, %v1721_v20, %v1677_v3  ;;  %v10572_v3 = vld [vmem:[%s9935_s19 + $0x368] sm:$0xff]  ;;  %v9707_v20 = vld [vmem:[%s9935_s19 + $0x518] sm:$0xff] }
 0x217   : >> { %v2167_v2 = vrot.slane %v10572_v3, 2 }
 0x218   : >> { %v1681_v24 = vpop.permute.xlu0 %1680 }
 0x219   : >> { %v1723_v62 = vsel %vm406_vm5, %v1722_v45, %v1681_v24  ;;  %v10590_v45 = vsel %vm2155_vm10, %v2166_v14, %v2167_v2 }
 0x21a   : >> { %v1693_v51 = vpop.permute.xlu1 %1692  ;;  %v1724_v18 = vsel %vm408_vm6, %v1723_v62, %v1685_v10 }
 0x21b   : >> { %v1726_v17 = vsel %vm398_vm1, %v1635_v4, %v1693_v51 }
 0x21c   : >> { %v1689_v16 = vpop.permute.xlu0 %1688 }
 0x21d   : >> { %v1725_v15 = vsel %vm410_vm7, %v1724_v18, %v1689_v16 }
 0x21e   : >> { %v1701_v52 = vpop.permute.xlu1 %1700 }
 0x220   : >> { %v1697_v11 = vpop.permute.xlu0 %1696 }
 0x221   : >> { %v1727_v40 = vsel %vm400_vm2, %v1726_v17, %v1697_v11  ;;  %v9705_v17 = vld [vmem:[%s9935_s19 + $0x1b8] sm:$0xff] }
 0x222   : >> { %v1709_v23 = vpop.permute.xlu1 %1708  ;;  %v1728_v59 = vsel %vm402_vm3, %v1727_v40, %v1701_v52  ;;  %v2161_v52 = vrot.slane %v9704_v39, 2  ;;  %v2162_v11 = vrot.slane %v9705_v17, 2  ;;  %v9706_v40 = vld [vmem:[%s9935_s19 + $0x510] sm:$0xff] }
 0x223   : >> { %v2171_v12 = vrot.slane %v9706_v40, 2 }
 0x224   : >> { %v1705_v5 = vpop.permute.xlu0 %1704 }
 0x225   : >> { %v1729_v21 = vsel %vm404_vm4, %v1728_v59, %v1705_v5 }
 0x226   : >> { %v1717_v44 = vpop.permute.xlu1 %1716  ;;  %v1730_v31 = vsel %vm406_vm5, %v1729_v21, %v1709_v23  ;;  %v2172_v23 = vrot.slane %v9707_v20, 2  ;;  %v10587_v21 = vsel %vm2155_vm10, %v2156_v48, %v2157_v6 }
 0x228   : >> { %v1713_v25 = vpop.permute.xlu0 %1712  ;;  %v10602_v18 = vsel %vm2155_vm10, %v2171_v12, %v2172_v23 }
 0x229   : >> { %v1731_v43 = vsel %vm408_vm6, %v1730_v31, %v1713_v25 }
 0x22a   : >> { %v1732_v58 = vsel %vm410_vm7, %v1731_v43, %v1717_v44  ;;  %v1832_v34 = vpop.permute.xlu1 %1831  ;;  %v10599_v43 = vsel %vm2155_vm10, %v2161_v52, %v2162_v11 }
 0x22b   : >> { %9321 = vmatprep.subr.msk.mxu1 %vm669_vm8, %v1732_v58 }
 0x22c   : >> { %9322 = vmatpush1.msk.msra.mxu1 %vm669_vm8, %v1725_v15  ;;  %v1830_v50 = vpop.permute.xlu0 %1829  ;;  %v2184_v15 = vcombine.low %v10587_v21, %v10590_v45 }
 0x22e   : >> { %v1836_v63 = vpop.permute.xlu1 %1835 }
 0x230   : >> { %v1834_v32 = vpop.permute.xlu0 %1833 }
 0x232   : >> { %v1840_v42 = vpop.permute.xlu1 %1839 }
 0x233   : >> { %v1921_v49 = vcombine.low %v1832_v34, %v1840_v42  ;;  %v1922_v35 = vcombine.high %v1832_v34, %v1840_v42  ;;  %v9314_v42 = vld [vmem:[%s13168_s1 + $0x38] sm:$0xff] }
 0x234   : >> { %v1838_v36 = vpop.permute.xlu0 %1837  ;;  %9318 = vmatmul.mubr.msk.f32.gmra.mrb[2].mxu1 %vm662_vm9, %v9314_v42  ;;  %v9320_v42 = vld [vmem:[%s13168_s1 + $0x48] sm:$0xff] }
 0x235   : >> { %v1853_v46 = vcombine.low %v1830_v50, %v1838_v36  ;;  %v1854_v19 = vcombine.high %v1830_v50, %v1838_v36  ;;  %v1929_v53 = vrot.slane %v1921_v49, %v9947_v13  ;;  %v1936_v5 = vrot.slane %v1922_v35, %v9947_v13  ;;  %v9708_v36 = vld [vmem:[%s9935_s19 + $0x10] sm:$0x3]  ;;  %1812 = vmatprep.mubr.f32.mxu1 %v13226_v37  ;;  %v9711_v49 = vld [vmem:[%s9935_s19 + $0x520] sm:$0x3] }
 0x236   : >> { %v1844_v47 = vpop.permute.xlu1 %1843 }
 0x237   : >> { %v1861_v30 = vrot.slane %v1853_v46, %v9947_v13  ;;  %v1937_v60 = vcombine.low %v1836_v63, %v1844_v47  ;;  %v1868_v4 = vrot.slane %v1854_v19, %v9947_v13  ;;  %v1938_v24 = vcombine.high %v1836_v63, %v1844_v47  ;;  %v9709_v47 = vld [vmem:[%s9935_s19 + $0x1c0] sm:$0x3] }
 0x238   : >> { %v1842_v7 = vpop.permute.xlu0 %1841  ;;  %v2159_v46 = vrot.slane %v9708_v36, 2  ;;  %v2164_v19 = vrot.slane %v9709_v47, 2 }
 0x239   : >> { %v1869_v33 = vcombine.low %v1834_v32, %v1842_v7  ;;  %v1870_v61 = vcombine.high %v1834_v32, %v1842_v7  ;;  %v1945_v27 = vrot.slane %v1937_v60, %v9947_v13  ;;  %v1952_v62 = vrot.slane %v1938_v24, %v9947_v13 }
 0x23a   : >> { %v2200_v32 = vcombine.low %v10599_v43, %v10602_v18 }
 0x23b   : >> { %v1877_v41 = vrot.slane %v1869_v33, %v9947_v13  ;;  %v1884_v55 = vrot.slane %v1870_v61, %v9947_v13  ;;  %v1953_v51 = vcombine.low %v1929_v53, %v1945_v27  ;;  %v1954_v44 = vcombine.high %v1929_v53, %v1945_v27  ;;  %v9710_v33 = vld [vmem:[%s9935_s19 + $0x370] sm:$0x3] }
 0x23c   : >> { %v1969_v34 = vcombine.low %v1936_v5, %v1952_v62  ;;  %v2169_v61 = vrot.slane %v9710_v33, 2  ;;  %v2185_v53 = vcombine.high %v10587_v21, %v10590_v45  ;;  %v10642_v27 = vsel %vm2155_vm10, %v2157_v6, %v2159_v46 }
 0x23d   : >> { %v1885_v9 = vcombine.low %v1861_v30, %v1877_v41  ;;  %v1886_v8 = vcombine.high %v1861_v30, %v1877_v41  ;;  %v1901_v28 = vcombine.low %v1868_v4, %v1884_v55  ;;  %v1902_v10 = vcombine.high %v1868_v4, %v1884_v55 }
 0x23e   : >> { %v10596_v25 = vrot.slane %v1953_v51, %v9980_v29  ;;  %v1968_v63 = vrot.slane %v1954_v44, %v9980_v29  ;;  %v2174_v30 = vrot.slane %v9711_v49, 2  ;;  %v2192_v41 = vrot.slane %v2184_v15, %v9947_v13 }
 0x23f   : >> { %v1900_v57 = vrot.slane %v1886_v8, %v9980_v29  ;;  %v10560_v54 = vrot.slane %v1885_v9, %v9980_v29  ;;  %v1909_v16 = vrot.slane %v1901_v28, %v9980_v29  ;;  %v1916_v31 = vrot.slane %v1902_v10, %v9980_v29  ;;  %v9319_v8 = vld [vmem:[%s13168_s1 + $0x40] sm:$0xff] }
 0x240   : >> { %v1985_v50 = vcombine.high %v10596_v25, %v13226_v37  ;;  %v1970_v55 = vcombine.high %v1936_v5, %v1952_v62  ;;  %v1986_v60 = vcombine.high %v1968_v63, %v13226_v37  ;;  %v1977_v4 = vrot.slane %v1969_v34, %v9980_v29  ;;  %9323 = vmatmul.mubr.msk.f32.vlgmr.msra.gmra.mrb[0].mxu1 %vm662_vm9, %v9319_v8 }
 0x241   : >> { %1994 = vrot.lane.b32.xlu1 %v1900_v57, %s9812_s23  ;;  %v1917_v26 = vcombine.high %v10560_v54, %v13226_v37  ;;  %v1918_v59 = vcombine.high %v1900_v57, %v13226_v37  ;;  %v1919_v58 = vcombine.high %v1909_v16, %v13226_v37  ;;  %v1920_v7 = vcombine.high %v1916_v31, %v13226_v37 }
 0x242   : >> { %v2208_v9 = vrot.slane %v2200_v32, %v9947_v13  ;;  %v2201_v28 = vcombine.high %v10599_v43, %v10602_v18  ;;  %v10645_v57 = vsel %vm2155_vm10, %v2162_v11, %v2164_v19  ;;  %v10651_v22 = vsel %vm2155_vm10, %v2172_v23, %v2174_v30  ;;  %1818 = vmatprep.mubr.f32.mxu1 %v13226_v37 }
 0x243   : >> { %1990 = vrot.lane.b32.xlu0 %v1917_v26, %s9815_s29  ;;  %v10648_v26 = vsel %vm2155_vm10, %v2167_v2, %v2169_v61  ;;  %v1987_v48 = vcombine.high %v1977_v4, %v13226_v37  ;;  %v1984_v56 = vrot.slane %v1970_v55, %v9980_v29  ;;  %v2199_v38 = vrot.slane %v2185_v53, %v9947_v13 }
 0x244   : >> { %v2216_v35 = vcombine.low %v2192_v41, %v2208_v9  ;;  %v2217_v6 = vcombine.high %v2192_v41, %v2208_v9  ;;  %v2215_v14 = vrot.slane %v2201_v28, %v9947_v13  ;;  %v2252_v3 = vcombine.low %v10642_v27, %v10648_v26  ;;  %9324 = vmatmul.mubr.msk.f32.gmra.mrb[2].mxu1 %vm662_vm9, %v9320_v42 }
 0x245   : >> { %2002 = vrot.lane.b32.xlu1 %v1909_v16, %s9811_s21  ;;  %v2268_v2 = vcombine.low %v10645_v57, %v10651_v22  ;;  %v1988_v10 = vcombine.high %v1984_v56, %v13226_v37  ;;  %v2253_v20 = vcombine.high %v10642_v27, %v10648_v26  ;;  %v2269_v23 = vcombine.high %v10645_v57, %v10651_v22 }
 0x246   : >> { %v10667_v24 = vrot.slane %v2216_v35, %v9980_v29  ;;  %v2231_v51 = vrot.slane %v2217_v6, %v9980_v29  ;;  %v2232_v16 = vcombine.low %v2199_v38, %v2215_v14  ;;  %v2260_v39 = vrot.slane %v2252_v3, %v9947_v13  ;;  %2138 = vmatprep.mubr.f32.mxu1 %v13226_v37 }
 0x247   : >> { %1998 = vrot.lane.b32.xlu0 %v1918_v59, %s9814_s28  ;;  %v2276_v52 = vrot.slane %v2268_v2, %v9947_v13  ;;  %v2233_v11 = vcombine.high %v2199_v38, %v2215_v14 }
 0x248   : >> { %v2248_v17 = vcombine.high %v10667_v24, %v13226_v37  ;;  %v2240_v40 = vrot.slane %v2232_v16, %v9980_v29  ;;  %v2249_v59 = vcombine.high %v2231_v51, %v13226_v37 }
 0x249   : >> { %2010 = vrot.lane.b32.xlu1 %v1916_v31, %s9813_s27  ;;  %v2284_v12 = vcombine.low %v2260_v39, %v2276_v52  ;;  %v2247_v5 = vrot.slane %v2233_v11, %v9980_v29  ;;  %v2285_v44 = vcombine.high %v2260_v39, %v2276_v52  ;;  %v2267_v31 = vrot.slane %v2253_v20, %v9947_v13 }
 0x24a   : >> { %v2250_v15 = vcombine.high %v2240_v40, %v13226_v37 }
 0x24b   : >> { %2006 = vrot.lane.b32.xlu0 %v1919_v58, %s9816_s30  ;;  %v10687_v62 = vrot.slane %v2284_v12, %v9980_v29  ;;  %v2283_v58 = vrot.slane %v2269_v23, %v9947_v13  ;;  %v2251_v32 = vcombine.high %v2247_v5, %v13226_v37 }
 0x24d   : >> { %2018 = vrot.lane.b32.xlu1 %v1985_v50, %s9815_s29  ;;  %v2316_v34 = vcombine.high %v10687_v62, %v13226_v37  ;;  %v2299_v50 = vrot.slane %v2285_v44, %v9980_v29 }
 0x24f   : >> { %2014 = vrot.lane.b32.xlu0 %v1920_v7, %s9817_s5  ;;  %v2317_v36 = vcombine.high %v2299_v50, %v13226_v37  ;;  %v2301_v7 = vcombine.high %v2267_v31, %v2283_v58 }
 0x251   : >> { %2026 = vrot.lane.b32.xlu1 %v1986_v60, %s9814_s28  ;;  %v2315_v19 = vrot.slane %v2301_v7, %v9980_v29 }
 0x253   : >> { %2022 = vrot.lane.b32.xlu0 %v1968_v63, %s9812_s23  ;;  %v2300_v63 = vcombine.low %v2267_v31, %v2283_v58  ;;  %v2319_v33 = vcombine.high %v2315_v19, %v13226_v37 }
 0x255   : >> { %2034 = vrot.lane.b32.xlu1 %v1987_v48, %s9816_s30  ;;  %v2308_v46 = vrot.slane %v2300_v63, %v9980_v29 }
 0x257   : >> { %2030 = vrot.lane.b32.xlu0 %v1977_v4, %s9811_s21  ;;  %v2318_v47 = vcombine.high %v2308_v46, %v13226_v37 }
 0x259   : >> { %2042 = vrot.lane.b32.xlu1 %v1988_v10, %s9817_s5 }
 0x25b   : >> { %2038 = vrot.lane.b32.xlu0 %v1984_v56, %s9813_s27 }
 0x25d   : >> { %2325 = vrot.lane.b32.xlu1 %v2231_v51, %s9812_s23 }
 0x25f   : >> { %2321 = vrot.lane.b32.xlu0 %v2248_v17, %s9815_s29 }
 0x261   : >> { %2333 = vrot.lane.b32.xlu1 %v2240_v40, %s9811_s21  ;;  %v9325_v40 = vld [vmem:[%s13168_s1 + $0x50] sm:$0xff] }
 0x263   : >> { %2329 = vrot.lane.b32.xlu0 %v2249_v59, %s9814_s28 }
 0x265   : >> { %2341 = vrot.lane.b32.xlu1 %v2247_v5, %s9813_s27 }
 0x267   : >> { %2337 = vrot.lane.b32.xlu0 %v2250_v15, %s9816_s30 }
 0x269   : >> { %2349 = vrot.lane.b32.xlu1 %v2316_v34, %s9815_s29 }
 0x26b   : >> { %2345 = vrot.lane.b32.xlu0 %v2251_v32, %s9817_s5 }
 0x26d   : >> { %2357 = vrot.lane.b32.xlu1 %v2317_v36, %s9814_s28 }
 0x26f   : >> { %2353 = vrot.lane.b32.xlu0 %v2299_v50, %s9812_s23 }
 0x271   : >> { %2365 = vrot.lane.b32.xlu1 %v2318_v47, %s9816_s30 }
 0x273   : >> { %2361 = vrot.lane.b32.xlu0 %v2308_v46, %s9811_s21 }
 0x275   : >> { %2373 = vrot.lane.b32.xlu1 %v2319_v33, %s9817_s5 }
 0x277   : >> { %2369 = vrot.lane.b32.xlu0 %v2315_v19, %s9813_s27 }
 0x279   : >> { %2488 = vrot.lane.b32.xlu1 %v10642_v27, %s9818_s6 }
 0x27b   : >> { %2486 = vrot.lane.b32.xlu0 %v10587_v21, %s9818_s6 }
 0x27d   : >> { %2492 = vrot.lane.b32.xlu1 %v10645_v57, %s9818_s6 }
 0x27f   : >> { %2490 = vrot.lane.b32.xlu0 %v10599_v43, %s9818_s6 }
 0x281   : >> { %2496 = vrot.lane.b32.xlu1 %v10648_v26, %s9818_s6 }
 0x283   : >> { %2494 = vrot.lane.b32.xlu0 %v10590_v45, %s9818_s6 }
 0x285   : >> { %2500 = vrot.lane.b32.xlu1 %v10651_v22, %s9818_s6 }
 0x287   : >> { %2498 = vrot.lane.b32.xlu0 %v10602_v18, %s9818_s6 }
 0x2b3   : >> { %v1995_v61 = vpop.permute.xlu1 %1994 }
 0x2b5   : >> { %v1991_v49 = vpop.permute.xlu0 %1990 }
 0x2b6   : >> { %v2045_v53 = vsel %vm398_vm1, %v10560_v54, %v1991_v49 }
 0x2b7   : >> { %v2003_v30 = vpop.permute.xlu1 %2002  ;;  %v2046_v35 = vsel %vm400_vm2, %v2045_v53, %v1995_v61 }
 0x2b9   : >> { %v1999_v41 = vpop.permute.xlu0 %1998 }
 0x2ba   : >> { %v2047_v38 = vsel %vm402_vm3, %v2046_v35, %v1999_v41 }
 0x2bb   : >> { %v2011_v55 = vpop.permute.xlu1 %2010  ;;  %v2048_v10 = vsel %vm404_vm4, %v2047_v38, %v2003_v30 }
 0x2bd   : >> { %v2007_v60 = vpop.permute.xlu0 %2006 }
 0x2be   : >> { %v2049_v54 = vsel %vm406_vm5, %v2048_v10, %v2007_v60 }
 0x2bf   : >> { %v2019_v4 = vpop.permute.xlu1 %2018  ;;  %v2050_v52 = vsel %vm408_vm6, %v2049_v54, %v2011_v55 }
 0x2c0   : >> { %v2052_v28 = vsel %vm398_vm1, %v10596_v25, %v2019_v4 }
 0x2c1   : >> { %v2015_v9 = vpop.permute.xlu0 %2014 }
 0x2c2   : >> { %v2051_v12 = vsel %vm410_vm7, %v2050_v52, %v2015_v9 }
 0x2c3   : >> { %v2027_v8 = vpop.permute.xlu1 %2026 }
 0x2c5   : >> { %v2023_v48 = vpop.permute.xlu0 %2022 }
 0x2c6   : >> { %v2053_v56 = vsel %vm400_vm2, %v2052_v28, %v2023_v48 }
 0x2c7   : >> { %v2035_v6 = vpop.permute.xlu1 %2034  ;;  %v2054_v14 = vsel %vm402_vm3, %v2053_v56, %v2027_v8 }
 0x2c9   : >> { %v2031_v3 = vpop.permute.xlu0 %2030 }
 0x2ca   : >> { %v2055_v2 = vsel %vm404_vm4, %v2054_v14, %v2031_v3 }
 0x2cb   : >> { %v2043_v51 = vpop.permute.xlu1 %2042  ;;  %v2056_v25 = vsel %vm406_vm5, %v2055_v2, %v2035_v6 }
 0x2cd   : >> { %v2039_v16 = vpop.permute.xlu0 %2038 }
 0x2ce   : >> { %v2057_v39 = vsel %vm408_vm6, %v2056_v25, %v2039_v16 }
 0x2cf   : >> { %v2058_v17 = vsel %vm410_vm7, %v2057_v39, %v2043_v51  ;;  %v2326_v11 = vpop.permute.xlu1 %2325 }
 0x2d0   : >> { %9327 = vmatprep.subr.msk.mxu1 %vm669_vm8, %v2058_v17 }
 0x2d1   : >> { %9328 = vmatpush1.msk.msra.mxu1 %vm669_vm8, %v2051_v12  ;;  %v2322_v20 = vpop.permute.xlu0 %2321 }
 0x2d2   : >> { %9329 = vmatmul.mubr.msk.f32.vlgmr.msra.gmra.mrb[0].mxu1 %vm662_vm9, %v9325_v40  ;;  %v2376_v50 = vsel %vm398_vm1, %v10667_v24, %v2322_v20 }
 0x2d3   : >> { %v2334_v23 = vpop.permute.xlu1 %2333  ;;  %2144 = vmatprep.mubr.f32.mxu1 %v13226_v37  ;;  %v2377_v42 = vsel %vm400_vm2, %v2376_v50, %v2326_v11 }
 0x2d5   : >> { %v2330_v59 = vpop.permute.xlu0 %2329 }
 0x2d6   : >> { %v2378_v46 = vsel %vm402_vm3, %v2377_v42, %v2330_v59 }
 0x2d7   : >> { %v2342_v5 = vpop.permute.xlu1 %2341  ;;  %v2379_v33 = vsel %vm404_vm4, %v2378_v46, %v2334_v23 }
 0x2d9   : >> { %v2338_v44 = vpop.permute.xlu0 %2337 }
 0x2da   : >> { %v2380_v61 = vsel %vm406_vm5, %v2379_v33, %v2338_v44 }
 0x2db   : >> { %v2350_v31 = vpop.permute.xlu1 %2349  ;;  %v2381_v41 = vsel %vm408_vm6, %v2380_v61, %v2342_v5 }
 0x2dc   : >> { %v2383_v15 = vsel %vm398_vm1, %v10687_v62, %v2350_v31 }
 0x2dd   : >> { %v2346_v58 = vpop.permute.xlu0 %2345 }
 0x2de   : >> { %v2382_v4 = vsel %vm410_vm7, %v2381_v41, %v2346_v58 }
 0x2df   : >> { %v2358_v34 = vpop.permute.xlu1 %2357 }
 0x2e1   : >> { %v2354_v63 = vpop.permute.xlu0 %2353 }
 0x2e2   : >> { %v2384_v32 = vsel %vm400_vm2, %v2383_v15, %v2354_v63 }
 0x2e3   : >> { %v2366_v36 = vpop.permute.xlu1 %2365  ;;  %v2385_v7 = vsel %vm402_vm3, %v2384_v32, %v2358_v34 }
 0x2e5   : >> { %v2362_v47 = vpop.permute.xlu0 %2361 }
 0x2e6   : >> { %v2386_v19 = vsel %vm404_vm4, %v2385_v7, %v2362_v47 }
 0x2e7   : >> { %v2374_v62 = vpop.permute.xlu1 %2373  ;;  %v2387_v24 = vsel %vm406_vm5, %v2386_v19, %v2366_v36  ;;  %v9326_v19 = vld [vmem:[%s13168_s1 + $0x58] sm:$0xff] }
 0x2e8   : >> { %9330 = vmatmul.mubr.msk.f32.gmra.mrb[2].mxu1 %vm662_vm9, %v9326_v19 }
 0x2e9   : >> { %v2370_v49 = vpop.permute.xlu0 %2369  ;;  %2469 = vmatprep.mubr.f32.mxu1 %v13226_v37 }
 0x2ea   : >> { %v2388_v30 = vsel %vm408_vm6, %v2387_v24, %v2370_v49  ;;  %v9331_v49 = vld [vmem:[%s13168_s1 + $0x60] sm:$0xff] }
 0x2eb   : >> { %v2389_v55 = vsel %vm410_vm7, %v2388_v30, %v2374_v62  ;;  %v2489_v60 = vpop.permute.xlu1 %2488 }
 0x2ec   : >> { %9333 = vmatprep.subr.msk.mxu1 %vm669_vm8, %v2389_v55 }
 0x2ed   : >> { %9334 = vmatpush1.msk.msra.mxu1 %vm669_vm8, %v2382_v4  ;;  %v2487_v9 = vpop.permute.xlu0 %2486 }
 0x2ee   : >> { %9335 = vmatmul.mubr.msk.f32.vlgmr.msra.gmra.mrb[0].mxu1 %vm662_vm9, %v9331_v49 }
 0x2ef   : >> { %v2493_v8 = vpop.permute.xlu1 %2492  ;;  %2475 = vmatprep.mubr.f32.mxu1 %v13226_v37 }
 0x2f1   : >> { %v2491_v53 = vpop.permute.xlu0 %2490 }
 0x2f3   : >> { %v2497_v28 = vpop.permute.xlu1 %2496 }
 0x2f4   : >> { %v2578_v2 = vcombine.low %v2489_v60, %v2497_v28  ;;  %v2579_v59 = vcombine.high %v2489_v60, %v2497_v28 }
 0x2f5   : >> { %v2495_v48 = vpop.permute.xlu0 %2494 }
 0x2f6   : >> { %v2510_v56 = vcombine.low %v2487_v9, %v2495_v48  ;;  %v2511_v38 = vcombine.high %v2487_v9, %v2495_v48  ;;  %v2586_v17 = vrot.slane %v2578_v2, %v9947_v13  ;;  %v2593_v34 = vrot.slane %v2579_v59, %v9947_v13 }
 0x2f7   : >> { %v2501_v6 = vpop.permute.xlu1 %2500 }
 0x2f8   : >> { %v2518_v10 = vrot.slane %v2510_v56, %v9947_v13  ;;  %v2594_v25 = vcombine.low %v2493_v8, %v2501_v6  ;;  %v2525_v16 = vrot.slane %v2511_v38, %v9947_v13  ;;  %v2595_v44 = vcombine.high %v2493_v8, %v2501_v6 }
 0x2f9   : >> { %v2499_v35 = vpop.permute.xlu0 %2498 }
 0x2fa   : >> { %v2526_v14 = vcombine.low %v2491_v53, %v2499_v35  ;;  %v2527_v3 = vcombine.high %v2491_v53, %v2499_v35  ;;  %v2602_v40 = vrot.slane %v2594_v25, %v9947_v13  ;;  %v2609_v50 = vrot.slane %v2595_v44, %v9947_v13 }
 0x2fc   : >> { %v2534_v51 = vrot.slane %v2526_v14, %v9947_v13  ;;  %v2541_v54 = vrot.slane %v2527_v3, %v9947_v13  ;;  %v2610_v31 = vcombine.low %v2586_v17, %v2602_v40  ;;  %v2611_v63 = vcombine.high %v2586_v17, %v2602_v40 }
 0x2fd   : >> { %v2626_v46 = vcombine.low %v2593_v34, %v2609_v50  ;;  %v2627_v62 = vcombine.high %v2593_v34, %v2609_v50 }
 0x2fe   : >> { %v2542_v39 = vcombine.low %v2518_v10, %v2534_v51  ;;  %v2543_v52 = vcombine.high %v2518_v10, %v2534_v51  ;;  %v2558_v11 = vcombine.low %v2525_v16, %v2541_v54  ;;  %v2559_v5 = vcombine.high %v2525_v16, %v2541_v54 }
 0x2ff   : >> { %v2618_v42 = vrot.slane %v2610_v31, %v9980_v29  ;;  %v2625_v47 = vrot.slane %v2611_v63, %v9980_v29  ;;  %v2634_v24 = vrot.slane %v2626_v46, %v9980_v29  ;;  %v2641_v41 = vrot.slane %v2627_v62, %v9980_v29 }
 0x300   : >> { %v2557_v12 = vrot.slane %v2543_v52, %v9980_v29  ;;  %v2550_v20 = vrot.slane %v2542_v39, %v9980_v29  ;;  %v2566_v58 = vrot.slane %v2558_v11, %v9980_v29  ;;  %v2573_v32 = vrot.slane %v2559_v5, %v9980_v29 }
 0x301   : >> { %v2642_v7 = vcombine.high %v2618_v42, %v13226_v37  ;;  %v2643_v61 = vcombine.high %v2625_v47, %v13226_v37  ;;  %v2644_v30 = vcombine.high %v2634_v24, %v13226_v37  ;;  %v2645_v55 = vcombine.high %v2641_v41, %v13226_v37 }
 0x302   : >> { %2651 = vrot.lane.b32.xlu1 %v2557_v12, %s9812_s23  ;;  %v2574_v23 = vcombine.high %v2550_v20, %v13226_v37  ;;  %v2575_v15 = vcombine.high %v2557_v12, %v13226_v37  ;;  %v2576_v36 = vcombine.high %v2566_v58, %v13226_v37  ;;  %v2577_v33 = vcombine.high %v2573_v32, %v13226_v37 }
 0x304   : >> { %2647 = vrot.lane.b32.xlu0 %v2574_v23, %s9815_s29 }
 0x306   : >> { %2659 = vrot.lane.b32.xlu1 %v2566_v58, %s9811_s21 }
 0x308   : >> { %2655 = vrot.lane.b32.xlu0 %v2575_v15, %s9814_s28 }
 0x30a   : >> { %2667 = vrot.lane.b32.xlu1 %v2573_v32, %s9813_s27 }
 0x30c   : >> { %2663 = vrot.lane.b32.xlu0 %v2576_v36, %s9816_s30 }
 0x30e   : >> { %2675 = vrot.lane.b32.xlu1 %v2642_v7, %s9815_s29 }
 0x310   : >> { %2671 = vrot.lane.b32.xlu0 %v2577_v33, %s9817_s5 }
 0x312   : >> { %2683 = vrot.lane.b32.xlu1 %v2643_v61, %s9814_s28 }
 0x314   : >> { %2679 = vrot.lane.b32.xlu0 %v2625_v47, %s9812_s23 }
 0x316   : >> { %2691 = vrot.lane.b32.xlu1 %v2644_v30, %s9816_s30 }
 0x318   : >> { %2687 = vrot.lane.b32.xlu0 %v2634_v24, %s9811_s21 }
 0x31a   : >> { %2699 = vrot.lane.b32.xlu1 %v2645_v55, %s9817_s5 }
 0x31c   : >> { %2695 = vrot.lane.b32.xlu0 %v2641_v41, %s9813_s27 }
 0x31e   : >> { %2814 = vrot.lane.b32.xlu1 %v10642_v27, %s9819_s7 }
 0x320   : >> { %2812 = vrot.lane.b32.xlu0 %v10587_v21, %s9819_s7 }
 0x322   : >> { %2818 = vrot.lane.b32.xlu1 %v10645_v57, %s9819_s7 }
 0x324   : >> { %2816 = vrot.lane.b32.xlu0 %v10599_v43, %s9819_s7 }
 0x326   : >> { %2822 = vrot.lane.b32.xlu1 %v10648_v26, %s9819_s7 }
 0x328   : >> { %2820 = vrot.lane.b32.xlu0 %v10590_v45, %s9819_s7 }
 0x32a   : >> { %2826 = vrot.lane.b32.xlu1 %v10651_v22, %s9819_s7 }
 0x32c   : >> { %2824 = vrot.lane.b32.xlu0 %v10602_v18, %s9819_s7 }
 0x374   : >> { %v2652_v27 = vpop.permute.xlu1 %2651 }
 0x376   : >> { %v2648_v21 = vpop.permute.xlu0 %2647 }
 0x377   : >> { %v2702_v26 = vsel %vm398_vm1, %v2550_v20, %v2648_v21 }
 0x378   : >> { %v2660_v60 = vpop.permute.xlu1 %2659  ;;  %v2703_v22 = vsel %vm400_vm2, %v2702_v26, %v2652_v27  ;;  %v10888_v26 = vld [vmem:[%s9935_s19 + $0x528] sm:$0xff] }
 0x37a   : >> { %v2656_v4 = vpop.permute.xlu0 %2655 }
 0x37b   : >> { %v2704_v18 = vsel %vm402_vm3, %v2703_v22, %v2656_v4 }
 0x37c   : >> { %v2668_v57 = vpop.permute.xlu1 %2667  ;;  %v2705_v14 = vsel %vm404_vm4, %v2704_v18, %v2660_v60 }
 0x37e   : >> { %v2664_v9 = vpop.permute.xlu0 %2663 }
 0x37f   : >> { %v2706_v2 = vsel %vm406_vm5, %v2705_v14, %v2664_v9 }
 0x380   : >> { %v2676_v8 = vpop.permute.xlu1 %2675  ;;  %v2707_v25 = vsel %vm408_vm6, %v2706_v2, %v2668_v57 }
 0x381   : >> { %v2709_v28 = vsel %vm398_vm1, %v2618_v42, %v2676_v8  ;;  %v10879_v8 = vld [vmem:[%s9935_s19 + $0x18] sm:$0xff] }
 0x382   : >> { %v2672_v43 = vpop.permute.xlu0 %2671 }
 0x383   : >> { %v2708_v52 = vsel %vm410_vm7, %v2707_v25, %v2672_v43  ;;  %v10882_v43 = vld [vmem:[%s9935_s19 + $0x378] sm:$0xff] }
 0x384   : >> { %v2684_v53 = vpop.permute.xlu1 %2683 }
 0x386   : >> { %v2680_v45 = vpop.permute.xlu0 %2679 }
 0x387   : >> { %v2710_v48 = vsel %vm400_vm2, %v2709_v28, %v2680_v45  ;;  %v3153_v45 = vcombine.low %v10879_v8, %v10882_v43 }
 0x388   : >> { %v2692_v56 = vpop.permute.xlu1 %2691  ;;  %v2711_v35 = vsel %vm402_vm3, %v2710_v48, %v2684_v53  ;;  %v10885_v53 = vld [vmem:[%s9935_s19 + $0x1c8] sm:$0xff] }
 0x389   : >> { %v3169_v18 = vcombine.low %v10885_v53, %v10888_v26  ;;  %v3170_v25 = vcombine.high %v10885_v53, %v10888_v26 }
 0x38a   : >> { %v2688_v6 = vpop.permute.xlu0 %2687 }
 0x38b   : >> { %v2712_v38 = vsel %vm404_vm4, %v2711_v35, %v2688_v6  ;;  %v9332_v35 = vld [vmem:[%s13168_s1 + $0x68] sm:$0xff] }
 0x38c   : >> { %v2700_v3 = vpop.permute.xlu1 %2699  ;;  %v2713_v10 = vsel %vm406_vm5, %v2712_v38, %v2692_v56  ;;  %9336 = vmatmul.mubr.msk.f32.gmra.mrb[2].mxu1 %vm662_vm9, %v9332_v35  ;;  %v3161_v38 = vrot.slane %v3153_v45, %v9947_v13 }
 0x38d   : >> { %2795 = vmatprep.mubr.f32.mxu1 %v13226_v37 }
 0x38e   : >> { %v2696_v51 = vpop.permute.xlu0 %2695 }
 0x38f   : >> { %v2714_v54 = vsel %vm408_vm6, %v2713_v10, %v2696_v51  ;;  %v3177_v10 = vrot.slane %v3169_v18, %v9947_v13  ;;  %v9337_v51 = vld [vmem:[%s13168_s1 + $0x70] sm:$0xff] }
 0x390   : >> { %v2715_v16 = vsel %vm410_vm7, %v2714_v54, %v2700_v3  ;;  %v2815_v39 = vpop.permute.xlu1 %2814  ;;  %v3154_v54 = vcombine.high %v10879_v8, %v10882_v43 }
 0x391   : >> { %9339 = vmatprep.subr.msk.mxu1 %vm669_vm8, %v2715_v16  ;;  %v10921_v16 = vld [vmem:[%s9935_s19 + $0x20] sm:$0xff] }
 0x392   : >> { %9340 = vmatpush1.msk.msra.mxu1 %vm669_vm8, %v2708_v52  ;;  %v2813_v17 = vpop.permute.xlu0 %2812  ;;  %v10928_v52 = vld [vmem:[%s9935_s19 + $0x380] sm:$0xff] }
 0x393   : >> { %9341 = vmatmul.mubr.msk.f32.vlgmr.msra.gmra.mrb[0].mxu1 %vm662_vm9, %v9337_v51 }
 0x394   : >> { %v2819_v11 = vpop.permute.xlu1 %2818  ;;  %2801 = vmatprep.mubr.f32.mxu1 %v13226_v37 }
 0x396   : >> { %v2817_v40 = vpop.permute.xlu0 %2816 }
 0x398   : >> { %v2823_v12 = vpop.permute.xlu1 %2822 }
 0x399   : >> { %v2904_v15 = vcombine.low %v2815_v39, %v2823_v12  ;;  %v2905_v24 = vcombine.high %v2815_v39, %v2823_v12  ;;  %v10925_v39 = vld [vmem:[%s9935_s19 + $0x1d0] sm:$0xff]  ;;  %v3185_v12 = vcombine.low %v3161_v38, %v3177_v10 }
 0x39a   : >> { %v2821_v20 = vpop.permute.xlu0 %2820 }
 0x39b   : >> { %v2836_v23 = vcombine.low %v2813_v17, %v2821_v20  ;;  %v2837_v44 = vcombine.high %v2813_v17, %v2821_v20  ;;  %v2912_v7 = vrot.slane %v2904_v15, %v9947_v13  ;;  %v2919_v21 = vrot.slane %v2905_v24, %v9947_v13  ;;  %v10931_v17 = vld [vmem:[%s9935_s19 + $0x530] sm:$0xff] }
 0x39c   : >> { %v2827_v5 = vpop.permute.xlu1 %2826  ;;  %v3186_v20 = vcombine.high %v3161_v38, %v3177_v10 }
 0x39d   : >> { %v2844_v34 = vrot.slane %v2836_v23, %v9947_v13  ;;  %v2920_v32 = vcombine.low %v2819_v11, %v2827_v5  ;;  %v2851_v42 = vrot.slane %v2837_v44, %v9947_v13  ;;  %v2921_v30 = vcombine.high %v2819_v11, %v2827_v5 }
 0x39e   : >> { %v2825_v59 = vpop.permute.xlu0 %2824  ;;  %v3168_v23 = vrot.slane %v3154_v54, %v9947_v13  ;;  %v3221_v5 = vcombine.low %v10921_v16, %v10928_v52  ;;  %v3237_v44 = vcombine.low %v10925_v39, %v10931_v17  ;;  %v3200_v15 = vrot.slane %v3186_v20, %v9980_v29 }
 0x39f   : >> { %v2852_v31 = vcombine.low %v2817_v40, %v2825_v59  ;;  %v2853_v58 = vcombine.high %v2817_v40, %v2825_v59  ;;  %v2928_v19 = vrot.slane %v2920_v32, %v9947_v13  ;;  %v2935_v60 = vrot.slane %v2921_v30, %v9947_v13 }
 0x3a0   : >> { %v3184_v59 = vrot.slane %v3170_v25, %v9947_v13 }
 0x3a1   : >> { %v2860_v50 = vrot.slane %v2852_v31, %v9947_v13  ;;  %v2867_v63 = vrot.slane %v2853_v58, %v9947_v13  ;;  %v2936_v41 = vcombine.low %v2912_v7, %v2928_v19  ;;  %v2937_v4 = vcombine.high %v2912_v7, %v2928_v19 }
 0x3a2   : >> { %v2952_v48 = vcombine.low %v2919_v21, %v2935_v60  ;;  %v2953_v14 = vcombine.high %v2919_v21, %v2935_v60  ;;  %v10947_v58 = vrot.slane %v3185_v12, %v9980_v29  ;;  %v3222_v7 = vcombine.high %v10921_v16, %v10928_v52 }
 0x3a3   : >> { %v2868_v36 = vcombine.low %v2844_v34, %v2860_v50  ;;  %v2869_v46 = vcombine.high %v2844_v34, %v2860_v50  ;;  %v2884_v47 = vcombine.low %v2851_v42, %v2867_v63  ;;  %v2885_v49 = vcombine.high %v2851_v42, %v2867_v63 }
 0x3a4   : >> { %v10876_v9 = vrot.slane %v2936_v41, %v9980_v29  ;;  %v2951_v56 = vrot.slane %v2937_v4, %v9980_v29  ;;  %v2960_v2 = vrot.slane %v2952_v48, %v9980_v29  ;;  %v2967_v40 = vrot.slane %v2953_v14, %v9980_v29  ;;  %v9338_v4 = vld [vmem:[%s13168_s1 + $0x78] sm:$0xff] }
 0x3a5   : >> { %v2883_v33 = vrot.slane %v2869_v46, %v9980_v29  ;;  %v10862_v62 = vrot.slane %v2868_v36, %v9980_v29  ;;  %v2892_v55 = vrot.slane %v2884_v47, %v9980_v29  ;;  %v2899_v57 = vrot.slane %v2885_v49, %v9980_v29  ;;  %9342 = vmatmul.mubr.msk.f32.gmra.mrb[2].mxu1 %vm662_vm9, %v9338_v4 }
 0x3a6   : >> { %v2968_v22 = vcombine.high %v10876_v9, %v13226_v37  ;;  %v2969_v3 = vcombine.high %v2951_v56, %v13226_v37  ;;  %v2970_v11 = vcombine.high %v2960_v2, %v13226_v37  ;;  %v2971_v31 = vcombine.high %v2967_v40, %v13226_v37  ;;  %3121 = vmatprep.mubr.f32.mxu1 %v13226_v37 }
 0x3a7   : >> { %2977 = vrot.lane.b32.xlu1 %v2883_v33, %s9812_s23  ;;  %v2900_v61 = vcombine.high %v10862_v62, %v13226_v37  ;;  %v2901_v27 = vcombine.high %v2883_v33, %v13226_v37  ;;  %v2902_v28 = vcombine.high %v2892_v55, %v13226_v37  ;;  %v2903_v6 = vcombine.high %v2899_v57, %v13226_v37 }
 0x3a8   : >> { %v3201_v34 = vcombine.low %v3168_v23, %v3184_v59  ;;  %v3229_v50 = vrot.slane %v3221_v5, %v9947_v13  ;;  %v3245_v63 = vrot.slane %v3237_v44, %v9947_v13  ;;  %v3217_v32 = vcombine.high %v10947_v58, %v13226_v37 }
 0x3a9   : >> { %2973 = vrot.lane.b32.xlu0 %v2900_v61, %s9815_s29  ;;  %v3202_v42 = vcombine.high %v3168_v23, %v3184_v59  ;;  %v3238_v47 = vcombine.high %v10925_v39, %v10931_v17  ;;  %v3218_v19 = vcombine.high %v3200_v15, %v13226_v37  ;;  %v3236_v49 = vrot.slane %v3222_v7, %v9947_v13 }
 0x3aa   : >> { %v3209_v36 = vrot.slane %v3201_v34, %v9980_v29  ;;  %v3253_v46 = vcombine.low %v3229_v50, %v3245_v63  ;;  %v3254_v24 = vcombine.high %v3229_v50, %v3245_v63 }
 0x3ab   : >> { %2985 = vrot.lane.b32.xlu1 %v2892_v55, %s9811_s21  ;;  %v3216_v33 = vrot.slane %v3202_v42, %v9980_v29  ;;  %v3252_v30 = vrot.slane %v3238_v47, %v9947_v13 }
 0x3ac   : >> { %v10967_v61 = vrot.slane %v3253_v46, %v9980_v29  ;;  %v3219_v41 = vcombine.high %v3209_v36, %v13226_v37 }
 0x3ad   : >> { %2981 = vrot.lane.b32.xlu0 %v2901_v27, %s9814_s28  ;;  %v3268_v27 = vrot.slane %v3254_v24, %v9980_v29  ;;  %v3269_v21 = vcombine.low %v3236_v49, %v3252_v30  ;;  %v3220_v60 = vcombine.high %v3216_v33, %v13226_v37  ;;  %v3270_v45 = vcombine.high %v3236_v49, %v3252_v30 }
 0x3ae   : >> { %v3285_v55 = vcombine.high %v10967_v61, %v13226_v37 }
 0x3af   : >> { %2993 = vrot.lane.b32.xlu1 %v2899_v57, %s9813_s27  ;;  %v3286_v57 = vcombine.high %v3268_v27, %v13226_v37 }
 0x3b1   : >> { %2989 = vrot.lane.b32.xlu0 %v2902_v28, %s9816_s30  ;;  %v3277_v28 = vrot.slane %v3269_v21, %v9980_v29 }
 0x3b3   : >> { %3001 = vrot.lane.b32.xlu1 %v2968_v22, %s9815_s29  ;;  %v3287_v48 = vcombine.high %v3277_v28, %v13226_v37  ;;  %v3284_v22 = vrot.slane %v3270_v45, %v9980_v29 }
 0x3b5   : >> { %2997 = vrot.lane.b32.xlu0 %v2903_v6, %s9817_s5 }
 0x3b7   : >> { %3009 = vrot.lane.b32.xlu1 %v2969_v3, %s9814_s28 }
 0x3b9   : >> { %3005 = vrot.lane.b32.xlu0 %v2951_v56, %s9812_s23  ;;  %v3288_v56 = vcombine.high %v3284_v22, %v13226_v37 }
 0x3bb   : >> { %3017 = vrot.lane.b32.xlu1 %v2970_v11, %s9816_s30 }
 0x3bd   : >> { %3013 = vrot.lane.b32.xlu0 %v2960_v2, %s9811_s21 }
 0x3bf   : >> { %3025 = vrot.lane.b32.xlu1 %v2971_v31, %s9817_s5 }
 0x3c1   : >> { %3021 = vrot.lane.b32.xlu0 %v2967_v40, %s9813_s27 }
 0x3c3   : >> { %3294 = vrot.lane.b32.xlu1 %v3200_v15, %s9812_s23 }
 0x3c5   : >> { %3290 = vrot.lane.b32.xlu0 %v3217_v32, %s9815_s29 }
 0x3c7   : >> { %3302 = vrot.lane.b32.xlu1 %v3209_v36, %s9811_s21  ;;  %v9343_v36 = vld [vmem:[%s13168_s1 + $0x80] sm:$0xff] }
 0x3c9   : >> { %3298 = vrot.lane.b32.xlu0 %v3218_v19, %s9814_s28 }
 0x3cb   : >> { %3310 = vrot.lane.b32.xlu1 %v3216_v33, %s9813_s27 }
 0x3cd   : >> { %3306 = vrot.lane.b32.xlu0 %v3219_v41, %s9816_s30 }
 0x3cf   : >> { %3318 = vrot.lane.b32.xlu1 %v3285_v55, %s9815_s29 }
 0x3d1   : >> { %3314 = vrot.lane.b32.xlu0 %v3220_v60, %s9817_s5 }
 0x3d3   : >> { %3326 = vrot.lane.b32.xlu1 %v3286_v57, %s9814_s28 }
 0x3d5   : >> { %3322 = vrot.lane.b32.xlu0 %v3268_v27, %s9812_s23 }
 0x3d7   : >> { %3334 = vrot.lane.b32.xlu1 %v3287_v48, %s9816_s30 }
 0x3d9   : >> { %3330 = vrot.lane.b32.xlu0 %v3277_v28, %s9811_s21 }
 0x3db   : >> { %3342 = vrot.lane.b32.xlu1 %v3288_v56, %s9817_s5 }
 0x3dd   : >> { %3338 = vrot.lane.b32.xlu0 %v3284_v22, %s9813_s27 }
 0x3df   : >> { %3465 = vrot.lane.b32.xlu1 %v10921_v16, %s9818_s6 }
 0x3e1   : >> { %3463 = vrot.lane.b32.xlu0 %v10879_v8, %s9818_s6 }
 0x3e3   : >> { %3469 = vrot.lane.b32.xlu1 %v10925_v39, %s9818_s6 }
 0x3e5   : >> { %3467 = vrot.lane.b32.xlu0 %v10885_v53, %s9818_s6 }
 0x3e7   : >> { %3473 = vrot.lane.b32.xlu1 %v10928_v52, %s9818_s6 }
 0x3e9   : >> { %3471 = vrot.lane.b32.xlu0 %v10882_v43, %s9818_s6 }
 0x3eb   : >> { %3477 = vrot.lane.b32.xlu1 %v10931_v17, %s9818_s6 }
 0x3ed   : >> { %3475 = vrot.lane.b32.xlu0 %v10888_v26, %s9818_s6 }
 0x419   : >> { %v2978_v18 = vpop.permute.xlu1 %2977 }
 0x41b   : >> { %v2974_v35 = vpop.permute.xlu0 %2973 }
 0x41c   : >> { %v3028_v54 = vsel %vm398_vm1, %v10862_v62, %v2974_v35 }
 0x41d   : >> { %v2986_v6 = vpop.permute.xlu1 %2985  ;;  %v3029_v12 = vsel %vm400_vm2, %v3028_v54, %v2978_v18 }
 0x41f   : >> { %v2982_v38 = vpop.permute.xlu0 %2981 }
 0x420   : >> { %v3030_v23 = vsel %vm402_vm3, %v3029_v12, %v2982_v38 }
 0x421   : >> { %v2994_v14 = vpop.permute.xlu1 %2993  ;;  %v3031_v31 = vsel %vm404_vm4, %v3030_v23, %v2986_v6 }
 0x423   : >> { %v2990_v3 = vpop.permute.xlu0 %2989 }
 0x424   : >> { %v3032_v62 = vsel %vm406_vm5, %v3031_v31, %v2990_v3 }
 0x425   : >> { %v3002_v2 = vpop.permute.xlu1 %3001  ;;  %v3033_v63 = vsel %vm408_vm6, %v3032_v62, %v2994_v14 }
 0x426   : >> { %v3035_v25 = vsel %vm398_vm1, %v10876_v9, %v3002_v2 }
 0x427   : >> { %v2998_v10 = vpop.permute.xlu0 %2997 }
 0x428   : >> { %v3034_v46 = vsel %vm410_vm7, %v3033_v63, %v2998_v10 }
 0x429   : >> { %v3010_v51 = vpop.permute.xlu1 %3009 }
 0x42b   : >> { %v3006_v11 = vpop.permute.xlu0 %3005 }
 0x42c   : >> { %v3036_v40 = vsel %vm400_vm2, %v3035_v25, %v3006_v11 }
 0x42d   : >> { %v3018_v20 = vpop.permute.xlu1 %3017  ;;  %v3037_v59 = vsel %vm402_vm3, %v3036_v40, %v3010_v51 }
 0x42f   : >> { %v3014_v5 = vpop.permute.xlu0 %3013 }
 0x430   : >> { %v3038_v44 = vsel %vm404_vm4, %v3037_v59, %v3014_v5 }
 0x431   : >> { %v3026_v15 = vpop.permute.xlu1 %3025  ;;  %v3039_v9 = vsel %vm406_vm5, %v3038_v44, %v3018_v20 }
 0x433   : >> { %v3022_v34 = vpop.permute.xlu0 %3021 }
 0x434   : >> { %v3040_v50 = vsel %vm408_vm6, %v3039_v9, %v3022_v34 }
 0x435   : >> { %v3041_v32 = vsel %vm410_vm7, %v3040_v50, %v3026_v15  ;;  %v3295_v42 = vpop.permute.xlu1 %3294 }
 0x436   : >> { %9345 = vmatprep.subr.msk.mxu1 %vm669_vm8, %v3041_v32 }
 0x437   : >> { %9346 = vmatpush1.msk.msra.mxu1 %vm669_vm8, %v3034_v46  ;;  %v3291_v7 = vpop.permute.xlu0 %3290 }
 0x438   : >> { %9347 = vmatmul.mubr.msk.f32.vlgmr.msra.gmra.mrb[0].mxu1 %vm662_vm9, %v9343_v36  ;;  %v3345_v27 = vsel %vm398_vm1, %v10947_v58, %v3291_v7 }
 0x439   : >> { %v3303_v47 = vpop.permute.xlu1 %3302  ;;  %3127 = vmatprep.mubr.f32.mxu1 %v13226_v37  ;;  %v3346_v4 = vsel %vm400_vm2, %v3345_v27, %v3295_v42 }
 0x43b   : >> { %v3299_v19 = vpop.permute.xlu0 %3298 }
 0x43c   : >> { %v3347_v28 = vsel %vm402_vm3, %v3346_v4, %v3299_v19 }
 0x43d   : >> { %v3311_v33 = vpop.permute.xlu1 %3310  ;;  %v3348_v56 = vsel %vm404_vm4, %v3347_v28, %v3303_v47 }
 0x43f   : >> { %v3307_v24 = vpop.permute.xlu0 %3306 }
 0x440   : >> { %v3349_v18 = vsel %vm406_vm5, %v3348_v56, %v3307_v24 }
 0x441   : >> { %v3319_v49 = vpop.permute.xlu1 %3318  ;;  %v3350_v38 = vsel %vm408_vm6, %v3349_v18, %v3311_v33 }
 0x442   : >> { %v3352_v41 = vsel %vm398_vm1, %v10967_v61, %v3319_v49 }
 0x443   : >> { %v3315_v30 = vpop.permute.xlu0 %3314 }
 0x444   : >> { %v3351_v2 = vsel %vm410_vm7, %v3350_v38, %v3315_v30 }
 0x445   : >> { %v3327_v55 = vpop.permute.xlu1 %3326 }
 0x447   : >> { %v3323_v21 = vpop.permute.xlu0 %3322 }
 0x448   : >> { %v3353_v60 = vsel %vm400_vm2, %v3352_v41, %v3323_v21 }
 0x449   : >> { %v3335_v57 = vpop.permute.xlu1 %3334  ;;  %v3354_v45 = vsel %vm402_vm3, %v3353_v60, %v3327_v55 }
 0x44b   : >> { %v3331_v48 = vpop.permute.xlu0 %3330 }
 0x44c   : >> { %v3355_v22 = vsel %vm404_vm4, %v3354_v45, %v3331_v48 }
 0x44d   : >> { %v3343_v61 = vpop.permute.xlu1 %3342  ;;  %v3356_v58 = vsel %vm406_vm5, %v3355_v22, %v3335_v57  ;;  %v9344_v22 = vld [vmem:[%s13168_s1 + $0x88] sm:$0xff] }
 0x44e   : >> { %9348 = vmatmul.mubr.msk.f32.gmra.mrb[2].mxu1 %vm662_vm9, %v9344_v22 }
 0x44f   : >> { %v3339_v35 = vpop.permute.xlu0 %3338  ;;  %3438 = vmatprep.mubr.f32.mxu1 %v13226_v37 }
 0x450   : >> { %v3357_v6 = vsel %vm408_vm6, %v3356_v58, %v3339_v35  ;;  %v9361_v35 = vld [vmem:[%s13168_s1 + $0x90] sm:$0xff] }
 0x451   : >> { %v3358_v14 = vsel %vm410_vm7, %v3357_v6, %v3343_v61  ;;  %v3466_v3 = vpop.permute.xlu1 %3465 }
 0x452   : >> { %9363 = vmatprep.subr.msk.mxu1 %vm669_vm8, %v3358_v14 }
 0x453   : >> { %9364 = vmatpush1.msk.msra.mxu1 %vm669_vm8, %v3351_v2  ;;  %v3464_v10 = vpop.permute.xlu0 %3463 }
 0x454   : >> { %9365 = vmatmul.mubr.msk.f32.vlgmr.msra.gmra.mrb[0].mxu1 %vm662_vm9, %v9361_v35 }
 0x455   : >> { %v3470_v51 = vpop.permute.xlu1 %3469  ;;  %3444 = vmatprep.mubr.f32.mxu1 %v13226_v37 }
 0x457   : >> { %v3468_v54 = vpop.permute.xlu0 %3467 }
 0x459   : >> { %v3474_v25 = vpop.permute.xlu1 %3473 }
 0x45a   : >> { %v3555_v44 = vcombine.low %v3466_v3, %v3474_v25  ;;  %v3556_v19 = vcombine.high %v3466_v3, %v3474_v25 }
 0x45b   : >> { %v3472_v11 = vpop.permute.xlu0 %3471 }
 0x45c   : >> { %v3487_v40 = vcombine.low %v3464_v10, %v3472_v11  ;;  %v3488_v23 = vcombine.high %v3464_v10, %v3472_v11  ;;  %v3563_v32 = vrot.slane %v3555_v44, %v9947_v13  ;;  %v3570_v55 = vrot.slane %v3556_v19, %v9947_v13 }
 0x45d   : >> { %v3478_v20 = vpop.permute.xlu1 %3477 }
 0x45e   : >> { %v3495_v31 = vrot.slane %v3487_v40, %v9947_v13  ;;  %v3571_v9 = vcombine.low %v3470_v51, %v3478_v20  ;;  %v3502_v34 = vrot.slane %v3488_v23, %v9947_v13  ;;  %v3572_v24 = vcombine.high %v3470_v51, %v3478_v20 }
 0x45f   : >> { %v3476_v12 = vpop.permute.xlu0 %3475 }
 0x460   : >> { %v3503_v59 = vcombine.low %v3468_v54, %v3476_v12  ;;  %v3504_v5 = vcombine.high %v3468_v54, %v3476_v12  ;;  %v3579_v36 = vrot.slane %v3571_v9, %v9947_v13  ;;  %v3586_v27 = vrot.slane %v3572_v24, %v9947_v13 }
 0x462   : >> { %v3511_v15 = vrot.slane %v3503_v59, %v9947_v13  ;;  %v3518_v62 = vrot.slane %v3504_v5, %v9947_v13  ;;  %v3587_v49 = vcombine.low %v3563_v32, %v3579_v36  ;;  %v3588_v21 = vcombine.high %v3563_v32, %v3579_v36 }
 0x463   : >> { %v3603_v28 = vcombine.low %v3570_v55, %v3586_v27  ;;  %v3604_v61 = vcombine.high %v3570_v55, %v3586_v27 }
 0x464   : >> { %v3519_v50 = vcombine.low %v3495_v31, %v3511_v15  ;;  %v3520_v63 = vcombine.high %v3495_v31, %v3511_v15  ;;  %v3535_v42 = vcombine.low %v3502_v34, %v3518_v62  ;;  %v3536_v33 = vcombine.high %v3502_v34, %v3518_v62 }
 0x465   : >> { %v3595_v4 = vrot.slane %v3587_v49, %v9980_v29  ;;  %v3602_v48 = vrot.slane %v3588_v21, %v9980_v29  ;;  %v3611_v58 = vrot.slane %v3603_v28, %v9980_v29  ;;  %v3618_v38 = vrot.slane %v3604_v61, %v9980_v29 }
 0x466   : >> { %v3534_v46 = vrot.slane %v3520_v63, %v9980_v29  ;;  %v3527_v7 = vrot.slane %v3519_v50, %v9980_v29  ;;  %v3543_v30 = vrot.slane %v3535_v42, %v9980_v29  ;;  %v3550_v60 = vrot.slane %v3536_v33, %v9980_v29 }
 0x467   : >> { %v3619_v45 = vcombine.high %v3595_v4, %v13226_v37  ;;  %v3620_v18 = vcombine.high %v3602_v48, %v13226_v37  ;;  %v3621_v6 = vcombine.high %v3611_v58, %v13226_v37  ;;  %v3622_v14 = vcombine.high %v3618_v38, %v13226_v37 }
 0x468   : >> { %3628 = vrot.lane.b32.xlu1 %v3534_v46, %s9812_s23  ;;  %v3551_v47 = vcombine.high %v3527_v7, %v13226_v37  ;;  %v3552_v41 = vcombine.high %v3534_v46, %v13226_v37  ;;  %v3553_v57 = vcombine.high %v3543_v30, %v13226_v37  ;;  %v3554_v56 = vcombine.high %v3550_v60, %v13226_v37 }
 0x46a   : >> { %3624 = vrot.lane.b32.xlu0 %v3551_v47, %s9815_s29 }
 0x46c   : >> { %3636 = vrot.lane.b32.xlu1 %v3543_v30, %s9811_s21 }
 0x46e   : >> { %3632 = vrot.lane.b32.xlu0 %v3552_v41, %s9814_s28 }
 0x470   : >> { %3644 = vrot.lane.b32.xlu1 %v3550_v60, %s9813_s27 }
 0x472   : >> { %3640 = vrot.lane.b32.xlu0 %v3553_v57, %s9816_s30 }
 0x474   : >> { %3652 = vrot.lane.b32.xlu1 %v3619_v45, %s9815_s29 }
 0x476   : >> { %3648 = vrot.lane.b32.xlu0 %v3554_v56, %s9817_s5 }
 0x478   : >> { %3660 = vrot.lane.b32.xlu1 %v3620_v18, %s9814_s28 }
 0x47a   : >> { %3656 = vrot.lane.b32.xlu0 %v3602_v48, %s9812_s23 }
 0x47c   : >> { %3668 = vrot.lane.b32.xlu1 %v3621_v6, %s9816_s30 }
 0x47e   : >> { %3664 = vrot.lane.b32.xlu0 %v3611_v58, %s9811_s21 }
 0x480   : >> { %3676 = vrot.lane.b32.xlu1 %v3622_v14, %s9817_s5 }
 0x482   : >> { %3672 = vrot.lane.b32.xlu0 %v3618_v38, %s9813_s27 }
 0x484   : >> { %3791 = vrot.lane.b32.xlu1 %v10921_v16, %s9819_s7 }
 0x486   : >> { %3789 = vrot.lane.b32.xlu0 %v10879_v8, %s9819_s7 }
 0x488   : >> { %3795 = vrot.lane.b32.xlu1 %v10925_v39, %s9819_s7 }
 0x48a   : >> { %3793 = vrot.lane.b32.xlu0 %v10885_v53, %s9819_s7 }
 0x48c   : >> { %3799 = vrot.lane.b32.xlu1 %v10928_v52, %s9819_s7 }
 0x48e   : >> { %3797 = vrot.lane.b32.xlu0 %v10882_v43, %s9819_s7 }
 0x490   : >> { %3803 = vrot.lane.b32.xlu1 %v10931_v17, %s9819_s7 }
 0x492   : >> { %3801 = vrot.lane.b32.xlu0 %v10888_v26, %s9819_s7 }
 0x4da   : >> { %v3629_v3 = vpop.permute.xlu1 %3628 }
 0x4dc   : >> { %v3625_v2 = vpop.permute.xlu0 %3624 }
 0x4dd   : >> { %v3679_v20 = vsel %vm398_vm1, %v3527_v7, %v3625_v2 }
 0x4de   : >> { %v3637_v10 = vpop.permute.xlu1 %3636  ;;  %v3680_v44 = vsel %vm400_vm2, %v3679_v20, %v3629_v3 }
 0x4e0   : >> { %v3633_v51 = vpop.permute.xlu0 %3632 }
 0x4e1   : >> { %v3681_v15 = vsel %vm402_vm3, %v3680_v44, %v3633_v51  ;;  %v4119_v51 = vrot.slane %v10879_v8, 1  ;;  %v4125_v44 = vrot.slane %v10925_v39, 1  ;;  %v4134_v8 = vrot.slane %v10888_v26, 1 }
 0x4e2   : >> { %v3645_v54 = vpop.permute.xlu1 %3644  ;;  %v3682_v50 = vsel %vm404_vm4, %v3681_v15, %v3637_v10 }
 0x4e4   : >> { %v3641_v25 = vpop.permute.xlu0 %3640 }
 0x4e5   : >> { %v3683_v32 = vsel %vm406_vm5, %v3682_v50, %v3641_v25  ;;  %v4120_v25 = vrot.slane %v10921_v16, 1 }
 0x4e6   : >> { %v3653_v11 = vpop.permute.xlu1 %3652  ;;  %v3684_v7 = vsel %vm408_vm6, %v3683_v32, %v3645_v54  ;;  %v11186_v32 = vld [vmem:[%s9935_s19 + $0x1d8] sm:$0x3] }
 0x4e7   : >> { %v3686_v23 = vsel %vm398_vm1, %v3595_v4, %v3653_v11  ;;  %v4129_v11 = vrot.slane %v10882_v43, 1 }
 0x4e8   : >> { %v3649_v40 = vpop.permute.xlu0 %3648 }
 0x4e9   : >> { %v3685_v33 = vsel %vm410_vm7, %v3684_v7, %v3649_v40  ;;  %v4130_v40 = vrot.slane %v10928_v52, 1  ;;  %v11161_v52 = vsel %vm1172_vm0, %v4119_v51, %v4120_v25 }
 0x4ea   : >> { %v3661_v12 = vpop.permute.xlu1 %3660 }
 0x4eb   : >> { %v11164_v15 = vsel %vm1172_vm0, %v4129_v11, %v4130_v40 }
 0x4ec   : >> { %v3657_v59 = vpop.permute.xlu0 %3656  ;;  %v4147_v50 = vcombine.low %v11161_v52, %v11164_v15 }
 0x4ed   : >> { %v3687_v5 = vsel %vm400_vm2, %v3686_v23, %v3657_v59 }
 0x4ee   : >> { %v3669_v31 = vpop.permute.xlu1 %3668  ;;  %v3688_v62 = vsel %vm402_vm3, %v3687_v5, %v3661_v12  ;;  %v4124_v5 = vrot.slane %v10885_v53, 1 }
 0x4f0   : >> { %v3665_v9 = vpop.permute.xlu0 %3664 }
 0x4f1   : >> { %v3689_v34 = vsel %vm404_vm4, %v3688_v62, %v3665_v9  ;;  %v11173_v62 = vsel %vm1172_vm0, %v4124_v5, %v4125_v44 }
 0x4f2   : >> { %v3677_v63 = vpop.permute.xlu1 %3676  ;;  %v3690_v42 = vsel %vm406_vm5, %v3689_v34, %v3669_v31  ;;  %v4135_v31 = vrot.slane %v10931_v17, 1 }
 0x4f4   : >> { %v3673_v36 = vpop.permute.xlu0 %3672  ;;  %v11176_v9 = vsel %vm1172_vm0, %v4134_v8, %v4135_v31 }
 0x4f5   : >> { %v3691_v46 = vsel %vm408_vm6, %v3690_v42, %v3673_v36  ;;  %v4163_v7 = vcombine.low %v11173_v62, %v11176_v9 }
 0x4f6   : >> { %v3692_v47 = vsel %vm410_vm7, %v3691_v46, %v3677_v63  ;;  %v3792_v19 = vpop.permute.xlu1 %3791  ;;  %v11183_v63 = vld [vmem:[%s9935_s19 + $0x28] sm:$0x3] }
 0x4f7   : >> { %9369 = vmatprep.subr.msk.mxu1 %vm669_vm8, %v3692_v47  ;;  %v11195_v47 = vld [vmem:[%s9935_s19 + $0x388] sm:$0x3] }
 0x4f8   : >> { %9370 = vmatpush1.msk.msra.mxu1 %vm669_vm8, %v3685_v33  ;;  %v3790_v24 = vpop.permute.xlu0 %3789  ;;  %v9362_v33 = vld [vmem:[%s13168_s1 + $0x98] sm:$0xff] }
 0x4f9   : >> { %9366 = vmatmul.mubr.msk.f32.gmra.mrb[2].mxu1 %vm662_vm9, %v9362_v33  ;;  %v9368_v33 = vld [vmem:[%s13168_s1 + $0xa8] sm:$0xff] }
 0x4fa   : >> { %v3796_v49 = vpop.permute.xlu1 %3795  ;;  %3772 = vmatprep.mubr.f32.mxu1 %v13226_v37 }
 0x4fc   : >> { %v3794_v30 = vpop.permute.xlu0 %3793 }
 0x4fe   : >> { %v3800_v41 = vpop.permute.xlu1 %3799 }
 0x4ff   : >> { %v3881_v45 = vcombine.low %v3792_v19, %v3800_v41  ;;  %v3882_v54 = vcombine.high %v3792_v19, %v3800_v41  ;;  %v11198_v19 = vld [vmem:[%s9935_s19 + $0x538] sm:$0x3]  ;;  %v4127_v41 = vrot.slane %v11186_v32, 1 }
 0x500   : >> { %v3798_v55 = vpop.permute.xlu0 %3797 }
 0x501   : >> { %v3813_v27 = vcombine.low %v3790_v24, %v3798_v55  ;;  %v3814_v4 = vcombine.high %v3790_v24, %v3798_v55  ;;  %v3889_v6 = vrot.slane %v3881_v45, %v9947_v13  ;;  %v3896_v16 = vrot.slane %v3882_v54, %v9947_v13 }
 0x502   : >> { %v3804_v60 = vpop.permute.xlu1 %3803  ;;  %v4132_v55 = vrot.slane %v11195_v47, 1  ;;  %v4148_v45 = vcombine.high %v11161_v52, %v11164_v15 }
 0x503   : >> { %v3821_v48 = vrot.slane %v3813_v27, %v9947_v13  ;;  %v3897_v61 = vcombine.low %v3796_v49, %v3804_v60  ;;  %v3828_v18 = vrot.slane %v3814_v4, %v9947_v13  ;;  %v3898_v20 = vcombine.high %v3796_v49, %v3804_v60 }
 0x504   : >> { %v3802_v21 = vpop.permute.xlu0 %3801  ;;  %v4155_v49 = vrot.slane %v4147_v50, %v9947_v13  ;;  %v4137_v27 = vrot.slane %v11198_v19, 1 }
 0x505   : >> { %v3829_v57 = vcombine.low %v3794_v30, %v3802_v21  ;;  %v3830_v28 = vcombine.high %v3794_v30, %v3802_v21  ;;  %v3905_v14 = vrot.slane %v3897_v61, %v9947_v13  ;;  %v3912_v53 = vrot.slane %v3898_v20, %v9947_v13 }
 0x506   : >> { %v4122_v30 = vrot.slane %v11183_v63, 1  ;;  %v11232_v61 = vsel %vm1172_vm0, %v4130_v40, %v4132_v55 }
 0x507   : >> { %v3837_v22 = vrot.slane %v3829_v57, %v9947_v13  ;;  %v3844_v56 = vrot.slane %v3830_v28, %v9947_v13  ;;  %v3913_v23 = vcombine.low %v3889_v6, %v3905_v14  ;;  %v3914_v39 = vcombine.high %v3889_v6, %v3905_v14  ;;  %v9367_v28 = vld [vmem:[%s13168_s1 + $0xa0] sm:$0xff] }
 0x508   : >> { %v3929_v42 = vcombine.low %v3896_v16, %v3912_v53  ;;  %v3930_v21 = vcombine.high %v3896_v16, %v3912_v53  ;;  %v4171_v57 = vrot.slane %v4163_v7, %v9947_v13  ;;  %9371 = vmatmul.mubr.msk.f32.vlgmr.msra.gmra.mrb[0].mxu1 %vm662_vm9, %v9367_v28  ;;  %v4162_v14 = vrot.slane %v4148_v45, %v9947_v13 }
 0x509   : >> { %v3845_v58 = vcombine.low %v3821_v48, %v3837_v22  ;;  %v3846_v35 = vcombine.high %v3821_v48, %v3837_v22  ;;  %v3861_v38 = vcombine.low %v3828_v18, %v3844_v56  ;;  %v3862_v12 = vcombine.high %v3828_v18, %v3844_v56  ;;  %3778 = vmatprep.mubr.f32.mxu1 %v13226_v37 }
 0x50a   : >> { %v11170_v17 = vrot.slane %v3913_v23, %v9980_v29  ;;  %v3928_v46 = vrot.slane %v3914_v39, %v9980_v29  ;;  %v3937_v4 = vrot.slane %v3929_v42, %v9980_v29  ;;  %v4164_v48 = vcombine.high %v11173_v62, %v11176_v9 }
 0x50b   : >> { %v3860_v3 = vrot.slane %v3846_v35, %v9980_v29  ;;  %v11142_v2 = vrot.slane %v3845_v58, %v9980_v29  ;;  %v3869_v59 = vrot.slane %v3861_v38, %v9980_v29  ;;  %v3876_v26 = vrot.slane %v3862_v12, %v9980_v29 }
 0x50c   : >> { %v3945_v36 = vcombine.high %v11170_v17, %v13226_v37  ;;  %v3946_v60 = vcombine.high %v3928_v46, %v13226_v37  ;;  %v11226_v22 = vsel %vm1172_vm0, %v4120_v25, %v4122_v30  ;;  %v11229_v56 = vsel %vm1172_vm0, %v4125_v44, %v4127_v41  ;;  %9372 = vmatmul.mubr.msk.f32.gmra.mrb[2].mxu1 %vm662_vm9, %v9368_v33 }
 0x50d   : >> { %3954 = vrot.lane.b32.xlu1 %v3860_v3, %s9812_s23  ;;  %v3877_v10 = vcombine.high %v11142_v2, %v13226_v37  ;;  %v3878_v43 = vcombine.high %v3860_v3, %v13226_v37  ;;  %v3879_v34 = vcombine.high %v3869_v59, %v13226_v37  ;;  %v3880_v24 = vcombine.high %v3876_v26, %v13226_v37 }
 0x50e   : >> { %v11235_v18 = vsel %vm1172_vm0, %v4135_v31, %v4137_v27  ;;  %v3947_v58 = vcombine.high %v3937_v4, %v13226_v37  ;;  %v3944_v35 = vrot.slane %v3930_v21, %v9980_v29  ;;  %v4179_v6 = vcombine.low %v4155_v49, %v4171_v57  ;;  %4098 = vmatprep.mubr.f32.mxu1 %v13226_v37 }
 0x50f   : >> { %3950 = vrot.lane.b32.xlu0 %v3877_v10, %s9815_s29  ;;  %v4180_v38 = vcombine.high %v4155_v49, %v4171_v57  ;;  %v4178_v3 = vrot.slane %v4164_v48, %v9947_v13  ;;  %v4215_v10 = vcombine.low %v11226_v22, %v11232_v61  ;;  %v4231_v51 = vcombine.low %v11229_v56, %v11235_v18 }
 0x510   : >> { %v3948_v54 = vcombine.high %v3944_v35, %v13226_v37  ;;  %v11251_v25 = vrot.slane %v4179_v6, %v9980_v29  ;;  %v4216_v8 = vcombine.high %v11226_v22, %v11232_v61  ;;  %v4232_v31 = vcombine.high %v11229_v56, %v11235_v18 }
 0x511   : >> { %3962 = vrot.lane.b32.xlu1 %v3869_v59, %s9811_s21  ;;  %v4194_v11 = vrot.slane %v4180_v38, %v9980_v29  ;;  %v4195_v40 = vcombine.low %v4162_v14, %v4178_v3  ;;  %v4223_v12 = vrot.slane %v4215_v10, %v9947_v13  ;;  %v4239_v20 = vrot.slane %v4231_v51, %v9947_v13 }
 0x512   : >> { %v4211_v23 = vcombine.high %v11251_v25, %v13226_v37  ;;  %v4196_v59 = vcombine.high %v4162_v14, %v4178_v3 }
 0x513   : >> { %3958 = vrot.lane.b32.xlu0 %v3878_v43, %s9814_s28  ;;  %v4203_v5 = vrot.slane %v4195_v40, %v9980_v29  ;;  %v4247_v44 = vcombine.low %v4223_v12, %v4239_v20  ;;  %v4212_v43 = vcombine.high %v4194_v11, %v13226_v37  ;;  %v4248_v39 = vcombine.high %v4223_v12, %v4239_v20 }
 0x514   : >> { %v4210_v16 = vrot.slane %v4196_v59, %v9980_v29 }
 0x515   : >> { %3970 = vrot.lane.b32.xlu1 %v3876_v26, %s9813_s27  ;;  %v11271_v53 = vrot.slane %v4247_v44, %v9980_v29  ;;  %v4230_v26 = vrot.slane %v4216_v8, %v9947_v13  ;;  %v4213_v50 = vcombine.high %v4203_v5, %v13226_v37 }
 0x516   : >> { %v4214_v7 = vcombine.high %v4210_v16, %v13226_v37 }
 0x517   : >> { %3966 = vrot.lane.b32.xlu0 %v3879_v34, %s9816_s30  ;;  %v4246_v34 = vrot.slane %v4232_v31, %v9947_v13  ;;  %v4279_v42 = vcombine.high %v11271_v53, %v13226_v37 }
 0x519   : >> { %3978 = vrot.lane.b32.xlu1 %v3945_v36, %s9815_s29  ;;  %v4262_v36 = vrot.slane %v4248_v39, %v9980_v29  ;;  %v4264_v30 = vcombine.high %v4230_v26, %v4246_v34 }
 0x51b   : >> { %3974 = vrot.lane.b32.xlu0 %v3880_v24, %s9817_s5  ;;  %v4280_v24 = vcombine.high %v4262_v36, %v13226_v37  ;;  %v4278_v55 = vrot.slane %v4264_v30, %v9980_v29 }
 0x51d   : >> { %3986 = vrot.lane.b32.xlu1 %v3946_v60, %s9814_s28  ;;  %v4282_v27 = vcombine.high %v4278_v55, %v13226_v37 }
 0x51f   : >> { %3982 = vrot.lane.b32.xlu0 %v3928_v46, %s9812_s23  ;;  %v4263_v46 = vcombine.low %v4230_v26, %v4246_v34 }
 0x521   : >> { %3994 = vrot.lane.b32.xlu1 %v3947_v58, %s9816_s30  ;;  %v4271_v49 = vrot.slane %v4263_v46, %v9980_v29 }
 0x523   : >> { %3990 = vrot.lane.b32.xlu0 %v3937_v4, %s9811_s21  ;;  %v4281_v41 = vcombine.high %v4271_v49, %v13226_v37 }
 0x525   : >> { %4002 = vrot.lane.b32.xlu1 %v3948_v54, %s9817_s5 }
 0x527   : >> { %3998 = vrot.lane.b32.xlu0 %v3944_v35, %s9813_s27 }
 0x529   : >> { %4288 = vrot.lane.b32.xlu1 %v4194_v11, %s9812_s23 }
 0x52b   : >> { %4284 = vrot.lane.b32.xlu0 %v4211_v23, %s9815_s29 }
 0x52d   : >> { %4296 = vrot.lane.b32.xlu1 %v4203_v5, %s9811_s21 }
 0x52f   : >> { %4292 = vrot.lane.b32.xlu0 %v4212_v43, %s9814_s28  ;;  %v9373_v43 = vld [vmem:[%s13168_s1 + $0xb0] sm:$0xff] }
 0x531   : >> { %4304 = vrot.lane.b32.xlu1 %v4210_v16, %s9813_s27 }
 0x533   : >> { %4300 = vrot.lane.b32.xlu0 %v4213_v50, %s9816_s30 }
 0x535   : >> { %4312 = vrot.lane.b32.xlu1 %v4279_v42, %s9815_s29 }
 0x537   : >> { %4308 = vrot.lane.b32.xlu0 %v4214_v7, %s9817_s5 }
 0x539   : >> { %4320 = vrot.lane.b32.xlu1 %v4280_v24, %s9814_s28 }
 0x53b   : >> { %4316 = vrot.lane.b32.xlu0 %v4262_v36, %s9812_s23 }
 0x53d   : >> { %4328 = vrot.lane.b32.xlu1 %v4281_v41, %s9816_s30 }
 0x53f   : >> { %4324 = vrot.lane.b32.xlu0 %v4271_v49, %s9811_s21 }
 0x541   : >> { %4336 = vrot.lane.b32.xlu1 %v4282_v27, %s9817_s5 }
 0x543   : >> { %4332 = vrot.lane.b32.xlu0 %v4278_v55, %s9813_s27 }
 0x545   : >> { %4451 = vrot.lane.b32.xlu1 %v11226_v22, %s9818_s6 }
 0x547   : >> { %4449 = vrot.lane.b32.xlu0 %v11161_v52, %s9818_s6 }
 0x549   : >> { %4455 = vrot.lane.b32.xlu1 %v11229_v56, %s9818_s6 }
 0x54b   : >> { %4453 = vrot.lane.b32.xlu0 %v11173_v62, %s9818_s6 }
 0x54d   : >> { %4459 = vrot.lane.b32.xlu1 %v11232_v61, %s9818_s6 }
 0x54f   : >> { %4457 = vrot.lane.b32.xlu0 %v11164_v15, %s9818_s6 }
 0x551   : >> { %4463 = vrot.lane.b32.xlu1 %v11235_v18, %s9818_s6 }
 0x553   : >> { %4461 = vrot.lane.b32.xlu0 %v11176_v9, %s9818_s6 }
 0x57f   : >> { %v3955_v21 = vpop.permute.xlu1 %3954 }
 0x581   : >> { %v3951_v60 = vpop.permute.xlu0 %3950 }
 0x582   : >> { %v4005_v6 = vsel %vm398_vm1, %v11142_v2, %v3951_v60 }
 0x583   : >> { %v3963_v4 = vpop.permute.xlu1 %3962  ;;  %v4006_v10 = vsel %vm400_vm2, %v4005_v6, %v3955_v21 }
 0x585   : >> { %v3959_v57 = vpop.permute.xlu0 %3958 }
 0x586   : >> { %v4007_v54 = vsel %vm402_vm3, %v4006_v10, %v3959_v57 }
 0x587   : >> { %v3971_v28 = vpop.permute.xlu1 %3970  ;;  %v4008_v20 = vsel %vm404_vm4, %v4007_v54, %v3963_v4 }
 0x589   : >> { %v3967_v45 = vpop.permute.xlu0 %3966 }
 0x58a   : >> { %v4009_v2 = vsel %vm406_vm5, %v4008_v20, %v3967_v45 }
 0x58b   : >> { %v3979_v48 = vpop.permute.xlu1 %3978  ;;  %v4010_v44 = vsel %vm408_vm6, %v4009_v2, %v3971_v28 }
 0x58c   : >> { %v4012_v38 = vsel %vm398_vm1, %v11170_v17, %v3979_v48 }
 0x58d   : >> { %v3975_v58 = vpop.permute.xlu0 %3974 }
 0x58e   : >> { %v4011_v16 = vsel %vm410_vm7, %v4010_v44, %v3975_v58 }
 0x58f   : >> { %v3987_v35 = vpop.permute.xlu1 %3986 }
 0x591   : >> { %v3983_v14 = vpop.permute.xlu0 %3982 }
 0x592   : >> { %v4013_v3 = vsel %vm400_vm2, %v4012_v38, %v3983_v14 }
 0x593   : >> { %v3995_v51 = vpop.permute.xlu1 %3994  ;;  %v4014_v11 = vsel %vm402_vm3, %v4013_v3, %v3987_v35 }
 0x595   : >> { %v3991_v40 = vpop.permute.xlu0 %3990 }
 0x596   : >> { %v4015_v12 = vsel %vm404_vm4, %v4014_v11, %v3991_v40 }
 0x597   : >> { %v4003_v23 = vpop.permute.xlu1 %4002  ;;  %v4016_v17 = vsel %vm406_vm5, %v4015_v12, %v3995_v51 }
 0x599   : >> { %v3999_v59 = vpop.permute.xlu0 %3998 }
 0x59a   : >> { %v4017_v5 = vsel %vm408_vm6, %v4016_v17, %v3999_v59 }
 0x59b   : >> { %v4018_v8 = vsel %vm410_vm7, %v4017_v5, %v4003_v23  ;;  %v4289_v31 = vpop.permute.xlu1 %4288 }
 0x59c   : >> { %9375 = vmatprep.subr.msk.mxu1 %vm669_vm8, %v4018_v8 }
 0x59d   : >> { %9376 = vmatpush1.msk.msra.mxu1 %vm669_vm8, %v4011_v16  ;;  %v4285_v39 = vpop.permute.xlu0 %4284 }
 0x59e   : >> { %9377 = vmatmul.mubr.msk.f32.vlgmr.msra.gmra.mrb[0].mxu1 %vm662_vm9, %v9373_v43  ;;  %v4339_v24 = vsel %vm398_vm1, %v11251_v25, %v4285_v39 }
 0x59f   : >> { %v4297_v26 = vpop.permute.xlu1 %4296  ;;  %4104 = vmatprep.mubr.f32.mxu1 %v13226_v37  ;;  %v4340_v41 = vsel %vm400_vm2, %v4339_v24, %v4289_v31 }
 0x5a1   : >> { %v4293_v34 = vpop.permute.xlu0 %4292 }
 0x5a2   : >> { %v4341_v27 = vsel %vm402_vm3, %v4340_v41, %v4293_v34 }
 0x5a3   : >> { %v4305_v50 = vpop.permute.xlu1 %4304  ;;  %v4342_v57 = vsel %vm404_vm4, %v4341_v27, %v4297_v26 }
 0x5a5   : >> { %v4301_v42 = vpop.permute.xlu0 %4300 }
 0x5a6   : >> { %v4343_v28 = vsel %vm406_vm5, %v4342_v57, %v4301_v42 }
 0x5a7   : >> { %v4313_v36 = vpop.permute.xlu1 %4312  ;;  %v4344_v58 = vsel %vm408_vm6, %v4343_v28, %v4305_v50 }
 0x5a8   : >> { %v4346_v7 = vsel %vm398_vm1, %v11271_v53, %v4313_v36 }
 0x5a9   : >> { %v4309_v46 = vpop.permute.xlu0 %4308 }
 0x5aa   : >> { %v4345_v38 = vsel %vm410_vm7, %v4344_v58, %v4309_v46 }
 0x5ab   : >> { %v4321_v33 = vpop.permute.xlu1 %4320 }
 0x5ad   : >> { %v4317_v49 = vpop.permute.xlu0 %4316 }
 0x5ae   : >> { %v4347_v30 = vsel %vm400_vm2, %v4346_v7, %v4317_v49 }
 0x5af   : >> { %v4329_v55 = vpop.permute.xlu1 %4328  ;;  %v4348_v21 = vsel %vm402_vm3, %v4347_v30, %v4321_v33 }
 0x5b1   : >> { %v4325_v60 = vpop.permute.xlu0 %4324 }
 0x5b2   : >> { %v4349_v4 = vsel %vm404_vm4, %v4348_v21, %v4325_v60 }
 0x5b3   : >> { %v4337_v53 = vpop.permute.xlu1 %4336  ;;  %v4350_v25 = vsel %vm406_vm5, %v4349_v4, %v4329_v55 }
 0x5b5   : >> { %v4333_v45 = vpop.permute.xlu0 %4332 }
 0x5b6   : >> { %v4351_v48 = vsel %vm408_vm6, %v4350_v25, %v4333_v45  ;;  %v9374_v25 = vld [vmem:[%s13168_s1 + $0xb8] sm:$0xff] }
 0x5b7   : >> { %v4352_v35 = vsel %vm410_vm7, %v4351_v48, %v4337_v53  ;;  %v4452_v6 = vpop.permute.xlu1 %4451  ;;  %9378 = vmatmul.mubr.msk.f32.gmra.mrb[2].mxu1 %vm662_vm9, %v9374_v25 }
 0x5b8   : >> { %9381 = vmatprep.subr.msk.mxu1 %vm669_vm8, %v4352_v35  ;;  %4432 = vmatprep.mubr.f32.mxu1 %v13226_v37 }
 0x5b9   : >> { %9382 = vmatpush1.msk.msra.mxu1 %vm669_vm8, %v4345_v38  ;;  %v4450_v14 = vpop.permute.xlu0 %4449 }
 0x5bb   : >> { %v4456_v3 = vpop.permute.xlu1 %4455 }
 0x5bd   : >> { %v4454_v10 = vpop.permute.xlu0 %4453 }
 0x5bf   : >> { %v4460_v51 = vpop.permute.xlu1 %4459 }
 0x5c0   : >> { %v4541_v17 = vcombine.low %v4452_v6, %v4460_v51  ;;  %v4542_v46 = vcombine.high %v4452_v6, %v4460_v51  ;;  %v9379_v6 = vld [vmem:[%s13168_s1 + $0xc0] sm:$0xff] }
 0x5c1   : >> { %v4458_v54 = vpop.permute.xlu0 %4457  ;;  %9383 = vmatmul.mubr.msk.f32.vlgmr.msra.gmra.mrb[0].mxu1 %vm662_vm9, %v9379_v6 }
 0x5c2   : >> { %v4473_v11 = vcombine.low %v4450_v14, %v4458_v54  ;;  %v4474_v20 = vcombine.high %v4450_v14, %v4458_v54  ;;  %v4549_v39 = vrot.slane %v4541_v17, %v9947_v13  ;;  %v4556_v41 = vrot.slane %v4542_v46, %v9947_v13  ;;  %4438 = vmatprep.mubr.f32.mxu1 %v13226_v37 }
 0x5c3   : >> { %v4464_v12 = vpop.permute.xlu1 %4463 }
 0x5c4   : >> { %v4481_v59 = vrot.slane %v4473_v11, %v9947_v13  ;;  %v4557_v8 = vcombine.low %v4456_v3, %v4464_v12  ;;  %v4488_v31 = vrot.slane %v4474_v20, %v9947_v13  ;;  %v4558_v33 = vcombine.high %v4456_v3, %v4464_v12 }
 0x5c5   : >> { %v4462_v40 = vpop.permute.xlu0 %4461 }
 0x5c6   : >> { %v4489_v23 = vcombine.low %v4454_v10, %v4462_v40  ;;  %v4490_v2 = vcombine.high %v4454_v10, %v4462_v40  ;;  %v4565_v34 = vrot.slane %v4557_v8, %v9947_v13  ;;  %v4572_v55 = vrot.slane %v4558_v33, %v9947_v13 }
 0x5c8   : >> { %v4497_v5 = vrot.slane %v4489_v23, %v9947_v13  ;;  %v4504_v44 = vrot.slane %v4490_v2, %v9947_v13  ;;  %v4573_v24 = vcombine.low %v4549_v39, %v4565_v34  ;;  %v4574_v27 = vcombine.high %v4549_v39, %v4565_v34 }
 0x5c9   : >> { %v4589_v57 = vcombine.low %v4556_v41, %v4572_v55  ;;  %v4590_v48 = vcombine.high %v4556_v41, %v4572_v55 }
 0x5ca   : >> { %v4505_v43 = vcombine.low %v4481_v59, %v4497_v5  ;;  %v4506_v16 = vcombine.high %v4481_v59, %v4497_v5  ;;  %v4521_v26 = vcombine.low %v4488_v31, %v4504_v44  ;;  %v4522_v7 = vcombine.high %v4488_v31, %v4504_v44 }
 0x5cb   : >> { %v4581_v60 = vrot.slane %v4573_v24, %v9980_v29  ;;  %v4588_v28 = vrot.slane %v4574_v27, %v9980_v29  ;;  %v4597_v35 = vrot.slane %v4589_v57, %v9980_v29  ;;  %v4604_v14 = vrot.slane %v4590_v48, %v9980_v29 }
 0x5cc   : >> { %v4520_v50 = vrot.slane %v4506_v16, %v9980_v29  ;;  %v4513_v42 = vrot.slane %v4505_v43, %v9980_v29  ;;  %v4529_v49 = vrot.slane %v4521_v26, %v9980_v29  ;;  %v4536_v21 = vrot.slane %v4522_v7, %v9980_v29 }
 0x5cd   : >> { %v4605_v53 = vcombine.high %v4581_v60, %v13226_v37  ;;  %v4606_v58 = vcombine.high %v4588_v28, %v13226_v37  ;;  %v4607_v38 = vcombine.high %v4597_v35, %v13226_v37  ;;  %v4608_v3 = vcombine.high %v4604_v14, %v13226_v37 }
 0x5ce   : >> { %4614 = vrot.lane.b32.xlu1 %v4520_v50, %s9812_s23  ;;  %v4537_v36 = vcombine.high %v4513_v42, %v13226_v37  ;;  %v4538_v30 = vcombine.high %v4520_v50, %v13226_v37  ;;  %v4539_v4 = vcombine.high %v4529_v49, %v13226_v37  ;;  %v4540_v45 = vcombine.high %v4536_v21, %v13226_v37 }
 0x5d0   : >> { %4610 = vrot.lane.b32.xlu0 %v4537_v36, %s9815_s29 }
 0x5d2   : >> { %4622 = vrot.lane.b32.xlu1 %v4529_v49, %s9811_s21 }
 0x5d4   : >> { %4618 = vrot.lane.b32.xlu0 %v4538_v30, %s9814_s28 }
 0x5d6   : >> { %4630 = vrot.lane.b32.xlu1 %v4536_v21, %s9813_s27 }
 0x5d8   : >> { %4626 = vrot.lane.b32.xlu0 %v4539_v4, %s9816_s30 }
 0x5da   : >> { %4638 = vrot.lane.b32.xlu1 %v4605_v53, %s9815_s29 }
 0x5dc   : >> { %4634 = vrot.lane.b32.xlu0 %v4540_v45, %s9817_s5 }
 0x5de   : >> { %4646 = vrot.lane.b32.xlu1 %v4606_v58, %s9814_s28 }
 0x5e0   : >> { %4642 = vrot.lane.b32.xlu0 %v4588_v28, %s9812_s23 }
 0x5e2   : >> { %4654 = vrot.lane.b32.xlu1 %v4607_v38, %s9816_s30 }
 0x5e4   : >> { %4650 = vrot.lane.b32.xlu0 %v4597_v35, %s9811_s21 }
 0x5e6   : >> { %4662 = vrot.lane.b32.xlu1 %v4608_v3, %s9817_s5 }
 0x5e8   : >> { %4658 = vrot.lane.b32.xlu0 %v4604_v14, %s9813_s27 }
 0x5ea   : >> { %4777 = vrot.lane.b32.xlu1 %v11226_v22, %s9819_s7 }
 0x5ec   : >> { %4775 = vrot.lane.b32.xlu0 %v11161_v52, %s9819_s7 }
 0x5ee   : >> { %4781 = vrot.lane.b32.xlu1 %v11229_v56, %s9819_s7 }
 0x5f0   : >> { %4779 = vrot.lane.b32.xlu0 %v11173_v62, %s9819_s7 }
 0x5f2   : >> { %4785 = vrot.lane.b32.xlu1 %v11232_v61, %s9819_s7 }
 0x5f4   : >> { %4783 = vrot.lane.b32.xlu0 %v11164_v15, %s9819_s7 }
 0x5f6   : >> { %4789 = vrot.lane.b32.xlu1 %v11235_v18, %s9819_s7 }
 0x5f8   : >> { %4787 = vrot.lane.b32.xlu0 %v11176_v9, %s9819_s7 }
 0x640   : >> { %v4615_v22 = vpop.permute.xlu1 %4614 }
 0x642   : >> { %v4611_v52 = vpop.permute.xlu0 %4610 }
 0x643   : >> { %v4665_v61 = vsel %vm398_vm1, %v4513_v42, %v4611_v52 }
 0x644   : >> { %v4623_v10 = vpop.permute.xlu1 %4622  ;;  %v4666_v18 = vsel %vm400_vm2, %v4665_v61, %v4615_v22 }
 0x646   : >> { %v4619_v51 = vpop.permute.xlu0 %4618 }
 0x647   : >> { %v4667_v9 = vsel %vm402_vm3, %v4666_v18, %v4619_v51 }
 0x648   : >> { %v4631_v56 = vpop.permute.xlu1 %4630  ;;  %v4668_v5 = vsel %vm404_vm4, %v4667_v9, %v4623_v10 }
 0x64a   : >> { %v4627_v54 = vpop.permute.xlu0 %4626 }
 0x64b   : >> { %v4669_v8 = vsel %vm406_vm5, %v4668_v5, %v4627_v54 }
 0x64c   : >> { %v4639_v11 = vpop.permute.xlu1 %4638  ;;  %v4670_v34 = vsel %vm408_vm6, %v4669_v8, %v4631_v56 }
 0x64d   : >> { %v4672_v12 = vsel %vm398_vm1, %v4581_v60, %v4639_v11 }
 0x64e   : >> { %v4635_v62 = vpop.permute.xlu0 %4634 }
 0x64f   : >> { %v4671_v50 = vsel %vm410_vm7, %v4670_v34, %v4635_v62 }
 0x650   : >> { %v4647_v40 = vpop.permute.xlu1 %4646 }
 0x652   : >> { %v4643_v15 = vpop.permute.xlu0 %4642 }
 0x653   : >> { %v4673_v20 = vsel %vm400_vm2, %v4672_v12, %v4643_v15 }
 0x654   : >> { %v4655_v23 = vpop.permute.xlu1 %4654  ;;  %v4674_v2 = vsel %vm402_vm3, %v4673_v20, %v4647_v40 }
 0x656   : >> { %v4651_v17 = vpop.permute.xlu0 %4650 }
 0x657   : >> { %v4675_v59 = vsel %vm404_vm4, %v4674_v2, %v4651_v17 }
 0x658   : >> { %v4663_v44 = vpop.permute.xlu1 %4662  ;;  %v4676_v31 = vsel %vm406_vm5, %v4675_v59, %v4655_v23  ;;  %v9712_v59 = vld [vmem:[%s9935_s19 + $0x1d0] sm:$0xff] }
 0x659   : >> { %v5107_v5 = vrot.slane %v9712_v59, 2 }
 0x65a   : >> { %v4659_v43 = vpop.permute.xlu0 %4658 }
 0x65b   : >> { %v4677_v16 = vsel %vm408_vm6, %v4676_v31, %v4659_v43  ;;  %v9713_v31 = vld [vmem:[%s9935_s19 + $0x20] sm:$0xff] }
 0x65c   : >> { %v4678_v39 = vsel %vm410_vm7, %v4677_v16, %v4663_v44  ;;  %v4778_v26 = vpop.permute.xlu1 %4777  ;;  %v5109_v44 = vrot.slane %v11186_v32, 2  ;;  %v5102_v43 = vrot.slane %v9713_v31, 2  ;;  %v5104_v16 = vrot.slane %v11183_v63, 2 }
 0x65d   : >> { %9387 = vmatprep.subr.msk.mxu0 %vm669_vm8, %v4678_v39  ;;  %9504 = vmatprep.subr.msk.mxu1 %vm669_vm8, %v4678_v39  ;;  %v5114_v63 = vrot.slane %v11195_v47, 2 }
 0x65e   : >> { %9388 = vmatpush1.msk.msra.mxu0 %vm669_vm8, %v4671_v50  ;;  %9505 = vmatpush1.msk.msra.mxu1 %vm669_vm8, %v4671_v50  ;;  %v4776_v42 = vpop.permute.xlu0 %4775  ;;  %v11492_v39 = vsel %vm2155_vm10, %v5107_v5, %v5109_v44  ;;  %v5119_v50 = vrot.slane %v11198_v19, 2  ;;  %v11498_v32 = vsel %vm2155_vm10, %v5102_v43, %v5104_v16 }
 0x660   : >> { %v4782_v36 = vpop.permute.xlu1 %4781 }
 0x662   : >> { %v4780_v46 = vpop.permute.xlu0 %4779 }
 0x664   : >> { %v4786_v7 = vpop.permute.xlu1 %4785 }
 0x665   : >> { %v4868_v33 = vcombine.high %v4778_v26, %v4786_v7  ;;  %v4867_v53 = vcombine.low %v4778_v26, %v4786_v7  ;;  %v9714_v26 = vld [vmem:[%s9935_s19 + $0x530] sm:$0xff]  ;;  %v9716_v7 = vld [vmem:[%s9935_s19 + $0x1c8] sm:$0xff] }
 0x666   : >> { %v4784_v24 = vpop.permute.xlu0 %4783  ;;  %v5117_v34 = vrot.slane %v9714_v26, 2 }
 0x667   : >> { %v11441_v30 = vrot.slane %v4868_v33, %v9947_v13  ;;  %v4799_v55 = vcombine.low %v4776_v42, %v4784_v24  ;;  %v4800_v57 = vcombine.high %v4776_v42, %v4784_v24  ;;  %v4875_v14 = vrot.slane %v4867_v53, %v9947_v13  ;;  %v9715_v42 = vld [vmem:[%s9935_s19 + $0x380] sm:$0xff]  ;;  %v9717_v24 = vld [vmem:[%s9935_s19 + $0x18] sm:$0xff] }
 0x668   : >> { %v4790_v49 = vpop.permute.xlu1 %4789  ;;  %v5106_v33 = vrot.slane %v9716_v7, 2  ;;  %v9385_v7 = vld [vmem:[%s13168_s1 + $0xd0] sm:$0xff] }
 0x669   : >> { %v4884_v41 = vcombine.high %v4782_v36, %v4790_v49  ;;  %v4807_v25 = vrot.slane %v4799_v55, %v9947_v13  ;;  %v4883_v45 = vcombine.low %v4782_v36, %v4790_v49  ;;  %v4814_v35 = vrot.slane %v4800_v57, %v9947_v13  ;;  %9389 = vmatmul.mubr.msk.f32.vlgmr.msra.gmra.mrb[0].mxu0 %vm662_vm9, %v9385_v7 }
 0x66a   : >> { %v4788_v27 = vpop.permute.xlu0 %4787  ;;  %v5112_v36 = vrot.slane %v9715_v42, 2  ;;  %v5101_v49 = vrot.slane %v9717_v24, 2  ;;  %v11517_v47 = vsel %vm2155_vm10, %v5106_v33, %v5107_v5  ;;  %5084 = vmatprep.mubr.f32.mxu0 %v13226_v37 }
 0x66b   : >> { %v11444_v21 = vrot.slane %v4884_v41, %v9947_v13  ;;  %v4815_v60 = vcombine.low %v4780_v46, %v4788_v27  ;;  %v4816_v4 = vcombine.high %v4780_v46, %v4788_v27  ;;  %v4891_v3 = vrot.slane %v4883_v45, %v9947_v13  ;;  %v9718_v41 = vld [vmem:[%s9935_s19 + $0x528] sm:$0xff]  ;;  %v11560_v45 = vld [vmem:[%s9935_s19 + $0x38] sm:$0xff] }
 0x66c   : >> { %v11505_v46 = vsel %vm2155_vm10, %v5117_v34, %v5119_v50  ;;  %v11511_v19 = vsel %vm2155_vm10, %v5112_v36, %v5114_v63  ;;  %v5116_v55 = vrot.slane %v9718_v41, 2  ;;  %v11523_v27 = vsel %vm2155_vm10, %v5101_v49, %v5102_v43 }
 0x66d   : >> { %v4916_v28 = vcombine.high %v11441_v30, %v11444_v21  ;;  %v4823_v48 = vrot.slane %v4815_v60, %v9947_v13  ;;  %v4830_v58 = vrot.slane %v4816_v4, %v9947_v13  ;;  %v4899_v56 = vcombine.low %v4875_v14, %v4891_v3  ;;  %v9719_v60 = vld [vmem:[%s9935_s19 + $0x378] sm:$0xff] }
 0x66e   : >> { %v4900_v40 = vcombine.high %v4875_v14, %v4891_v3  ;;  %v4915_v20 = vcombine.low %v11441_v30, %v11444_v21  ;;  %v5111_v4 = vrot.slane %v9719_v60, 2  ;;  %v11529_v57 = vsel %vm2155_vm10, %v5116_v55, %v5117_v34  ;;  %v11590_v14 = vld [vmem:[%s9935_s19 + $0x390] sm:$0xff] }
 0x66f   : >> { %v4831_v6 = vcombine.low %v4807_v25, %v4823_v48  ;;  %v4832_v38 = vcombine.high %v4807_v25, %v4823_v48  ;;  %v4847_v22 = vcombine.low %v4814_v35, %v4830_v58  ;;  %v4848_v54 = vcombine.high %v4814_v35, %v4830_v58  ;;  %v11555_v25 = vld [vmem:[%s9935_s19 + $0x1e8] sm:$0xff]  ;;  %v11570_v58 = vld [vmem:[%s9935_s19 + $0x398] sm:$0xff]  ;;  %v11575_v35 = vld [vmem:[%s9935_s19 + $0x1e0] sm:$0xff] }
 0x670   : >> { %v11468_v12 = vrot.slane %v4899_v56, %v9980_v29  ;;  %v4914_v23 = vrot.slane %v4900_v40, %v9980_v29  ;;  %v4923_v17 = vrot.slane %v4915_v20, %v9980_v29  ;;  %v11534_v53 = vsel %vm2155_vm10, %v5111_v4, %v5112_v36  ;;  %v11565_v48 = vld [vmem:[%s9935_s19 + $0x548] sm:$0xff]  ;;  %v11605_v3 = vld [vmem:[%s9935_s19 + $0x1f0] sm:$0x3] }
 0x671   : >> { %v4846_v52 = vrot.slane %v4832_v38, %v9980_v29  ;;  %v11456_v10 = vrot.slane %v4831_v6, %v9980_v29  ;;  %v4855_v11 = vrot.slane %v4847_v22, %v9980_v29  ;;  %v4862_v61 = vrot.slane %v4848_v54, %v9980_v29  ;;  %v11580_v6 = vld [vmem:[%s9935_s19 + $0x30] sm:$0xff]  ;;  %v11585_v38 = vld [vmem:[%s9935_s19 + $0x540] sm:$0xff] }
 0x672   : >> { %v4931_v18 = vcombine.high %v11468_v12, %v13226_v37  ;;  %v4932_v2 = vcombine.high %v4914_v23, %v13226_v37  ;;  %v4933_v8 = vcombine.high %v4923_v17, %v13226_v37  ;;  %v11610_v22 = vld [vmem:[%s9935_s19 + $0x40] sm:$0x3]  ;;  %v11617_v56 = vld [vmem:[%s9935_s19 + $0x550] sm:$0x3]  ;;  %v7065_v54 = vrot.slane %v11560_v45, 1 }
 0x673   : >> { %4940 = vrot.lane.b32.xlu1 %v4846_v52, %s9812_s23  ;;  %v4863_v51 = vcombine.high %v11456_v10, %v13226_v37  ;;  %v4864_v62 = vcombine.high %v4846_v52, %v13226_v37  ;;  %v4865_v15 = vcombine.high %v4855_v11, %v13226_v37  ;;  %v4866_v9 = vcombine.high %v4862_v61, %v13226_v37 }
 0x674   : >> { %v7070_v52 = vrot.slane %v11555_v25, 1  ;;  %v7064_v59 = vrot.slane %v11580_v6, 1  ;;  %v7079_v44 = vrot.slane %v11585_v38, 1  ;;  %v7074_v31 = vrot.slane %v11590_v14, 1 }
 0x675   : >> { %4936 = vrot.lane.b32.xlu0 %v4863_v51, %s9815_s29  ;;  %v7072_v51 = vrot.slane %v11605_v3, 1  ;;  %v5145_v26 = vcombine.low %v11517_v47, %v11529_v57  ;;  %v5129_v34 = vcombine.low %v11523_v27, %v11534_v53  ;;  %v5213_v50 = vcombine.low %v11492_v39, %v11505_v46 }
 0x676   : >> { %v5197_v42 = vcombine.low %v11498_v32, %v11511_v19  ;;  %v4930_v49 = vrot.slane %v4916_v28, %v9980_v29  ;;  %v5146_v28 = vcombine.high %v11517_v47, %v11529_v57 }
 0x677   : >> { %4948 = vrot.lane.b32.xlu1 %v4855_v11, %s9811_s21  ;;  %v7067_v11 = vrot.slane %v11610_v22, 1  ;;  %v11627_v40 = vsel %vm1172_vm0, %v7070_v52, %v7072_v51  ;;  %v5153_v36 = vrot.slane %v5145_v26, %v9947_v13  ;;  %v5137_v63 = vrot.slane %v5129_v34, %v9947_v13 }
 0x678   : >> { %13227 = vst [vmem:[#allocation8_spill] sm:$0xff] %v11627_v40  ;;  %v5221_v33 = vrot.slane %v5213_v50, %v9947_v13  ;;  %v5205_v24 = vrot.slane %v5197_v42, %v9947_v13  ;;  %v4934_v30 = vcombine.high %v4930_v49, %v13226_v37 }
 0x679   : >> { %4944 = vrot.lane.b32.xlu0 %v4864_v62, %s9814_s28  ;;  %v11624_v62 = vld [vmem:[%s9935_s19 + $0x3a0] sm:$0x3]  ;;  %v11634_v20 = vsel %vm1172_vm0, %v7065_v54, %v7067_v11  ;;  %v5161_v41 = vcombine.low %v5137_v63, %v5153_v36 }
 0x67a   : >> { %13228 = vst [vmem:[#allocation9_spill] sm:$0xff] %v11634_v20  ;;  %v5229_v60 = vcombine.low %v5205_v24, %v5221_v33 }
 0x67b   : >> { %4956 = vrot.lane.b32.xlu1 %v4862_v61, %s9813_s27  ;;  %v7080_v61 = vrot.slane %v11565_v48, 1 }
 0x67c   : >> { %v11723_v21 = vrot.slane %v5229_v60, %v9980_v29 }
 0x67d   : >> { %4952 = vrot.lane.b32.xlu0 %v4865_v15, %s9816_s30  ;;  %v7082_v15 = vrot.slane %v11617_v56, 1  ;;  %v11665_v43 = vsel %vm1172_vm0, %v7079_v44, %v7080_v61 }
 0x67e   : >> { %13233 = vst [vmem:[#allocation14_spill] sm:$0xff] %v11665_v43 }
 0x67f   : >> { %4964 = vrot.lane.b32.xlu1 %v4931_v18, %s9815_s29  ;;  %v7075_v18 = vrot.slane %v11570_v58, 1 }
 0x681   : >> { %4960 = vrot.lane.b32.xlu0 %v4866_v9, %s9817_s5  ;;  %v11641_v9 = vsel %vm1172_vm0, %v7080_v61, %v7082_v15  ;;  %v11670_v16 = vsel %vm1172_vm0, %v7074_v31, %v7075_v18  ;;  %v5162_v15 = vcombine.high %v5137_v63, %v5153_v36 }
 0x682   : >> { %13229 = vst [vmem:[#allocation10_spill] sm:$0xff] %v11641_v9  ;;  %13234 = vst [vmem:[#allocation15_spill] sm:$0xff] %v11670_v16 }
 0x683   : >> { %4972 = vrot.lane.b32.xlu1 %v4932_v2, %s9814_s28  ;;  %v7069_v2 = vrot.slane %v11575_v35, 1 }
 0x685   : >> { %4968 = vrot.lane.b32.xlu0 %v4914_v23, %s9812_s23  ;;  %v7077_v23 = vrot.slane %v11624_v62, 1  ;;  %v11653_v5 = vsel %vm1172_vm0, %v7069_v2, %v7070_v52  ;;  %v11715_v52 = vrot.slane %v5161_v41, %v9980_v29 }
 0x686   : >> { %13231 = vst [vmem:[#allocation12_spill] sm:$0xff] %v11653_v5 }
 0x687   : >> { %4980 = vrot.lane.b32.xlu1 %v4933_v8, %s9816_s30  ;;  %v11659_v8 = vsel %vm1172_vm0, %v7064_v59, %v7065_v54  ;;  %v5130_v54 = vcombine.high %v11523_v27, %v11534_v53  ;;  %v5193_v61 = vcombine.high %v11715_v52, %v13226_v37 }
 0x688   : >> { %13232 = vst [vmem:[#allocation13_spill] sm:$0xff] %v11659_v8 }
 0x689   : >> { %4976 = vrot.lane.b32.xlu0 %v4923_v17, %s9811_s21  ;;  %v11647_v17 = vsel %vm1172_vm0, %v7075_v18, %v7077_v23  ;;  %v5214_v18 = vcombine.high %v11492_v39, %v11505_v46  ;;  %v5198_v23 = vcombine.high %v11498_v32, %v11511_v19 }
 0x68a   : >> { %13230 = vst [vmem:[#allocation11_spill] sm:$0xff] %v11647_v17 }
 0x68b   : >> { %5437 = vrot.lane.b32.xlu1 %v11492_v39, %s9818_s6 }
 0x68d   : >> { %5433 = vrot.lane.b32.xlu0 %v11498_v32, %s9818_s6 }
 0x68f   : >> { %5445 = vrot.lane.b32.xlu1 %v11505_v46, %s9818_s6 }
 0x691   : >> { %5441 = vrot.lane.b32.xlu0 %v11511_v19, %s9818_s6 }
 0x693   : >> { %5435 = vrot.lane.b32.xlu1 %v11517_v47, %s9818_s6 }
 0x695   : >> { %5431 = vrot.lane.b32.xlu0 %v11523_v27, %s9818_s6 }
 0x697   : >> { %5443 = vrot.lane.b32.xlu1 %v11529_v57, %s9818_s6 }
 0x699   : >> { %5439 = vrot.lane.b32.xlu0 %v11534_v53, %s9818_s6 }
 0x69b   : >> { %5763 = vrot.lane.b32.xlu1 %v11492_v39, %s9819_s7  ;;  %v5176_v39 = vrot.slane %v5162_v15, %v9980_v29 }
 0x69d   : >> { %5759 = vrot.lane.b32.xlu0 %v11498_v32, %s9819_s7  ;;  %v5228_v32 = vrot.slane %v5214_v18, %v9947_v13  ;;  %v5194_v26 = vcombine.high %v5176_v39, %v13226_v37 }
 0x69f   : >> { %5771 = vrot.lane.b32.xlu1 %v11505_v46, %s9819_s7  ;;  %v5212_v46 = vrot.slane %v5198_v23, %v9947_v13 }
 0x6a1   : >> { %5767 = vrot.lane.b32.xlu0 %v11511_v19, %s9819_s7  ;;  %v5245_v36 = vcombine.low %v5212_v46, %v5228_v32 }
 0x6a3   : >> { %5761 = vrot.lane.b32.xlu1 %v11517_v47, %s9819_s7  ;;  %v5261_v47 = vcombine.high %v11723_v21, %v13226_v37 }
 0x6a5   : >> { %5757 = vrot.lane.b32.xlu0 %v11523_v27, %s9819_s7  ;;  %v5230_v27 = vcombine.high %v5205_v24, %v5221_v33  ;;  %v5253_v24 = vrot.slane %v5245_v36, %v9980_v29 }
 0x6a7   : >> { %5769 = vrot.lane.b32.xlu1 %v11529_v57, %s9819_s7  ;;  %v5160_v57 = vrot.slane %v5146_v28, %v9947_v13  ;;  %v5244_v44 = vrot.slane %v5230_v27, %v9980_v29  ;;  %v5263_v28 = vcombine.high %v5253_v24, %v13226_v37 }
 0x6a9   : >> { %5765 = vrot.lane.b32.xlu0 %v11534_v53, %s9819_s7  ;;  %v5144_v53 = vrot.slane %v5130_v54, %v9947_v13  ;;  %v5262_v42 = vcombine.high %v5244_v44, %v13226_v37  ;;  %v5246_v54 = vcombine.high %v5212_v46, %v5228_v32 }
 0x6ab   : >> { %6414 = vrot.lane.b32.xlu1 %v11555_v25, %s9818_s6  ;;  %v5177_v34 = vcombine.low %v5144_v53, %v5160_v57  ;;  %v5178_v60 = vcombine.high %v5144_v53, %v5160_v57  ;;  %v5260_v23 = vrot.slane %v5246_v54, %v9980_v29 }
 0x6ad   : >> { %6410 = vrot.lane.b32.xlu0 %v11560_v45, %s9818_s6  ;;  %v5185_v7 = vrot.slane %v5177_v34, %v9980_v29  ;;  %v5192_v15 = vrot.slane %v5178_v60, %v9980_v29  ;;  %v5264_v32 = vcombine.high %v5260_v23, %v13226_v37 }
 0x6af   : >> { %6422 = vrot.lane.b32.xlu1 %v11565_v48, %s9818_s6  ;;  %v5195_v41 = vcombine.high %v5185_v7, %v13226_v37  ;;  %v5196_v57 = vcombine.high %v5192_v15, %v13226_v37 }
 0x6b1   : >> { %6418 = vrot.lane.b32.xlu0 %v11570_v58, %s9818_s6 }
 0x6b3   : >> { %6412 = vrot.lane.b32.xlu1 %v11575_v35, %s9818_s6 }
 0x6b5   : >> { %6408 = vrot.lane.b32.xlu0 %v11580_v6, %s9818_s6 }
 0x6b7   : >> { %6420 = vrot.lane.b32.xlu1 %v11585_v38, %s9818_s6 }
 0x6b9   : >> { %6416 = vrot.lane.b32.xlu0 %v11590_v14, %s9818_s6 }
 0x6bb   : >> { %6740 = vrot.lane.b32.xlu1 %v11555_v25, %s9819_s7 }
 0x6bd   : >> { %6736 = vrot.lane.b32.xlu0 %v11560_v45, %s9819_s7 }
 0x6bf   : >> { %6748 = vrot.lane.b32.xlu1 %v11565_v48, %s9819_s7 }
 0x6c1   : >> { %6744 = vrot.lane.b32.xlu0 %v11570_v58, %s9819_s7 }
 0x6c3   : >> { %6738 = vrot.lane.b32.xlu1 %v11575_v35, %s9819_s7 }
 0x6c5   : >> { %6734 = vrot.lane.b32.xlu0 %v11580_v6, %s9819_s7 }
 0x6c7   : >> { %6746 = vrot.lane.b32.xlu1 %v11585_v38, %s9819_s7 }
 0x6c9   : >> { %6742 = vrot.lane.b32.xlu0 %v11590_v14, %s9819_s7 }
 0x6cb   : >> { %7400 = vrot.lane.b32.xlu1 %v11627_v40, %s9818_s6 }
 0x6cd   : >> { %7396 = vrot.lane.b32.xlu0 %v11634_v20, %s9818_s6 }
 0x6cf   : >> { %7408 = vrot.lane.b32.xlu1 %v11641_v9, %s9818_s6 }
 0x6d1   : >> { %7404 = vrot.lane.b32.xlu0 %v11647_v17, %s9818_s6 }
 0x6d3   : >> { %7398 = vrot.lane.b32.xlu1 %v11653_v5, %s9818_s6 }
 0x6d5   : >> { %7394 = vrot.lane.b32.xlu0 %v11659_v8, %s9818_s6 }
 0x6d7   : >> { %7406 = vrot.lane.b32.xlu1 %v11665_v43, %s9818_s6 }
 0x6d9   : >> { %7402 = vrot.lane.b32.xlu0 %v11670_v16, %s9818_s6 }
 0x6db   : >> { %7726 = vrot.lane.b32.xlu1 %v11627_v40, %s9819_s7  ;;  %v8046_v40 = vrot.slane %v11580_v6, 2 }
 0x6dd   : >> { %7722 = vrot.lane.b32.xlu0 %v11634_v20, %s9819_s7 }
 0x6df   : >> { %7734 = vrot.lane.b32.xlu1 %v11641_v9, %s9819_s7 }
 0x6e1   : >> { %7730 = vrot.lane.b32.xlu0 %v11647_v17, %s9819_s7  ;;  %v8061_v17 = vrot.slane %v11585_v38, 2 }
 0x6e3   : >> { %7720 = vrot.lane.b32.xlu1 %v11659_v8, %s9819_s7  ;;  %v8047_v8 = vrot.slane %v11560_v45, 2 }
 0x6e5   : >> { %v11707_v55 = vpop.permute.xlu1 %4940  ;;  %4984 = vrot.lane.b32.xlu0 %v4930_v49, %s9813_s27 }
 0x6e7   : >> { %7728 = vrot.lane.b32.xlu1 %v11670_v16, %s9819_s7  ;;  %v11712_v4 = vpop.permute.xlu0 %4936  ;;  %v8049_v16 = vrot.slane %v11610_v22, 2  ;;  %v8059_v22 = vrot.slane %v11624_v62, 2 }
 0x6e9   : >> { %v11717_v51 = vpop.permute.xlu1 %4948  ;;  %7724 = vrot.lane.b32.xlu0 %v11653_v5, %s9819_s7 }
 0x6eb   : >> { %4988 = vrot.lane.b32.xlu1 %v4934_v30, %s9817_s5  ;;  %v11730_v11 = vpop.permute.xlu0 %4944 }
 0x6ed   : >> { %v11738_v2 = vpop.permute.xlu1 %4956  ;;  %7732 = vrot.lane.b32.xlu0 %v11665_v43, %s9819_s7 }
 0x6ef   : >> { %5266 = vrot.lane.b32.xlu1 %v5193_v61, %s9815_s29  ;;  %v11747_v59 = vpop.permute.xlu0 %4952 }
 0x6f1   : >> { %v11752_v19 = vpop.permute.xlu1 %4964  ;;  %5294 = vrot.lane.b32.xlu0 %v5261_v47, %s9815_s29 }
 0x6f3   : >> { %5270 = vrot.lane.b32.xlu1 %v5176_v39, %s9812_s23  ;;  %v11757_v31 = vpop.permute.xlu0 %4960 }
 0x6f5   : >> { %v11760_v50 = vpop.permute.xlu1 %4972  ;;  %5298 = vrot.lane.b32.xlu0 %v5244_v44, %s9812_s23 }
 0x6f7   : >> { %5274 = vrot.lane.b32.xlu1 %v5194_v26, %s9814_s28  ;;  %v11765_v63 = vpop.permute.xlu0 %4968 }
 0x6f9   : >> { %v11768_v33 = vpop.permute.xlu1 %4980  ;;  %5302 = vrot.lane.b32.xlu0 %v5262_v42, %s9814_s28 }
 0x6fb   : >> { %5278 = vrot.lane.b32.xlu1 %v5185_v7, %s9811_s21  ;;  %v11773_v49 = vpop.permute.xlu0 %4976 }
 0x6fd   : >> { %v5438_v30 = vpop.permute.xlu1 %5437  ;;  %5306 = vrot.lane.b32.xlu0 %v5253_v24, %s9811_s21 }
 0x6ff   : >> { %5282 = vrot.lane.b32.xlu1 %v5195_v41, %s9816_s30  ;;  %v5434_v61 = vpop.permute.xlu0 %5433 }
 0x701   : >> { %v5446_v18 = vpop.permute.xlu1 %5445  ;;  %5310 = vrot.lane.b32.xlu0 %v5263_v28, %s9816_s30 }
 0x702   : >> { %v5539_v47 = vcombine.low %v5438_v30, %v5446_v18 }
 0x703   : >> { %5286 = vrot.lane.b32.xlu1 %v5192_v15, %s9813_s27  ;;  %v5442_v27 = vpop.permute.xlu0 %5441 }
 0x704   : >> { %v5523_v53 = vcombine.low %v5434_v61, %v5442_v27  ;;  %v5547_v46 = vrot.slane %v5539_v47, %v9947_v13  ;;  %v5524_v41 = vcombine.high %v5434_v61, %v5442_v27 }
 0x705   : >> { %v5436_v39 = vpop.permute.xlu1 %5435  ;;  %5314 = vrot.lane.b32.xlu0 %v5260_v23, %s9813_s27  ;;  %v5540_v23 = vcombine.high %v5438_v30, %v5446_v18 }
 0x706   : >> { %v5531_v44 = vrot.slane %v5523_v53, %v9947_v13 }
 0x707   : >> { %5290 = vrot.lane.b32.xlu1 %v5196_v57, %s9817_s5  ;;  %v5432_v26 = vpop.permute.xlu0 %5431 }
 0x708   : >> { %v5555_v34 = vcombine.low %v5531_v44, %v5547_v46  ;;  %v5556_v28 = vcombine.high %v5531_v44, %v5547_v46  ;;  %v5554_v46 = vrot.slane %v5540_v23, %v9947_v13 }
 0x709   : >> { %v5444_v42 = vpop.permute.xlu1 %5443  ;;  %5318 = vrot.lane.b32.xlu0 %v5264_v32, %s9817_s5  ;;  %v5538_v32 = vrot.slane %v5524_v41, %v9947_v13 }
 0x70a   : >> { %v5471_v36 = vcombine.low %v5436_v39, %v5444_v42  ;;  %v11791_v7 = vrot.slane %v5555_v34, %v9980_v29  ;;  %v5570_v27 = vrot.slane %v5556_v28, %v9980_v29  ;;  %v5472_v28 = vcombine.high %v5436_v39, %v5444_v42 }
 0x70b   : >> { %v5440_v24 = vpop.permute.xlu0 %5439  ;;  %v5571_v18 = vcombine.low %v5538_v32, %v5554_v46  ;;  %v8054_v42 = vrot.slane %v11605_v3, 2  ;;  %v8062_v3 = vrot.slane %v11565_v48, 2  ;;  %v5572_v5 = vcombine.high %v5538_v32, %v5554_v46 }
 0x70c   : >> { %13235 = vst [vmem:[#allocation16_spill] sm:$0xff] %v11791_v7  ;;  %v5455_v60 = vcombine.low %v5432_v26, %v5440_v24  ;;  %v5587_v15 = vcombine.high %v11791_v7, %v13226_v37  ;;  %v5479_v47 = vrot.slane %v5471_v36, %v9947_v13  ;;  %v5456_v36 = vcombine.high %v5432_v26, %v5440_v24 }
 0x70d   : >> { %v11793_v54 = vpop.permute.xlu1 %5763  ;;  %v5588_v41 = vcombine.high %v5570_v27, %v13226_v37  ;;  %v5579_v26 = vrot.slane %v5571_v18, %v9980_v29  ;;  %v5586_v46 = vrot.slane %v5572_v5, %v9980_v29 }
 0x70e   : >> { %v5463_v57 = vrot.slane %v5455_v60, %v9947_v13  ;;  %5620 = vrot.lane.b32.xlu0 %v5587_v15, %s9815_s29 }
 0x70f   : >> { %v11800_v53 = vpop.permute.xlu0 %5759  ;;  %v5589_v18 = vcombine.high %v5579_v26, %v13226_v37 }
 0x710   : >> { %v5487_v34 = vcombine.low %v5463_v57, %v5479_v47  ;;  %v5488_v60 = vcombine.high %v5463_v57, %v5479_v47  ;;  %v11830_v47 = vrot.slane %v5472_v28, %v9947_v13  ;;  %v8064_v28 = vrot.slane %v11617_v56, 2 }
 0x711   : >> { %v11803_v61 = vpop.permute.xlu1 %5771  ;;  %v11867_v56 = vsel %vm2155_vm10, %v8047_v8, %v8049_v16  ;;  %v8051_v16 = vrot.slane %v11575_v35, 2 }
 0x712   : >> { %v11808_v44 = vrot.slane %v5487_v34, %v9980_v29  ;;  %5624 = vrot.lane.b32.xlu0 %v5570_v27, %s9812_s23  ;;  %v11823_v34 = vrot.slane %v5456_v36, %v9947_v13  ;;  %v5502_v24 = vrot.slane %v5488_v60, %v9980_v29  ;;  %13239 = vst [vmem:[#allocation20_spill] sm:$0xff] %v11867_v56 }
 0x713   : >> { %v11811_v30 = vpop.permute.xlu0 %5767 }
 0x714   : >> { %13236 = vst [vmem:[#allocation17_spill] sm:$0xff] %v11808_v44  ;;  %v5519_v0 = vcombine.high %v11808_v44, %v13226_v37  ;;  %v5503_v57 = vcombine.low %v11823_v34, %v11830_v47  ;;  %v5520_v36 = vcombine.high %v5502_v24, %v13226_v37  ;;  %v5865_v44 = vcombine.low %v11793_v54, %v11803_v61 }
 0x715   : >> { %v11813_v15 = vpop.permute.xlu1 %5761  ;;  %v5849_v62 = vcombine.low %v11800_v53, %v11811_v30 }
 0x716   : >> { %5628 = vrot.lane.b32.xlu0 %v5588_v41, %s9814_s28  ;;  %5592 = vrot.lane.b32.xlu1 %v5519_v0, %s9815_s29  ;;  %v8052_v0 = vrot.slane %v11555_v25, 2  ;;  %v5873_v9 = vrot.slane %v5865_v44, %v9947_v13  ;;  %v8056_v44 = vrot.slane %v11590_v14, 2 }
 0x717   : >> { %v11820_v23 = vpop.permute.xlu0 %5757  ;;  %v5857_v7 = vrot.slane %v5849_v62, %v9947_v13 }
 0x718   : >> { %v11849_v41 = vsel %vm2155_vm10, %v8052_v0, %v8054_v42  ;;  %v11864_v42 = vsel %vm2155_vm10, %v8062_v3, %v8064_v28 }
 0x719   : >> { %v11825_v1 = vpop.permute.xlu1 %5769  ;;  %13237 = vst [vmem:[#allocation18_spill] sm:$0xff] %v11849_v41  ;;  %13238 = vst [vmem:[#allocation19_spill] sm:$0xff] %v11864_v42  ;;  %v5881_v62 = vcombine.low %v5857_v7, %v5873_v9 }
 0x71a   : >> { %5632 = vrot.lane.b32.xlu0 %v5579_v26, %s9811_s21  ;;  %5596 = vrot.lane.b32.xlu1 %v5502_v24, %s9812_s23  ;;  %v5511_v24 = vrot.slane %v5503_v57, %v9980_v29 }
 0x71b   : >> { %v11834_v39 = vpop.permute.xlu0 %5765 }
 0x71c   : >> { %v5521_v5 = vcombine.high %v5511_v24, %v13226_v37 }
 0x71d   : >> { %v11840_v27 = vpop.permute.xlu1 %6414 }
 0x71e   : >> { %5636 = vrot.lane.b32.xlu0 %v5589_v18, %s9816_s30  ;;  %5600 = vrot.lane.b32.xlu1 %v5520_v36, %s9814_s28  ;;  %v8057_v36 = vrot.slane %v11570_v58, 2 }
 0x71f   : >> { %v11846_v60 = vpop.permute.xlu0 %6410 }
 0x720   : >> { %v11880_v28 = vsel %vm2155_vm10, %v8057_v36, %v8059_v22  ;;  %v11896_v22 = vsel %vm2155_vm10, %v8051_v16, %v8052_v0  ;;  %v11911_v0 = vsel %vm2155_vm10, %v8061_v17, %v8062_v3  ;;  %v11914_v16 = vsel %vm2155_vm10, %v8046_v40, %v8047_v8 }
 0x721   : >> { %v11855_v26 = vpop.permute.xlu1 %6422  ;;  %v5590_v40 = vcombine.high %v5586_v46, %v13226_v37  ;;  %v11931_v8 = vsel %vm2155_vm10, %v8056_v44, %v8057_v36  ;;  %v5504_v3 = vcombine.high %v11823_v34, %v11830_v47  ;;  %v5866_v36 = vcombine.high %v11793_v54, %v11803_v61 }
 0x722   : >> { %8382 = vrot.lane.b32.xlu0 %v11849_v41, %s9818_s6  ;;  %5604 = vrot.lane.b32.xlu1 %v5511_v24, %s9811_s21  ;;  %v5781_v24 = vcombine.low %v11820_v23, %v11834_v39  ;;  %v5850_v34 = vcombine.high %v11800_v53, %v11811_v30  ;;  %v5882_v47 = vcombine.high %v5857_v7, %v5873_v9 }
 0x723   : >> { %v11861_v18 = vpop.permute.xlu0 %6418  ;;  %v5880_v54 = vrot.slane %v5866_v36, %v9947_v13  ;;  %v5798_v36 = vcombine.high %v11813_v15, %v11825_v1 }
 0x724   : >> { %v5864_v61 = vrot.slane %v5850_v34, %v9947_v13  ;;  %v5896_v7 = vrot.slane %v5882_v47, %v9980_v29  ;;  %v5782_v34 = vcombine.high %v11820_v23, %v11834_v39 }
 0x725   : >> { %v11871_v43 = vpop.permute.xlu1 %6412 }
 0x726   : >> { %13240 = vst [vmem:[#allocation21_spill] sm:$0xff] %v11871_v43  ;;  %8390 = vrot.lane.b32.xlu0 %v11864_v42, %s9818_s6  ;;  %8378 = vrot.lane.b32.xlu1 %v11867_v56, %s9818_s6  ;;  %v5914_v47 = vcombine.high %v5896_v7, %v13226_v37 }
 0x727   : >> { %v11877_v57 = vpop.permute.xlu0 %6408 }
 0x728   : >> { %13241 = vst [vmem:[#allocation22_spill] sm:$0xff] %v11877_v57 }
 0x729   : >> { %v11887_v32 = vpop.permute.xlu1 %6420 }
 0x72a   : >> { %13242 = vst [vmem:[#allocation23_spill] sm:$0xff] %v11887_v32  ;;  %5640 = vrot.lane.b32.xlu0 %v5586_v46, %s9813_s27  ;;  %8386 = vrot.lane.b32.xlu1 %v11880_v28, %s9818_s6  ;;  %v11940_v32 = vrot.slane %v5881_v62, %v9980_v29  ;;  %v5518_v62 = vrot.slane %v5504_v3, %v9980_v29 }
 0x72b   : >> { %v11893_v20 = vpop.permute.xlu0 %6416 }
 0x72c   : >> { %13243 = vst [vmem:[#allocation24_spill] sm:$0xff] %v11893_v20  ;;  %13247 = vst [vmem:[#allocation28_spill] sm:$0xff] %v11940_v32  ;;  %v5522_v9 = vcombine.high %v5518_v62, %v13226_v37 }
 0x72d   : >> { %v11902_v57 = vpop.permute.xlu1 %6740 }
 0x72e   : >> { %13244 = vst [vmem:[#allocation25_spill] sm:$0xff] %v11902_v57  ;;  %8380 = vrot.lane.b32.xlu0 %v11896_v22, %s9818_s6  ;;  %5608 = vrot.lane.b32.xlu1 %v5521_v5, %s9816_s30  ;;  %v5797_v57 = vcombine.low %v11813_v15, %v11825_v1  ;;  %v11990_v1 = vrot.slane %v5782_v34, %v9947_v13 }
 0x72f   : >> { %v11908_v20 = vpop.permute.xlu0 %6736 }
 0x730   : >> { %13245 = vst [vmem:[#allocation26_spill] sm:$0xff] %v11908_v20  ;;  %v5805_v5 = vrot.slane %v5797_v57, %v9947_v13  ;;  %v5789_v20 = vrot.slane %v5781_v24, %v9947_v13  ;;  %v5913_v24 = vcombine.high %v11940_v32, %v13226_v37 }
 0x731   : >> { %v11921_v43 = vpop.permute.xlu1 %6748 }
 0x732   : >> { %13246 = vst [vmem:[#allocation27_spill] sm:$0xff] %v11921_v43  ;;  %8388 = vrot.lane.b32.xlu0 %v11911_v0, %s9818_s6  ;;  %8376 = vrot.lane.b32.xlu1 %v11914_v16, %s9818_s6  ;;  %v5813_v57 = vcombine.low %v5789_v20, %v5805_v5  ;;  %v5814_v32 = vcombine.high %v5789_v20, %v5805_v5 }
 0x733   : >> { %v11927_v17 = vpop.permute.xlu0 %6744 }
 0x734   : >> { %v11967_v30 = vrot.slane %v5813_v57, %v9980_v29  ;;  %v5828_v23 = vrot.slane %v5814_v32, %v9980_v29 }
 0x735   : >> { %v11937_v43 = vpop.permute.xlu1 %6738 }
 0x736   : >> { %5644 = vrot.lane.b32.xlu0 %v5590_v40, %s9817_s5  ;;  %8384 = vrot.lane.b32.xlu1 %v11931_v8, %s9818_s6  ;;  %13248 = vst [vmem:[#allocation29_spill] sm:$0xff] %v11967_v30  ;;  %v5845_v57 = vcombine.high %v11967_v30, %v13226_v37  ;;  %v5846_v34 = vcombine.high %v5828_v23, %v13226_v37  ;;  %s9118_s6 = sshra.s32 %s9806_s11, 3  ;;  %s191_s11 = sadd.s32 1, %s9806_s11  }
 0x737   : >> { %v11945_v46 = vpop.permute.xlu0 %6734  ;;  %s9502_s8 = sshll.u32 %s9118_s6, 4  ;;  %p188_p12 = scmp.ge.s32.totalorder %s191_s11, 16  }
 0x738   : >> { %s9124_s18 = sadd.s32 %s9502_s8, %s9121_s10  ;;  %s9503_s26 = sshll.u32 (%p188_p12), %s9794_s15, 12 }
 0x739   : >> { %v11951_v44 = vpop.permute.xlu1 %6746  ;;  %s9822_s15 = smov (%p188_p12), [#allocation2]  }
 0x73a   : >> { %5612 = vrot.lane.b32.xlu1 %v5518_v62, %s9813_s27  ;;  %5946 = vrot.lane.b32.xlu0 %v5913_v24, %s9815_s29  ;;  %v5897_v24 = vcombine.low %v5864_v61, %v5880_v54 }
 0x73b   : >> { %v11958_v40 = vpop.permute.xlu0 %6742 }
 0x73c   : >> { %v5905_v15 = vrot.slane %v5897_v24, %v9980_v29 }
 0x73d   : >> { %v11962_v53 = vpop.permute.xlu1 %7400 }
 0x73e   : >> { %5616 = vrot.lane.b32.xlu1 %v5522_v9, %s9817_s5  ;;  %5950 = vrot.lane.b32.xlu0 %v5896_v7, %s9812_s23 }
 0x73f   : >> { %v11971_v3 = vpop.permute.xlu0 %7396 }
 0x740   : >> { %13249 = vst [vmem:[#allocation30_spill] sm:$0xff] %v11971_v3  ;;  %v11987_v3 = vrot.slane %v5798_v36, %v9947_v13  ;;  %v5915_v36 = vcombine.high %v5905_v15, %v13226_v37 }
 0x741   : >> { %v11977_v62 = vpop.permute.xlu1 %7408 }
 0x742   : >> { %5954 = vrot.lane.b32.xlu0 %v5914_v47, %s9814_s28  ;;  %5918 = vrot.lane.b32.xlu1 %v5845_v57, %s9815_s29  ;;  %v5829_v5 = vcombine.low %v11990_v1, %v11987_v3 }
 0x743   : >> { %v11984_v9 = vpop.permute.xlu0 %7404 }
 0x744   : >> { %v5837_v47 = vrot.slane %v5829_v5, %v9980_v29  ;;  %v6166_v5 = vcombine.low %v11560_v45, %v11570_v58 }
 0x745   : >> { %v11992_v20 = vpop.permute.xlu1 %7398 }
 0x746   : >> { %5958 = vrot.lane.b32.xlu0 %v5905_v15, %s9811_s21  ;;  %5922 = vrot.lane.b32.xlu1 %v5828_v23, %s9812_s23  ;;  %v5898_v15 = vcombine.high %v5864_v61, %v5880_v54  ;;  %v4991_v54 = vsel %vm398_vm1, %v11456_v10, %v11712_v4  ;;  %v4998_v61 = vsel %vm398_vm1, %v11468_v12, %v11752_v19 }
 0x747   : >> { %v11998_v39 = vpop.permute.xlu0 %7394  ;;  %v6174_v4 = vrot.slane %v6166_v5, %v9947_v13  ;;  %v6114_v5 = vcombine.low %v11575_v35, %v11585_v38 }
 0x749   : >> { %v12002_v7 = vpop.permute.xlu1 %7406 }
 0x74a   : >> { %5962 = vrot.lane.b32.xlu0 %v5915_v36, %s9816_s30  ;;  %5926 = vrot.lane.b32.xlu1 %v5846_v34, %s9814_s28  ;;  %v6182_v36 = vcombine.low %v11555_v25, %v11565_v48  ;;  %v4999_v34 = vsel %vm400_vm2, %v4998_v61, %v11765_v63  ;;  %v6098_v61 = vcombine.low %v11580_v6, %v11590_v14 }
 0x74b   : >> { %v12008_v32 = vpop.permute.xlu0 %7402  ;;  %v5000_v63 = vsel %vm402_vm3, %v4999_v34, %v11760_v50 }
 0x74c   : >> { %v6190_v12 = vrot.slane %v6182_v36, %v9947_v13 }
 0x74d   : >> { %v12010_v24 = vpop.permute.xlu1 %7726 }
 0x74e   : >> { %8708 = vrot.lane.b32.xlu0 %v11849_v41, %s9819_s7  ;;  %5930 = vrot.lane.b32.xlu1 %v5837_v47, %s9811_s21  ;;  %v5912_v41 = vrot.slane %v5898_v15, %v9980_v29  ;;  %v5001_v15 = vsel %vm404_vm4, %v5000_v63, %v11773_v49  ;;  %v6198_v50 = vcombine.low %v6174_v4, %v6190_v12 }
 0x74f   : >> { %v12016_v57 = vpop.permute.xlu0 %7722 }
 0x751   : >> { %v12018_v30 = vpop.permute.xlu1 %7734 }
 0x752   : >> { %8716 = vrot.lane.b32.xlu0 %v11864_v42, %s9819_s7  ;;  %8704 = vrot.lane.b32.xlu1 %v11867_v56, %s9819_s7  ;;  %v4992_v42 = vsel %vm400_vm2, %v4991_v54, %v11707_v55  ;;  %v5847_v54 = vcombine.high %v5837_v47, %v13226_v37 }
 0x753   : >> { %v12024_v23 = vpop.permute.xlu0 %7730  ;;  %v4993_v19 = vsel %vm402_vm3, %v4992_v42, %v11730_v11  ;;  %v5002_v42 = vsel %vm406_vm5, %v5001_v15, %v11768_v33  ;;  %v12085_v33 = vrot.slane %v6198_v50, %v9980_v29  ;;  %v6167_v50 = vcombine.high %v11560_v45, %v11570_v58 }
 0x754   : >> { %v4994_v36 = vsel %vm404_vm4, %v4993_v19, %v11717_v51  ;;  %v6106_v51 = vrot.slane %v6098_v61, %v9947_v13  ;;  %v6122_v19 = vrot.slane %v6114_v5, %v9947_v13  ;;  %v5916_v5 = vcombine.high %v5912_v41, %v13226_v37 }
 0x755   : >> { %v12038_v56 = vpop.permute.xlu1 %7720  ;;  %v4995_v49 = vsel %vm406_vm5, %v4994_v36, %v11747_v59  ;;  %v6181_v58 = vrot.slane %v6167_v50, %v9947_v13 }
 0x756   : >> { %5966 = vrot.lane.b32.xlu0 %v5912_v41, %s9813_s27  ;;  %8712 = vrot.lane.b32.xlu1 %v11880_v28, %s9819_s7  ;;  %v6130_v36 = vcombine.low %v6106_v51, %v6122_v19  ;;  %v9392_v41 = vld [vmem:[%s13168_s1 + $0xe8] sm:$0xff] }
 0x757   : >> { %v4985_v10 = vpop.permute.xlu0 %4984 }
 0x758   : >> { %v5003_v47 = vsel %vm408_vm6, %v5002_v42, %v4985_v10  ;;  %v9391_v10 = vld [vmem:[%s13168_s1 + $0xe0] sm:$0xff] }
 0x759   : >> { %v12054_v55 = vpop.permute.xlu1 %7728 }
 0x75a   : >> { %8706 = vrot.lane.b32.xlu0 %v11896_v22, %s9819_s7  ;;  %5934 = vrot.lane.b32.xlu1 %v5847_v54, %s9816_s30  ;;  %v4996_v54 = vsel %vm408_vm6, %v4995_v49, %v11738_v2  ;;  %v5830_v2 = vcombine.high %v11990_v1, %v11987_v3  ;;  %v6183_v49 = vcombine.high %v11555_v25, %v11565_v48 }
 0x75b   : >> { %v12066_v11 = vpop.permute.xlu0 %7724  ;;  %v4997_v15 = vsel %vm410_vm7, %v4996_v54, %v11757_v31  ;;  %v6230_v3 = vcombine.high %v12085_v33, %v13226_v37  ;;  %v6199_v1 = vcombine.high %v6174_v4, %v6190_v12  ;;  %v12113_v48 = vrot.slane %v6130_v36, %v9980_v29 }
 0x75c   : >> { %v5844_v25 = vrot.slane %v5830_v2, %v9980_v29  ;;  %v6197_v42 = vrot.slane %v6183_v49, %v9947_v13  ;;  %v6131_v54 = vcombine.high %v6106_v51, %v6122_v19  ;;  %v6115_v36 = vcombine.high %v11575_v35, %v11585_v38 }
 0x75d   : >> { %v4989_v34 = vpop.permute.xlu1 %4988  ;;  %v6213_v12 = vrot.slane %v6199_v1, %v9980_v29  ;;  %v6516_v38 = vcombine.low %v11840_v27, %v11855_v26 }
 0x75e   : >> { %v5004_v63 = vsel %vm410_vm7, %v5003_v47, %v4989_v34  ;;  %8714 = vrot.lane.b32.xlu0 %v11911_v0, %s9819_s7  ;;  %8702 = vrot.lane.b32.xlu1 %v11914_v16, %s9819_s7  ;;  %v5848_v34 = vcombine.high %v5844_v25, %v13226_v37  ;;  %v6145_v49 = vrot.slane %v6131_v54, %v9980_v29 }
 0x75f   : >> { %v12082_v59 = vpop.permute.xlu0 %7732  ;;  %9393 = vmatprep.subr.msk.mxu0 %vm669_vm8, %v5004_v63  ;;  %v6162_v63 = vcombine.high %v12113_v48, %v13226_v37  ;;  %v6231_v2 = vcombine.high %v6213_v12, %v13226_v37 }
 0x760   : >> { %9394 = vmatpush1.msk.msra.mxu0 %vm669_vm8, %v4997_v15 }
 0x761   : >> { %v5267_v61 = vpop.permute.xlu1 %5266  ;;  %9395 = vmatmul.mubr.msk.f32.vlgmr.msra.gmra.mrb[0].mxu0 %vm662_vm9, %v9391_v10  ;;  %v6214_v10 = vcombine.low %v6181_v58, %v6197_v42 }
 0x762   : >> { %5970 = vrot.lane.b32.xlu0 %v5916_v5, %s9817_s5  ;;  %8710 = vrot.lane.b32.xlu1 %v11931_v8, %s9819_s7  ;;  %v6099_v5 = vcombine.high %v11580_v6, %v11590_v14  ;;  %v5321_v51 = vsel %vm398_vm1, %v11715_v52, %v5267_v61  ;;  %v6129_v6 = vrot.slane %v6115_v36, %v9947_v13  ;;  %s13301_s7 = scalar_lea.vmem [#allocation2], %s9914_s4 }
 0x763   : >> { %v5295_v31 = vpop.permute.xlu0 %5294  ;;  %5090 = vmatprep.mubr.f32.mxu0 %v13226_v37  ;;  %v6500_v14 = vcombine.low %v11846_v60, %v11861_v18  ;;  %v6163_v61 = vcombine.high %v6145_v49, %v13226_v37  ;;  %s9125_s19 = scalar_lea.vmem %s13301_s7, %s9124_s18 [#allocation2] }
 0x764   : >> { %v6113_v1 = vrot.slane %v6099_v5, %v9947_v13  ;;  %v5328_v35 = vsel %vm398_vm1, %v11723_v21, %v5295_v31 }
 0x765   : >> { %v5271_v45 = vpop.permute.xlu1 %5270  ;;  %9396 = vmatmul.mubr.msk.f32.gmra.mrb[2].mxu0 %vm662_vm9, %v9392_v41  ;;  %v6508_v54 = vrot.slane %v6500_v14, %v9947_v13 }
 0x766   : >> { %6263 = vrot.lane.b32.xlu0 %v6230_v3, %s9815_s29  ;;  %5938 = vrot.lane.b32.xlu1 %v5844_v25, %s9813_s27  ;;  %v6222_v3 = vrot.slane %v6214_v10, %v9980_v29  ;;  %v5322_v52 = vsel %vm400_vm2, %v5321_v51, %v5271_v45  ;;  %v6146_v31 = vcombine.low %v6113_v1, %v6129_v6 }
 0x767   : >> { %v5299_v4 = vpop.permute.xlu0 %5298  ;;  %5414 = vmatprep.mubr.f32.mxu0 %v13226_v37 }
 0x768   : >> { %v6232_v25 = vcombine.high %v6222_v3, %v13226_v37  ;;  %v6154_v5 = vrot.slane %v6146_v31, %v9980_v29 }
 0x769   : >> { %v5275_v47 = vpop.permute.xlu1 %5274 }
 0x76a   : >> { %6267 = vrot.lane.b32.xlu0 %v6213_v12, %s9812_s23  ;;  %5942 = vrot.lane.b32.xlu1 %v5848_v34, %s9817_s5  ;;  %v5329_v12 = vsel %vm400_vm2, %v5328_v35, %v5299_v4  ;;  %v6215_v34 = vcombine.high %v6181_v58, %v6197_v42  ;;  %v5323_v10 = vsel %vm402_vm3, %v5322_v52, %v5275_v47  ;;  %v13252_v35 = vld [vmem:[#allocation24_spill] sm:$0xff]  ;;  %v13253_v47 = vld [vmem:[#allocation22_spill] sm:$0xff] }
 0x76b   : >> { %v5303_v15 = vpop.permute.xlu0 %5302 }
 0x76c   : >> { %v6229_v36 = vrot.slane %v6215_v34, %v9980_v29  ;;  %v6147_v34 = vcombine.high %v6113_v1, %v6129_v6  ;;  %v6517_v6 = vcombine.high %v11840_v27, %v11855_v26 }
 0x76d   : >> { %v5279_v50 = vpop.permute.xlu1 %5278 }
 0x76e   : >> { %6235 = vrot.lane.b32.xlu1 %v6162_v63, %s9815_s29  ;;  %6271 = vrot.lane.b32.xlu0 %v6231_v2, %s9814_s28  ;;  %v6524_v63 = vrot.slane %v6516_v38, %v9947_v13  ;;  %v5330_v2 = vsel %vm402_vm3, %v5329_v12, %v5303_v15  ;;  %v5324_v58 = vsel %vm404_vm4, %v5323_v10, %v5279_v50 }
 0x76f   : >> { %v5307_v19 = vpop.permute.xlu0 %5306  ;;  %v6432_v38 = vcombine.low %v13253_v47, %v13252_v35  ;;  %v6161_v1 = vrot.slane %v6147_v34, %v9980_v29 }
 0x770   : >> { %v6532_v42 = vcombine.low %v6508_v54, %v6524_v63  ;;  %v5331_v15 = vsel %vm404_vm4, %v5330_v2, %v5307_v19 }
 0x771   : >> { %v5283_v41 = vpop.permute.xlu1 %5282  ;;  %v6440_v2 = vrot.slane %v6432_v38, %v9947_v13  ;;  %v6165_v27 = vcombine.high %v6161_v1, %v13226_v37 }
 0x772   : >> { %6239 = vrot.lane.b32.xlu1 %v6145_v49, %s9812_s23  ;;  %6275 = vrot.lane.b32.xlu0 %v6222_v3, %s9811_s21  ;;  %v13250_v49 = vld [vmem:[#allocation23_spill] sm:$0xff]  ;;  %v13251_v3 = vld [vmem:[#allocation21_spill] sm:$0xff]  ;;  %v5325_v12 = vsel %vm406_vm5, %v5324_v58, %v5283_v41  ;;  %v12180_v41 = vrot.slane %v6532_v42, %v9980_v29 }
 0x773   : >> { %v5311_v21 = vpop.permute.xlu0 %5310  ;;  %v6448_v51 = vcombine.low %v13251_v3, %v13250_v49 }
 0x774   : >> { %v5332_v14 = vsel %vm406_vm5, %v5331_v15, %v5311_v21  ;;  %v6564_v42 = vcombine.high %v12180_v41, %v13226_v37 }
 0x775   : >> { %v5287_v45 = vpop.permute.xlu1 %5286  ;;  %v6456_v21 = vrot.slane %v6448_v51, %v9947_v13  ;;  %v9398_v51 = vld [vmem:[%s13168_s1 + $0xf8] sm:$0xff] }
 0x776   : >> { %6243 = vrot.lane.b32.xlu1 %v6163_v61, %s9814_s28  ;;  %6279 = vrot.lane.b32.xlu0 %v6232_v25, %s9816_s30  ;;  %v6164_v61 = vcombine.high %v6154_v5, %v13226_v37  ;;  %v6233_v25 = vcombine.high %v6229_v36, %v13226_v37  ;;  %v5326_v10 = vsel %vm408_vm6, %v5325_v12, %v5287_v45 }
 0x777   : >> { %v5315_v4 = vpop.permute.xlu0 %5314  ;;  %v6501_v45 = vcombine.high %v11846_v60, %v11861_v18  ;;  %v6531_v60 = vrot.slane %v6517_v6, %v9947_v13 }
 0x778   : >> { %v5333_v50 = vsel %vm408_vm6, %v5332_v14, %v5315_v4  ;;  %v9397_v4 = vld [vmem:[%s13168_s1 + $0xf0] sm:$0xff]  ;;  %v6449_v14 = vcombine.high %v13251_v3, %v13250_v49 }
 0x779   : >> { %v5291_v52 = vpop.permute.xlu1 %5290  ;;  %v6515_v26 = vrot.slane %v6501_v45, %v9947_v13 }
 0x77a   : >> { %6247 = vrot.lane.b32.xlu1 %v6154_v5, %s9811_s21  ;;  %6283 = vrot.lane.b32.xlu0 %v6229_v36, %s9813_s27  ;;  %v5327_v15 = vsel %vm410_vm7, %v5326_v10, %v5291_v52  ;;  %v6533_v5 = vcombine.high %v6508_v54, %v6524_v63  ;;  %v6464_v36 = vcombine.low %v6440_v2, %v6456_v21 }
 0x77b   : >> { %v5319_v31 = vpop.permute.xlu0 %5318  ;;  %v6548_v38 = vcombine.low %v6515_v26, %v6531_v60  ;;  %v6433_v52 = vcombine.high %v13253_v47, %v13252_v35  ;;  %v6463_v34 = vrot.slane %v6449_v14, %v9947_v13  ;;  %v13254_v35 = vld [vmem:[#allocation27_spill] sm:$0xff]  ;;  %v13255_v47 = vld [vmem:[#allocation25_spill] sm:$0xff] }
 0x77c   : >> { %v5334_v19 = vsel %vm410_vm7, %v5333_v50, %v5319_v31  ;;  %v6547_v63 = vrot.slane %v6533_v5, %v9980_v29  ;;  %v12212_v54 = vrot.slane %v6464_v36, %v9980_v29  ;;  %v6842_v10 = vcombine.low %v13255_v47, %v13254_v35 }
 0x77d   : >> { %9399 = vmatprep.subr.msk.mxu0 %vm669_vm8, %v5334_v19  ;;  %v6556_v49 = vrot.slane %v6548_v38, %v9980_v29  ;;  %v6447_v3 = vrot.slane %v6433_v52, %v9947_v13  ;;  %v13256_v19 = vld [vmem:[#allocation26_spill] sm:$0xff] }
 0x77e   : >> { %9400 = vmatpush1.msk.msra.mxu0 %vm669_vm8, %v5327_v15  ;;  %6251 = vrot.lane.b32.xlu1 %v6164_v61, %s9816_s30  ;;  %v6465_v61 = vcombine.high %v6440_v2, %v6456_v21  ;;  %v6496_v50 = vcombine.high %v12212_v54, %v13226_v37  ;;  %v6565_v31 = vcombine.high %v6547_v63, %v13226_v37 }
 0x77f   : >> { %6287 = vrot.lane.b32.xlu0 %v6233_v25, %s9817_s5  ;;  %9401 = vmatmul.mubr.msk.f32.vlgmr.msra.gmra.mrb[0].mxu0 %vm662_vm9, %v9397_v4  ;;  %v6826_v21 = vcombine.low %v13256_v19, %v11927_v17  ;;  %v6566_v6 = vcombine.high %v6556_v49, %v13226_v37  ;;  %v6480_v45 = vcombine.low %v6447_v3, %v6463_v34 }
 0x780   : >> { %v12194_v58 = vpop.permute.xlu0 %5620  ;;  %5420 = vmatprep.mubr.f32.mxu0 %v13226_v37  ;;  %v6479_v4 = vrot.slane %v6465_v61, %v9980_v29  ;;  %v6850_v5 = vrot.slane %v6842_v10, %v9947_v13 }
 0x781   : >> { %v6834_v36 = vrot.slane %v6826_v21, %v9947_v13  ;;  %v6488_v61 = vrot.slane %v6480_v45, %v9980_v29 }
 0x782   : >> { %6255 = vrot.lane.b32.xlu1 %v6161_v1, %s9813_s27  ;;  %v6549_v1 = vcombine.high %v6515_v26, %v6531_v60  ;;  %v6774_v60 = vcombine.low %v11937_v43, %v11951_v44  ;;  %v6758_v26 = vcombine.low %v11945_v46, %v11958_v40 }
 0x783   : >> { %6597 = vrot.lane.b32.xlu0 %v6564_v42, %s9815_s29  ;;  %9402 = vmatmul.mubr.msk.f32.gmra.mrb[2].mxu0 %vm662_vm9, %v9398_v51  ;;  %v6858_v38 = vcombine.low %v6834_v36, %v6850_v5  ;;  %v6859_v45 = vcombine.high %v6834_v36, %v6850_v5 }
 0x784   : >> { %v12208_v18 = vpop.permute.xlu0 %5624  ;;  %5740 = vmatprep.mubr.f32.mxu0 %v13226_v37  ;;  %v6766_v10 = vrot.slane %v6758_v26, %v9947_v13 }
 0x785   : >> { %v6873_v5 = vrot.slane %v6859_v45, %v9980_v29 }
 0x786   : >> { %6259 = vrot.lane.b32.xlu1 %v6165_v27, %s9817_s5  ;;  %v6497_v27 = vcombine.high %v6479_v4, %v13226_v37 }
 0x787   : >> { %6601 = vrot.lane.b32.xlu0 %v6547_v63, %s9812_s23  ;;  %v6563_v63 = vrot.slane %v6549_v1, %v9980_v29  ;;  %v6498_v1 = vcombine.high %v6488_v61, %v13226_v37 }
 0x788   : >> { %v12221_v25 = vpop.permute.xlu1 %5592  ;;  %v12223_v12 = vpop.permute.xlu0 %5628 }
 0x78a   : >> { %6569 = vrot.lane.b32.xlu1 %v6496_v50, %s9815_s29  ;;  %v6481_v50 = vcombine.high %v6447_v3, %v6463_v34  ;;  %v6843_v34 = vcombine.high %v13255_v47, %v13254_v35  ;;  %v6827_v3 = vcombine.high %v13256_v19, %v11927_v17 }
 0x78b   : >> { %6605 = vrot.lane.b32.xlu0 %v6565_v31, %s9814_s28  ;;  %v6567_v31 = vcombine.high %v6563_v63, %v13226_v37 }
 0x78c   : >> { %v12237_v2 = vpop.permute.xlu1 %5596  ;;  %v12239_v15 = vpop.permute.xlu0 %5632  ;;  %v6495_v26 = vrot.slane %v6481_v50, %v9980_v29  ;;  %v6841_v35 = vrot.slane %v6827_v3, %v9947_v13 }
 0x78e   : >> { %6573 = vrot.lane.b32.xlu1 %v6479_v4, %s9812_s23  ;;  %v6499_v19 = vcombine.high %v6495_v26, %v13226_v37 }
 0x78f   : >> { %6609 = vrot.lane.b32.xlu0 %v6556_v49, %s9811_s21  ;;  %v6782_v49 = vrot.slane %v6774_v60, %v9947_v13 }
 0x790   : >> { %v12247_v42 = vpop.permute.xlu1 %5600  ;;  %v5637_v51 = vpop.permute.xlu0 %5636 }
 0x792   : >> { %6577 = vrot.lane.b32.xlu1 %v6497_v27, %s9814_s28  ;;  %v6790_v27 = vcombine.low %v6766_v10, %v6782_v49 }
 0x793   : >> { %6613 = vrot.lane.b32.xlu0 %v6566_v6, %s9816_s30  ;;  %v12273_v6 = vrot.slane %v6858_v38, %v9980_v29 }
 0x794   : >> { %v12257_v14 = vpop.permute.xlu1 %5604  ;;  %v12259_v52 = vpop.permute.xlu0 %8382  ;;  %v12295_v36 = vrot.slane %v6790_v27, %v9980_v29 }
 0x795   : >> { %13257 = vst [vmem:[#allocation23_spill] sm:$0xff] %v12273_v6  ;;  %v6890_v38 = vcombine.high %v12273_v6, %v13226_v37 }
 0x796   : >> { %6581 = vrot.lane.b32.xlu1 %v6488_v61, %s9811_s21  ;;  %v6857_v61 = vrot.slane %v6843_v34, %v9947_v13  ;;  %13259 = vst [vmem:[#allocation24_spill] sm:$0xff] %v12295_v36  ;;  %v13260_v34 = vld [vmem:[#allocation16_spill] sm:$0xff] }
 0x797   : >> { %6617 = vrot.lane.b32.xlu0 %v6563_v63, %s9813_s27  ;;  %v5654_v3 = vsel %vm398_vm1, %v13260_v34, %v12194_v58  ;;  %v13265_v58 = vld [vmem:[#allocation11_spill] sm:$0xff] }
 0x798   : >> { %v12267_v21 = vpop.permute.xlu1 %8378  ;;  %v12269_v4 = vpop.permute.xlu0 %8390  ;;  %v6874_v50 = vcombine.low %v6841_v35, %v6857_v61  ;;  %v5655_v45 = vsel %vm400_vm2, %v5654_v3, %v12208_v18 }
 0x79a   : >> { %6585 = vrot.lane.b32.xlu1 %v6498_v1, %s9816_s30  ;;  %v6759_v1 = vcombine.high %v11945_v46, %v11958_v40  ;;  %v5656_v46 = vsel %vm402_vm3, %v5655_v45, %v12223_v12  ;;  %v13264_v40 = vld [vmem:[#allocation8_spill] sm:$0xff] }
 0x79b   : >> { %6621 = vrot.lane.b32.xlu0 %v6567_v31, %s9817_s5  ;;  %v6775_v31 = vcombine.high %v11937_v43, %v11951_v44  ;;  %v6891_v43 = vcombine.high %v6873_v5, %v13226_v37  ;;  %v13263_v44 = vld [vmem:[#allocation10_spill] sm:$0xff]  ;;  %v5657_v18 = vsel %vm404_vm4, %v5656_v46, %v12239_v15 }
 0x79c   : >> { %v12281_v63 = vpop.permute.xlu1 %8386  ;;  %v5641_v60 = vpop.permute.xlu0 %5640  ;;  %v7176_v6 = vcombine.low %v13264_v40, %v13263_v44  ;;  %v5658_v34 = vsel %vm406_vm5, %v5657_v18, %v5637_v51  ;;  %v6773_v12 = vrot.slane %v6759_v1, %v9947_v13  ;;  %v6875_v51 = vcombine.high %v6841_v35, %v6857_v61  ;;  %v13270_v18 = vld [vmem:[#allocation12_spill] sm:$0xff]  ;;  %v13271_v35 = vld [vmem:[#allocation15_spill] sm:$0xff] }
 0x79d   : >> { %v6789_v3 = vrot.slane %v6775_v31, %v9947_v13  ;;  %v5659_v45 = vsel %vm408_vm6, %v5658_v34, %v5641_v60  ;;  %v13272_v34 = vld [vmem:[#allocation13_spill] sm:$0xff] }
 0x79e   : >> { %6589 = vrot.lane.b32.xlu1 %v6495_v26, %s9813_s27  ;;  %v6791_v26 = vcombine.high %v6766_v10, %v6782_v49  ;;  %v13266_v49 = vld [vmem:[#allocation9_spill] sm:$0xff] }
 0x79f   : >> { %6923 = vrot.lane.b32.xlu0 %v6890_v38, %s9815_s29  ;;  %v7160_v10 = vcombine.low %v13266_v49, %v13265_v58  ;;  %v6806_v31 = vcombine.low %v6773_v12, %v6789_v3 }
 0x7a0   : >> { %v5609_v47 = vpop.permute.xlu1 %5608  ;;  %v12290_v17 = vpop.permute.xlu0 %8380 }
 0x7a1   : >> { %13258 = vst [vmem:[#allocation21_spill] sm:$0xff] %v12290_v17  ;;  %v6805_v17 = vrot.slane %v6791_v26, %v9980_v29 }
 0x7a2   : >> { %6593 = vrot.lane.b32.xlu1 %v6499_v19, %s9817_s5  ;;  %v6822_v19 = vcombine.high %v12295_v36, %v13226_v37 }
 0x7a3   : >> { %6927 = vrot.lane.b32.xlu0 %v6873_v5, %s9812_s23  ;;  %v6882_v5 = vrot.slane %v6874_v50, %v9980_v29  ;;  %v13268_v50 = vld [vmem:[#allocation17_spill] sm:$0xff] }
 0x7a4   : >> { %v12308_v27 = vpop.permute.xlu1 %8376  ;;  %v12310_v38 = vpop.permute.xlu0 %8388  ;;  %v5647_v60 = vsel %vm398_vm1, %v13268_v50, %v12221_v25 }
 0x7a5   : >> { %13261 = vst [vmem:[#allocation22_spill] sm:$0xff] %v12308_v27  ;;  %13262 = vst [vmem:[#allocation27_spill] sm:$0xff] %v12310_v38  ;;  %v5648_v1 = vsel %vm400_vm2, %v5647_v60, %v12237_v2  ;;  %v6892_v46 = vcombine.high %v6882_v5, %v13226_v37  ;;  %v6889_v38 = vrot.slane %v6875_v51, %v9980_v29 }
 0x7a6   : >> { %6895 = vrot.lane.b32.xlu1 %v6822_v19, %s9815_s29  ;;  %v7184_v19 = vrot.slane %v7176_v6, %v9947_v13  ;;  %v6823_v6 = vcombine.high %v6805_v17, %v13226_v37  ;;  %v5649_v25 = vsel %vm402_vm3, %v5648_v1, %v12247_v42  ;;  %v6807_v51 = vcombine.high %v6773_v12, %v6789_v3  ;;  %v9404_v3 = vld [vmem:[%s13168_s1 + $0x108] sm:$0xff] }
 0x7a7   : >> { %6931 = vrot.lane.b32.xlu0 %v6891_v43, %s9814_s28  ;;  %v7168_v43 = vrot.slane %v7160_v10, %v9947_v13  ;;  %v13269_v10 = vld [vmem:[#allocation14_spill] sm:$0xff]  ;;  %v7161_v12 = vcombine.high %v13266_v49, %v13265_v58 }
 0x7a8   : >> { %v12330_v36 = vpop.permute.xlu1 %8384  ;;  %v5645_v27 = vpop.permute.xlu0 %5644  ;;  %v7108_v61 = vcombine.low %v13270_v18, %v13269_v10 }
 0x7a9   : >> { %13267 = vst [vmem:[#allocation25_spill] sm:$0xff] %v12330_v36  ;;  %v5660_v15 = vsel %vm410_vm7, %v5659_v45, %v5645_v27  ;;  %v7092_v45 = vcombine.low %v13272_v34, %v13271_v35  ;;  %v7192_v2 = vcombine.low %v7168_v43, %v7184_v19  ;;  %v6814_v36 = vrot.slane %v6806_v31, %v9980_v29 }
 0x7aa   : >> { %6899 = vrot.lane.b32.xlu1 %v6805_v17, %s9812_s23  ;;  %9405 = vmatprep.subr.msk.mxu0 %vm669_vm8, %v5660_v15  ;;  %v5650_v15 = vsel %vm404_vm4, %v5649_v25, %v12257_v14  ;;  %v7116_v42 = vrot.slane %v7108_v61, %v9947_v13  ;;  %v6893_v61 = vcombine.high %v6889_v38, %v13226_v37 }
 0x7ab   : >> { %6935 = vrot.lane.b32.xlu0 %v6882_v5, %s9811_s21  ;;  %v5651_v17 = vsel %vm406_vm5, %v5650_v15, %v5609_v47  ;;  %v7100_v14 = vrot.slane %v7092_v45, %v9947_v13  ;;  %v12373_v47 = vrot.slane %v7192_v2, %v9980_v29  ;;  %v7177_v45 = vcombine.high %v13264_v40, %v13263_v44 }
 0x7ac   : >> { %v5613_v26 = vpop.permute.xlu1 %5612  ;;  %v12344_v27 = vpop.permute.xlu0 %5946  ;;  %v6821_v40 = vrot.slane %v6807_v51, %v9980_v29  ;;  %v7175_v49 = vrot.slane %v7161_v12, %v9947_v13 }
 0x7ad   : >> { %v5652_v5 = vsel %vm408_vm6, %v5651_v17, %v5613_v26  ;;  %13273 = vst [vmem:[#allocation26_spill] sm:$0xff] %v12373_v47  ;;  %v7124_v25 = vcombine.low %v7100_v14, %v7116_v42  ;;  %v7191_v58 = vrot.slane %v7177_v45, %v9947_v13 }
 0x7ae   : >> { %6903 = vrot.lane.b32.xlu1 %v6823_v6, %s9814_s28  ;;  %v9403_v6 = vld [vmem:[%s13168_s1 + $0x100] sm:$0xff] }
 0x7af   : >> { %6939 = vrot.lane.b32.xlu0 %v6892_v46, %s9816_s30  ;;  %v6824_v46 = vcombine.high %v6814_v36, %v13226_v37  ;;  %v12402_v2 = vrot.slane %v7124_v25, %v9980_v29 }
 0x7b0   : >> { %v5617_v50 = vpop.permute.xlu1 %5616  ;;  %v12360_v60 = vpop.permute.xlu0 %5950 }
 0x7b1   : >> { %v5653_v1 = vsel %vm410_vm7, %v5652_v5, %v5617_v50  ;;  %13274 = vst [vmem:[#allocation16_spill] sm:$0xff] %v12402_v2  ;;  %v6825_v5 = vcombine.high %v6821_v40, %v13226_v37  ;;  %v7109_v50 = vcombine.high %v13270_v18, %v13269_v10 }
 0x7b2   : >> { %6907 = vrot.lane.b32.xlu1 %v6814_v36, %s9811_s21  ;;  %9406 = vmatpush1.msk.msra.mxu0 %vm669_vm8, %v5653_v1  ;;  %v7224_v36 = vcombine.high %v12373_v47, %v13226_v37  ;;  %v7093_v1 = vcombine.high %v13272_v34, %v13271_v35 }
 0x7b3   : >> { %6943 = vrot.lane.b32.xlu0 %v6889_v38, %s9813_s27  ;;  %9407 = vmatmul.mubr.msk.f32.vlgmr.msra.gmra.mrb[0].mxu0 %vm662_vm9, %v9403_v6  ;;  %v7193_v38 = vcombine.high %v7168_v43, %v7184_v19  ;;  %v7156_v6 = vcombine.high %v12402_v2, %v13226_v37  ;;  %v7123_v10 = vrot.slane %v7109_v50, %v9947_v13 }
 0x7b4   : >> { %v12376_v31 = vpop.permute.xlu1 %5918  ;;  %v12378_v26 = vpop.permute.xlu0 %5954  ;;  %5746 = vmatprep.mubr.f32.mxu0 %v13226_v37  ;;  %v7107_v18 = vrot.slane %v7093_v1, %v9947_v13 }
 0x7b5   : >> { %v7207_v19 = vrot.slane %v7193_v38, %v9980_v29 }
 0x7b6   : >> { %6911 = vrot.lane.b32.xlu1 %v6824_v46, %s9816_s30  ;;  %v7125_v46 = vcombine.high %v7100_v14, %v7116_v42  ;;  %v7502_v42 = vcombine.low %v11962_v53, %v11977_v62  ;;  %v13275_v14 = vld [vmem:[#allocation30_spill] sm:$0xff] }
 0x7b7   : >> { %6947 = vrot.lane.b32.xlu0 %v6893_v61, %s9817_s5  ;;  %9408 = vmatmul.mubr.msk.f32.gmra.mrb[2].mxu0 %vm662_vm9, %v9404_v3  ;;  %v7225_v51 = vcombine.high %v7207_v19, %v13226_v37  ;;  %v7208_v61 = vcombine.low %v7175_v49, %v7191_v58  ;;  %v7486_v3 = vcombine.low %v13275_v14, %v11984_v9 }
 0x7b8   : >> { %v12395_v15 = vpop.permute.xlu1 %5922  ;;  %v12397_v44 = vpop.permute.xlu0 %5958  ;;  %6066 = vmatprep.mubr.f32.mxu0 %v13226_v37  ;;  %v7139_v35 = vrot.slane %v7125_v46, %v9980_v29  ;;  %v7510_v50 = vrot.slane %v7502_v42, %v9947_v13 }
 0x7b9   : >> { %v7216_v34 = vrot.slane %v7208_v61, %v9980_v29  ;;  %v7494_v1 = vrot.slane %v7486_v3, %v9947_v13 }
 0x7ba   : >> { %6915 = vrot.lane.b32.xlu1 %v6821_v40, %s9813_s27  ;;  %v7157_v38 = vcombine.high %v7139_v35, %v13226_v37 }
 0x7bb   : >> { %7257 = vrot.lane.b32.xlu0 %v7224_v36, %s9815_s29  ;;  %v7226_v40 = vcombine.high %v7216_v34, %v13226_v37 }
 0x7bc   : >> { %v12410_v43 = vpop.permute.xlu1 %5926  ;;  %v5963_v17 = vpop.permute.xlu0 %5962 }
 0x7be   : >> { %6919 = vrot.lane.b32.xlu1 %v6825_v5, %s9817_s5  ;;  %v7209_v5 = vcombine.high %v7175_v49, %v7191_v58  ;;  %v7418_v58 = vcombine.low %v11998_v39, %v12008_v32 }
 0x7bf   : >> { %7261 = vrot.lane.b32.xlu0 %v7207_v19, %s9812_s23  ;;  %v7140_v19 = vcombine.low %v7107_v18, %v7123_v10 }
 0x7c0   : >> { %v12422_v45 = vpop.permute.xlu1 %5930  ;;  %v12424_v25 = vpop.permute.xlu0 %8708  ;;  %v7223_v61 = vrot.slane %v7209_v5, %v9980_v29  ;;  %v7426_v47 = vrot.slane %v7418_v58, %v9947_v13 }
 0x7c1   : >> { %v7148_v46 = vrot.slane %v7140_v19, %v9980_v29  ;;  %v13279_v19 = vld [vmem:[#allocation28_spill] sm:$0xff] }
 0x7c2   : >> { %7229 = vrot.lane.b32.xlu1 %v7156_v6, %s9815_s29  ;;  %v5980_v5 = vsel %vm398_vm1, %v13279_v19, %v12344_v27 }
 0x7c3   : >> { %7265 = vrot.lane.b32.xlu0 %v7225_v51, %s9814_s28  ;;  %v7158_v3 = vcombine.high %v7148_v46, %v13226_v37 }
 0x7c4   : >> { %v12436_v12 = vpop.permute.xlu1 %8704  ;;  %v12438_v36 = vpop.permute.xlu0 %8716 }
 0x7c5   : >> { %13276 = vst [vmem:[#allocation10_spill] sm:$0xff] %v12436_v12 }
 0x7c6   : >> { %7233 = vrot.lane.b32.xlu1 %v7139_v35, %s9812_s23  ;;  %v7518_v35 = vcombine.low %v7494_v1, %v7510_v50 }
 0x7c7   : >> { %7269 = vrot.lane.b32.xlu0 %v7216_v34, %s9811_s21  ;;  %v7434_v34 = vcombine.low %v11992_v20, %v12002_v7 }
 0x7c8   : >> { %v12446_v6 = vpop.permute.xlu1 %8712  ;;  %v5967_v51 = vpop.permute.xlu0 %5966 }
 0x7c9   : >> { %13277 = vst [vmem:[#allocation8_spill] sm:$0xff] %v12446_v6  ;;  %v7442_v2 = vrot.slane %v7434_v34, %v9947_v13  ;;  %v7519_v34 = vcombine.high %v7494_v1, %v7510_v50 }
 0x7ca   : >> { %7237 = vrot.lane.b32.xlu1 %v7157_v38, %s9814_s28  ;;  %v7227_v38 = vcombine.high %v7223_v61, %v13226_v37 }
 0x7cb   : >> { %7273 = vrot.lane.b32.xlu0 %v7226_v40, %s9816_s30  ;;  %v7141_v40 = vcombine.high %v7107_v18, %v7123_v10  ;;  %v7450_v58 = vcombine.low %v7426_v47, %v7442_v2 }
 0x7cc   : >> { %v5935_v49 = vpop.permute.xlu1 %5934  ;;  %v12456_v42 = vpop.permute.xlu0 %8706 }
 0x7cd   : >> { %13278 = vst [vmem:[#allocation11_spill] sm:$0xff] %v12456_v42  ;;  %v5981_v42 = vsel %vm400_vm2, %v5980_v5, %v12360_v60  ;;  %v7155_v18 = vrot.slane %v7141_v40, %v9980_v29  ;;  %v7503_v60 = vcombine.high %v11962_v53, %v11977_v62  ;;  %v7533_v40 = vrot.slane %v7519_v34, %v9980_v29 }
 0x7ce   : >> { %7241 = vrot.lane.b32.xlu1 %v7148_v46, %s9811_s21  ;;  %v12474_v46 = vrot.slane %v7518_v35, %v9980_v29  ;;  %v5982_v10 = vsel %vm402_vm3, %v5981_v42, %v12378_v26  ;;  %v12507_v19 = vrot.slane %v7450_v58, %v9980_v29 }
 0x7cf   : >> { %7277 = vrot.lane.b32.xlu0 %v7223_v61, %s9813_s27  ;;  %v5983_v27 = vsel %vm404_vm4, %v5982_v10, %v12397_v44  ;;  %v7487_v61 = vcombine.high %v13275_v14, %v11984_v9  ;;  %v7159_v53 = vcombine.high %v7155_v18, %v13226_v37  ;;  %v7517_v62 = vrot.slane %v7503_v60, %v9947_v13 }
 0x7d0   : >> { %v12469_v12 = vpop.permute.xlu1 %8702  ;;  %v12471_v6 = vpop.permute.xlu0 %8714  ;;  %v5984_v35 = vsel %vm406_vm5, %v5983_v27, %v5963_v17  ;;  %v13280_v17 = vld [vmem:[#allocation29_spill] sm:$0xff]  ;;  %v7419_v27 = vcombine.high %v11998_v39, %v12008_v32  ;;  %v7451_v60 = vcombine.high %v7426_v47, %v7442_v2  ;;  %v7551_v34 = vcombine.high %v7533_v40, %v13226_v37 }
 0x7d1   : >> { %v5985_v26 = vsel %vm408_vm6, %v5984_v35, %v5967_v51  ;;  %v7501_v9 = vrot.slane %v7487_v61, %v9947_v13  ;;  %v5973_v14 = vsel %vm398_vm1, %v13280_v17, %v12376_v31  ;;  %v7828_v47 = vcombine.low %v12010_v24, %v12018_v30 }
 0x7d2   : >> { %7245 = vrot.lane.b32.xlu1 %v7158_v3, %s9816_s30  ;;  %v7550_v3 = vcombine.high %v12474_v46, %v13226_v37  ;;  %v5974_v50 = vsel %vm400_vm2, %v5973_v14, %v12395_v15  ;;  %v7435_v15 = vcombine.high %v11992_v20, %v12002_v7  ;;  %v9409_v20 = vld [vmem:[%s13168_s1 + $0x110] sm:$0xff]  ;;  %v7433_v32 = vrot.slane %v7419_v27, %v9947_v13 }
 0x7d3   : >> { %7281 = vrot.lane.b32.xlu0 %v7227_v38, %s9817_s5  ;;  %v5975_v5 = vsel %vm402_vm3, %v5974_v50, %v12410_v43  ;;  %v7534_v31 = vcombine.low %v7501_v9, %v7517_v62  ;;  %v7812_v2 = vcombine.low %v12016_v57, %v12024_v23  ;;  %v7836_v14 = vrot.slane %v7828_v47, %v9947_v13 }
 0x7d4   : >> { %v12489_v42 = vpop.permute.xlu1 %8710  ;;  %v5971_v44 = vpop.permute.xlu0 %5970  ;;  %v5976_v10 = vsel %vm404_vm4, %v5975_v5, %v12422_v45  ;;  %v7482_v45 = vcombine.high %v12507_v19, %v13226_v37  ;;  %v7449_v39 = vrot.slane %v7435_v15, %v9947_v13  ;;  %v7760_v15 = vcombine.low %v12066_v11, %v12082_v59 }
 0x7d5   : >> { %v5986_v38 = vsel %vm410_vm7, %v5985_v26, %v5971_v44  ;;  %v7542_v7 = vrot.slane %v7534_v31, %v9980_v29  ;;  %v7465_v44 = vrot.slane %v7451_v60, %v9980_v29  ;;  %v7820_v50 = vrot.slane %v7812_v2, %v9947_v13 }
 0x7d6   : >> { %7249 = vrot.lane.b32.xlu1 %v7155_v18, %s9813_s27  ;;  %9411 = vmatprep.subr.msk.mxu0 %vm669_vm8, %v5986_v38  ;;  %v5977_v18 = vsel %vm406_vm5, %v5976_v10, %v5935_v49  ;;  %v7535_v38 = vcombine.high %v7501_v9, %v7517_v62  ;;  %v7466_v17 = vcombine.low %v7433_v32, %v7449_v39 }
 0x7d7   : >> { %7583 = vrot.lane.b32.xlu0 %v7550_v3, %s9815_s29  ;;  %v9410_v3 = vld [vmem:[%s13168_s1 + $0x118] sm:$0xff]  ;;  %v7483_v5 = vcombine.high %v7465_v44, %v13226_v37  ;;  %v7844_v10 = vcombine.low %v7820_v50, %v7836_v14  ;;  %v7744_v31 = vcombine.low %v12038_v56, %v12054_v55  ;;  %v7845_v2 = vcombine.high %v7820_v50, %v7836_v14 }
 0x7d8   : >> { %v5939_v1 = vpop.permute.xlu1 %5938  ;;  %v6264_v51 = vpop.permute.xlu0 %6263  ;;  %v7549_v9 = vrot.slane %v7535_v38, %v9980_v29  ;;  %v7474_v60 = vrot.slane %v7466_v17, %v9980_v29 }
 0x7d9   : >> { %v5978_v61 = vsel %vm408_vm6, %v5977_v18, %v5939_v1  ;;  %v6297_v62 = vsel %vm398_vm1, %v12085_v33, %v6264_v51  ;;  %v7467_v33 = vcombine.high %v7433_v32, %v7449_v39  ;;  %v7829_v39 = vcombine.high %v12010_v24, %v12018_v30 }
 0x7da   : >> { %7253 = vrot.lane.b32.xlu1 %v7159_v53, %s9817_s5  ;;  %v7552_v53 = vcombine.high %v7542_v7, %v13226_v37  ;;  %v7553_v51 = vcombine.high %v7549_v9, %v13226_v37  ;;  %v7813_v32 = vcombine.high %v12016_v57, %v12024_v23  ;;  %v7859_v50 = vrot.slane %v7845_v2, %v9980_v29 }
 0x7db   : >> { %7587 = vrot.lane.b32.xlu0 %v7533_v40, %s9812_s23  ;;  %v12600_v57 = vrot.slane %v7829_v39, %v9947_v13 }
 0x7dc   : >> { %v5943_v43 = vpop.permute.xlu1 %5942  ;;  %v6268_v35 = vpop.permute.xlu0 %6267  ;;  %v7827_v23 = vrot.slane %v7813_v32, %v9947_v13 }
 0x7dd   : >> { %v5979_v58 = vsel %vm410_vm7, %v5978_v61, %v5943_v43  ;;  %v6298_v61 = vsel %vm400_vm2, %v6297_v62, %v6268_v35  ;;  %v12567_v43 = vrot.slane %v7744_v31, %v9947_v13 }
 0x7de   : >> { %7555 = vrot.lane.b32.xlu1 %v7482_v45, %s9815_s29  ;;  %9412 = vmatpush1.msk.msra.mxu0 %vm669_vm8, %v5979_v58  ;;  %v12570_v45 = vrot.slane %v7760_v15, %v9947_v13 }
 0x7df   : >> { %7591 = vrot.lane.b32.xlu0 %v7551_v34, %s9814_s28  ;;  %9413 = vmatmul.mubr.msk.f32.vlgmr.msra.gmra.mrb[0].mxu0 %vm662_vm9, %v9409_v20  ;;  %v7484_v20 = vcombine.high %v7474_v60, %v13226_v37 }
 0x7e0   : >> { %v6236_v49 = vpop.permute.xlu1 %6235  ;;  %v6272_v26 = vpop.permute.xlu0 %6271  ;;  %6072 = vmatprep.mubr.f32.mxu0 %v13226_v37 }
 0x7e1   : >> { %v6299_v35 = vsel %vm402_vm3, %v6298_v61, %v6272_v26  ;;  %v7776_v26 = vcombine.low %v12567_v43, %v12570_v45  ;;  %v6290_v14 = vsel %vm398_vm1, %v12113_v48, %v6236_v49  ;;  %v7860_v48 = vcombine.low %v7827_v23, %v12600_v57  ;;  %v9386_v61 = vld [vmem:[%s13168_s1 + $0xd8] sm:$0xff] }
 0x7e2   : >> { %7559 = vrot.lane.b32.xlu1 %v7465_v44, %s9812_s23  ;;  %v7745_v49 = vcombine.high %v12038_v56, %v12054_v55 }
 0x7e3   : >> { %7595 = vrot.lane.b32.xlu0 %v7542_v7, %s9811_s21  ;;  %9414 = vmatmul.mubr.msk.f32.gmra.mrb[2].mxu0 %vm662_vm9, %v9410_v3  ;;  %v12574_v7 = vrot.slane %v7844_v10, %v9980_v29  ;;  %v9380_v3 = vld [vmem:[%s13168_s1 + $0xc8] sm:$0xff]  ;;  %v12610_v31 = vrot.slane %v7776_v26, %v9980_v29 }
 0x7e4   : >> { %v6240_v1 = vpop.permute.xlu1 %6239  ;;  %v6276_v40 = vpop.permute.xlu0 %6275  ;;  %6383 = vmatprep.mubr.f32.mxu0 %v13226_v37  ;;  %9384 = vmatmul.mubr.msk.f32.gmra.mrb[2].mxu1 %vm662_vm9, %v9380_v3  ;;  %v7868_v3 = vrot.slane %v7860_v48, %v9980_v29  ;;  %v9428_v26 = vld [vmem:[%s13168_s1 + $0x128] sm:$0xff] }
 0x7e5   : >> { %v6300_v47 = vsel %vm404_vm4, %v6299_v35, %v6276_v40  ;;  %v7481_v40 = vrot.slane %v7467_v33, %v9980_v29  ;;  %v7876_v30 = vcombine.high %v12574_v7, %v13226_v37  ;;  %4764 = vmatprep.mubr.f32.mxu1 %v13226_v37  ;;  %v7777_v33 = vcombine.high %v12567_v43, %v12570_v45  ;;  %v13281_v35 = vld [vmem:[#allocation19_spill] sm:$0xff]  ;;  %v13283_v43 = vld [vmem:[#allocation20_spill] sm:$0xff] }
 0x7e6   : >> { %7563 = vrot.lane.b32.xlu1 %v7483_v5, %s9814_s28  ;;  %v6291_v5 = vsel %vm400_vm2, %v6290_v14, %v6240_v1  ;;  %v7808_v56 = vcombine.high %v12610_v31, %v13226_v37  ;;  %v8142_v45 = vcombine.low %v13283_v43, %v11880_v28 }
 0x7e7   : >> { %7599 = vrot.lane.b32.xlu0 %v7552_v53, %s9816_s30  ;;  %v7485_v10 = vcombine.high %v7481_v40, %v13226_v37 }
 0x7e8   : >> { %v6244_v27 = vpop.permute.xlu1 %6243  ;;  %v6280_v18 = vpop.permute.xlu0 %6279 }
 0x7e9   : >> { %v6301_v44 = vsel %vm406_vm5, %v6300_v47, %v6280_v18  ;;  %v6292_v15 = vsel %vm402_vm3, %v6291_v5, %v6244_v27  ;;  %v7761_v27 = vcombine.high %v12066_v11, %v12082_v59  ;;  %v13282_v11 = vld [vmem:[#allocation18_spill] sm:$0xff]  ;;  %v7759_v47 = vrot.slane %v7745_v49, %v9947_v13 }
 0x7ea   : >> { %7567 = vrot.lane.b32.xlu1 %v7474_v60, %s9811_s21  ;;  %v7877_v60 = vcombine.high %v7859_v50, %v13226_v37  ;;  %v8158_v59 = vcombine.low %v13282_v11, %v13281_v35  ;;  %v8090_v5 = vcombine.low %v11896_v22, %v11911_v0 }
 0x7eb   : >> { %7603 = vrot.lane.b32.xlu0 %v7549_v9, %s9813_s27  ;;  %v7775_v39 = vrot.slane %v7761_v27, %v9947_v13 }
 0x7ec   : >> { %v6248_v34 = vpop.permute.xlu1 %6247  ;;  %v6284_v58 = vpop.permute.xlu0 %6283  ;;  %9390 = vmatmul.mubr.msk.f32.vlgmr.msra.gmra.mrb[2].mxu1 %vm662_vm9, %v9386_v61  ;;  %v8098_v48 = vrot.slane %v8090_v5, %v9947_v13 }
 0x7ed   : >> { %v6302_v38 = vsel %vm408_vm6, %v6301_v44, %v6284_v58  ;;  %v6293_v18 = vsel %vm404_vm4, %v6292_v15, %v6248_v34  ;;  %v7791_v44 = vrot.slane %v7777_v33, %v9980_v29  ;;  %v7793_v61 = vcombine.high %v7759_v47, %v7775_v39 }
 0x7ee   : >> { %7571 = vrot.lane.b32.xlu1 %v7484_v20, %s9816_s30  ;;  %v9427_v20 = vld [vmem:[%s13168_s1 + $0x120] sm:$0xff] }
 0x7ef   : >> { %7607 = vrot.lane.b32.xlu0 %v7553_v51, %s9817_s5  ;;  %v7809_v14 = vcombine.high %v7791_v44, %v13226_v37 }
 0x7f0   : >> { %v6252_v53 = vpop.permute.xlu1 %6251 }
 0x7f1   : >> { %v6288_v17 = vpop.permute.xlu0 %6287  ;;  %v6294_v1 = vsel %vm406_vm5, %v6293_v18, %v6252_v53  ;;  %v8150_v53 = vrot.slane %v8142_v45, %v9947_v13 }
 0x7f2   : >> { %v6303_v24 = vsel %vm410_vm7, %v6302_v38, %v6288_v17  ;;  %7575 = vrot.lane.b32.xlu1 %v7481_v40, %s9813_s27  ;;  %v8166_v38 = vrot.slane %v8158_v59, %v9947_v13  ;;  %v7861_v17 = vcombine.high %v7827_v23, %v12600_v57  ;;  %v7792_v40 = vcombine.low %v7759_v47, %v7775_v39 }
 0x7f3   : >> { %7909 = vrot.lane.b32.xlu0 %v7876_v30, %s9815_s29  ;;  %9429 = vmatprep.subr.msk.mxu0 %vm669_vm8, %v6303_v24 }
 0x7f4   : >> { %v6256_v62 = vpop.permute.xlu1 %6255  ;;  %v8174_v57 = vcombine.low %v8150_v53, %v8166_v38  ;;  %v7800_v15 = vrot.slane %v7792_v40, %v9980_v29  ;;  %v7875_v18 = vrot.slane %v7861_v17, %v9980_v29 }
 0x7f5   : >> { %v6598_v9 = vpop.permute.xlu0 %6597  ;;  %v6295_v51 = vsel %vm408_vm6, %v6294_v1, %v6256_v62  ;;  %v8074_v62 = vcombine.low %v11914_v16, %v11931_v8 }
 0x7f6   : >> { %7579 = vrot.lane.b32.xlu1 %v7485_v10, %s9817_s5  ;;  %v12674_v1 = vrot.slane %v8174_v57, %v9980_v29 }
 0x7f7   : >> { %7913 = vrot.lane.b32.xlu0 %v7859_v50, %s9812_s23  ;;  %v7878_v50 = vcombine.high %v7868_v3, %v13226_v37  ;;  %v8082_v49 = vrot.slane %v8074_v62, %v9947_v13 }
 0x7f8   : >> { %v6260_v34 = vpop.permute.xlu1 %6259 }
 0x7f9   : >> { %v6602_v58 = vpop.permute.xlu0 %6601  ;;  %v6296_v55 = vsel %vm410_vm7, %v6295_v51, %v6260_v34  ;;  %v7810_v34 = vcombine.high %v7800_v15, %v13226_v37  ;;  %v8106_v45 = vcombine.low %v8082_v49, %v8098_v48 }
 0x7fa   : >> { %7881 = vrot.lane.b32.xlu1 %v7808_v56, %s9815_s29  ;;  %9430 = vmatpush1.msk.msra.mxu0 %vm669_vm8, %v6296_v55  ;;  %v7879_v56 = vcombine.high %v7875_v18, %v13226_v37  ;;  %v8159_v55 = vcombine.high %v13282_v11, %v13281_v35 }
 0x7fb   : >> { %7917 = vrot.lane.b32.xlu0 %v7877_v60, %s9814_s28  ;;  %9431 = vmatmul.mubr.msk.f32.vlgmr.msra.gmra.mrb[0].mxu0 %vm662_vm9, %v9427_v20  ;;  %v6631_v60 = vsel %vm398_vm1, %v12180_v41, %v6598_v9  ;;  %v8143_v20 = vcombine.high %v13283_v43, %v11880_v28  ;;  %v8206_v9 = vcombine.high %v12674_v1, %v13226_v37 }
 0x7fc   : >> { %v6570_v32 = vpop.permute.xlu1 %6569  ;;  %6389 = vmatprep.mubr.f32.mxu0 %v13226_v37  ;;  %v6632_v27 = vsel %vm400_vm2, %v6631_v60, %v6602_v58  ;;  %v8175_v58 = vcombine.high %v8150_v53, %v8166_v38  ;;  %v7807_v28 = vrot.slane %v7793_v61, %v9980_v29  ;;  %v8091_v53 = vcombine.high %v11896_v22, %v11911_v0 }
 0x7fd   : >> { %v6606_v2 = vpop.permute.xlu0 %6605  ;;  %v6624_v38 = vsel %vm398_vm1, %v12212_v54, %v6570_v32  ;;  %v8107_v22 = vcombine.high %v8082_v49, %v8098_v48  ;;  %v8484_v60 = vcombine.low %v12259_v52, %v12269_v4  ;;  %v8468_v61 = vcombine.low %v12267_v21, %v12281_v63 }
 0x7fe   : >> { %7885 = vrot.lane.b32.xlu1 %v7791_v44, %s9812_s23  ;;  %v6633_v59 = vsel %vm402_vm3, %v6632_v27, %v6606_v2  ;;  %v12696_v2 = vrot.slane %v8106_v45, %v9980_v29  ;;  %v8173_v44 = vrot.slane %v8159_v55, %v9947_v13 }
 0x7ff   : >> { %7921 = vrot.lane.b32.xlu0 %v7868_v3, %s9811_s21  ;;  %9432 = vmatmul.mubr.msk.f32.gmra.mrb[2].mxu0 %vm662_vm9, %v9428_v26  ;;  %v8157_v3 = vrot.slane %v8143_v20, %v9947_v13  ;;  %v8189_v26 = vrot.slane %v8175_v58, %v9980_v29  ;;  %v8121_v48 = vrot.slane %v8107_v22, %v9980_v29 }
 0x800   : >> { %v6574_v30 = vpop.permute.xlu1 %6573  ;;  %6717 = vmatprep.mubr.f32.mxu0 %v13226_v37  ;;  %v8138_v62 = vcombine.high %v12696_v2, %v13226_v37  ;;  %v8476_v45 = vrot.slane %v8468_v61, %v9947_v13 }
 0x801   : >> { %v6610_v24 = vpop.permute.xlu0 %6609  ;;  %v6625_v17 = vsel %vm400_vm2, %v6624_v38, %v6574_v30  ;;  %v8207_v54 = vcombine.high %v8189_v26, %v13226_v37  ;;  %v8190_v0 = vcombine.low %v8157_v3, %v8173_v44  ;;  %v8191_v20 = vcombine.high %v8157_v3, %v8173_v44  ;;  %v13287_v44 = vld [vmem:[#allocation22_spill] sm:$0xff] }
 0x802   : >> { %7889 = vrot.lane.b32.xlu1 %v7809_v14, %s9814_s28  ;;  %v6634_v41 = vsel %vm404_vm4, %v6633_v59, %v6610_v24  ;;  %v7811_v14 = vcombine.high %v7807_v28, %v13226_v37  ;;  %v8492_v59 = vrot.slane %v8484_v60, %v9947_v13 }
 0x803   : >> { %7925 = vrot.lane.b32.xlu0 %v7878_v50, %s9816_s30  ;;  %v8075_v50 = vcombine.high %v11914_v16, %v11931_v8  ;;  %v8198_v49 = vrot.slane %v8190_v0, %v9980_v29 }
 0x804   : >> { %v6578_v23 = vpop.permute.xlu1 %6577 }
 0x805   : >> { %v6614_v10 = vpop.permute.xlu0 %6613  ;;  %v6626_v5 = vsel %vm402_vm3, %v6625_v17, %v6578_v23  ;;  %v8105_v23 = vrot.slane %v8091_v53, %v9947_v13 }
 0x806   : >> { %7893 = vrot.lane.b32.xlu1 %v7800_v15, %s9811_s21  ;;  %v6635_v47 = vsel %vm406_vm5, %v6634_v41, %v6614_v10  ;;  %v9433_v15 = vld [vmem:[%s13168_s1 + $0x130] sm:$0xff] }
 0x807   : >> { %7929 = vrot.lane.b32.xlu0 %v7875_v18, %s9813_s27  ;;  %v8089_v18 = vrot.slane %v8075_v50, %v9947_v13 }
 0x808   : >> { %v6582_v33 = vpop.permute.xlu1 %6581 }
 0x809   : >> { %v6618_v51 = vpop.permute.xlu0 %6617  ;;  %v6627_v32 = vsel %vm404_vm4, %v6626_v5, %v6582_v33  ;;  %v8122_v55 = vcombine.low %v8089_v18, %v8105_v23 }
 0x80a   : >> { %7897 = vrot.lane.b32.xlu1 %v7810_v34, %s9816_s30  ;;  %v6636_v35 = vsel %vm408_vm6, %v6635_v47, %v6618_v51  ;;  %v8139_v51 = vcombine.high %v8121_v48, %v13226_v37  ;;  %v9434_v34 = vld [vmem:[%s13168_s1 + $0x138] sm:$0xff]  ;;  %v8205_v47 = vrot.slane %v8191_v20, %v9980_v29 }
 0x80b   : >> { %7933 = vrot.lane.b32.xlu0 %v7879_v56, %s9817_s5  ;;  %v8208_v56 = vcombine.high %v8198_v49, %v13226_v37  ;;  %v8130_v58 = vrot.slane %v8122_v55, %v9980_v29 }
 0x80c   : >> { %v6586_v11 = vpop.permute.xlu1 %6585  ;;  %v8209_v17 = vcombine.high %v8205_v47, %v13226_v37 }
 0x80d   : >> { %v6622_v39 = vpop.permute.xlu0 %6621  ;;  %v6628_v30 = vsel %vm406_vm5, %v6627_v32, %v6586_v11  ;;  %v13284_v11 = vld [vmem:[#allocation27_spill] sm:$0xff]  ;;  %v8140_v53 = vcombine.high %v8130_v58, %v13226_v37 }
 0x80e   : >> { %v6637_v43 = vsel %vm410_vm7, %v6636_v35, %v6622_v39  ;;  %7901 = vrot.lane.b32.xlu1 %v7807_v28, %s9813_s27  ;;  %v8500_v35 = vcombine.low %v8476_v45, %v8492_v59  ;;  %v13285_v39 = vld [vmem:[#allocation21_spill] sm:$0xff] }
 0x80f   : >> { %8239 = vrot.lane.b32.xlu0 %v8206_v9, %s9815_s29  ;;  %9435 = vmatprep.subr.msk.mxu0 %vm669_vm8, %v6637_v43  ;;  %v8416_v28 = vcombine.low %v13285_v39, %v13284_v11  ;;  %v13286_v43 = vld [vmem:[#allocation25_spill] sm:$0xff] }
 0x810   : >> { %v6590_v40 = vpop.permute.xlu1 %6589  ;;  %v8400_v3 = vcombine.low %v13287_v44, %v13286_v43  ;;  %v12767_v0 = vrot.slane %v8500_v35, %v9980_v29 }
 0x811   : >> { %v6924_v24 = vpop.permute.xlu0 %6923  ;;  %v6629_v57 = vsel %vm408_vm6, %v6628_v30, %v6590_v40  ;;  %v8123_v40 = vcombine.high %v8089_v18, %v8105_v23  ;;  %v8424_v5 = vrot.slane %v8416_v28, %v9947_v13  ;;  %v8501_v23 = vcombine.high %v8476_v45, %v8492_v59 }
 0x812   : >> { %7905 = vrot.lane.b32.xlu1 %v7811_v14, %s9817_s5  ;;  %v13288_v14 = vld [vmem:[#allocation23_spill] sm:$0xff]  ;;  %v8532_v60 = vcombine.high %v12767_v0, %v13226_v37 }
 0x813   : >> { %8243 = vrot.lane.b32.xlu0 %v8189_v26, %s9812_s23  ;;  %v6957_v50 = vsel %vm398_vm1, %v13288_v14, %v6924_v24  ;;  %v8137_v24 = vrot.slane %v8123_v40, %v9980_v29  ;;  %v13290_v40 = vld [vmem:[#allocation8_spill] sm:$0xff]  ;;  %v13291_v14 = vld [vmem:[#allocation10_spill] sm:$0xff] }
 0x814   : >> { %v6594_v16 = vpop.permute.xlu1 %6593 }
 0x815   : >> { %v6928_v8 = vpop.permute.xlu0 %6927  ;;  %v6630_v10 = vsel %vm410_vm7, %v6629_v57, %v6594_v16  ;;  %v8485_v16 = vcombine.high %v12259_v52, %v12269_v4  ;;  %v8141_v52 = vcombine.high %v8137_v24, %v13226_v37 }
 0x816   : >> { %8211 = vrot.lane.b32.xlu1 %v8138_v62, %s9815_s29  ;;  %9436 = vmatpush1.msk.msra.mxu0 %vm669_vm8, %v6630_v10  ;;  %v8408_v62 = vrot.slane %v8400_v3, %v9947_v13 }
 0x817   : >> { %8247 = vrot.lane.b32.xlu0 %v8207_v54, %s9814_s28  ;;  %9437 = vmatmul.mubr.msk.f32.vlgmr.msra.gmra.mrb[0].mxu0 %vm662_vm9, %v9433_v15  ;;  %v6958_v54 = vsel %vm400_vm2, %v6957_v50, %v6928_v8  ;;  %v8469_v8 = vcombine.high %v12267_v21, %v12281_v63  ;;  %v8499_v21 = vrot.slane %v8485_v16, %v9947_v13  ;;  %v13289_v63 = vld [vmem:[#allocation24_spill] sm:$0xff] }
 0x818   : >> { %v6896_v27 = vpop.permute.xlu1 %6895  ;;  %6723 = vmatprep.mubr.f32.mxu0 %v13226_v37  ;;  %v8432_v15 = vcombine.low %v8408_v62, %v8424_v5  ;;  %v8433_v35 = vcombine.high %v8408_v62, %v8424_v5  ;;  %v8794_v50 = vcombine.low %v13291_v14, %v13290_v40 }
 0x819   : >> { %v6932_v33 = vpop.permute.xlu0 %6931  ;;  %v8483_v4 = vrot.slane %v8469_v8, %v9947_v13 }
 0x81a   : >> { %8215 = vrot.lane.b32.xlu1 %v8121_v48, %s9812_s23  ;;  %v6959_v30 = vsel %vm402_vm3, %v6958_v54, %v6932_v33  ;;  %v6950_v33 = vsel %vm398_vm1, %v13289_v63, %v6896_v27  ;;  %v12794_v20 = vrot.slane %v8432_v15, %v9980_v29  ;;  %v8447_v54 = vrot.slane %v8433_v35, %v9980_v29  ;;  %v13292_v15 = vld [vmem:[#allocation26_spill] sm:$0xff] }
 0x81b   : >> { %8251 = vrot.lane.b32.xlu0 %v8198_v49, %s9811_s21  ;;  %9438 = vmatmul.mubr.msk.f32.gmra.mrb[2].mxu0 %vm662_vm9, %v9434_v34  ;;  %v8516_v27 = vcombine.low %v8483_v4, %v8499_v21  ;;  %v8802_v16 = vrot.slane %v8794_v50, %v9947_v13  ;;  %v8795_v35 = vcombine.high %v13291_v14, %v13290_v40 }
 0x81c   : >> { %v6900_v41 = vpop.permute.xlu1 %6899  ;;  %7043 = vmatprep.mubr.f32.mxu0 %v13226_v37 }
 0x81d   : >> { %v6936_v9 = vpop.permute.xlu0 %6935  ;;  %v6951_v34 = vsel %vm400_vm2, %v6950_v33, %v6900_v41 }
 0x81e   : >> { %8219 = vrot.lane.b32.xlu1 %v8139_v51, %s9814_s28  ;;  %v6960_v57 = vsel %vm404_vm4, %v6959_v30, %v6936_v9  ;;  %v8515_v51 = vrot.slane %v8501_v23, %v9980_v29  ;;  %v8417_v9 = vcombine.high %v13285_v39, %v13284_v11  ;;  %v9439_v11 = vld [vmem:[%s13168_s1 + $0x140] sm:$0xff] }
 0x81f   : >> { %8255 = vrot.lane.b32.xlu0 %v8208_v56, %s9816_s30 }
 0x820   : >> { %v6904_v26 = vpop.permute.xlu1 %6903  ;;  %v8533_v41 = vcombine.high %v8515_v51, %v13226_v37  ;;  %v8431_v39 = vrot.slane %v8417_v9, %v9947_v13 }
 0x821   : >> { %v6940_v38 = vpop.permute.xlu0 %6939  ;;  %v6952_v59 = vsel %vm402_vm3, %v6951_v34, %v6904_v26 }
 0x822   : >> { %8223 = vrot.lane.b32.xlu1 %v8130_v58, %s9811_s21  ;;  %v6961_v10 = vsel %vm406_vm5, %v6960_v57, %v6940_v38  ;;  %v8464_v38 = vcombine.high %v12794_v20, %v13226_v37 }
 0x823   : >> { %8259 = vrot.lane.b32.xlu0 %v8205_v47, %s9813_s27  ;;  %v8401_v47 = vcombine.high %v13287_v44, %v13286_v43  ;;  %v8524_v43 = vrot.slane %v8516_v27, %v9980_v29 }
 0x824   : >> { %v6908_v32 = vpop.permute.xlu1 %6907 }
 0x825   : >> { %v6944_v22 = vpop.permute.xlu0 %6943  ;;  %v6953_v45 = vsel %vm404_vm4, %v6952_v59, %v6908_v32  ;;  %v8415_v44 = vrot.slane %v8401_v47, %v9947_v13  ;;  %v9440_v32 = vld [vmem:[%s13168_s1 + $0x148] sm:$0xff]  ;;  %v8534_v30 = vcombine.high %v8524_v43, %v13226_v37  ;;  %v8811_v47 = vcombine.high %v12424_v25, %v12438_v36 }
 0x826   : >> { %8227 = vrot.lane.b32.xlu1 %v8140_v53, %s9816_s30  ;;  %v6962_v18 = vsel %vm408_vm6, %v6961_v10, %v6944_v22  ;;  %v8517_v22 = vcombine.high %v8483_v4, %v8499_v21  ;;  %v8465_v10 = vcombine.high %v8447_v54, %v13226_v37 }
 0x827   : >> { %8263 = vrot.lane.b32.xlu0 %v8209_v17, %s9817_s5  ;;  %v8810_v17 = vcombine.low %v12424_v25, %v12438_v36  ;;  %v8448_v57 = vcombine.low %v8415_v44, %v8431_v39  ;;  %v8825_v25 = vrot.slane %v8811_v47, %v9947_v13  ;;  %v8809_v36 = vrot.slane %v8795_v35, %v9947_v13 }
 0x828   : >> { %v6912_v48 = vpop.permute.xlu1 %6911 }
 0x829   : >> { %v6948_v49 = vpop.permute.xlu0 %6947  ;;  %v6954_v58 = vsel %vm406_vm5, %v6953_v45, %v6912_v48  ;;  %v8531_v48 = vrot.slane %v8517_v22, %v9980_v29  ;;  %v8456_v63 = vrot.slane %v8448_v57, %v9980_v29 }
 0x82a   : >> { %v6963_v61 = vsel %vm410_vm7, %v6962_v18, %v6948_v49  ;;  %8231 = vrot.lane.b32.xlu1 %v8137_v24, %s9813_s27  ;;  %v8818_v24 = vrot.slane %v8810_v17, %v9947_v13  ;;  %v13294_v17 = vld [vmem:[#allocation16_spill] sm:$0xff] }
 0x82b   : >> { %8565 = vrot.lane.b32.xlu0 %v8532_v60, %s9815_s29  ;;  %9441 = vmatprep.subr.msk.mxu0 %vm669_vm8, %v6963_v61  ;;  %v13293_v60 = vld [vmem:[#allocation11_spill] sm:$0xff]  ;;  %v8535_v34 = vcombine.high %v8531_v48, %v13226_v37  ;;  %v8466_v27 = vcombine.high %v8456_v63, %v13226_v37 }
 0x82c   : >> { %v6916_v56 = vpop.permute.xlu1 %6915  ;;  %v8826_v49 = vcombine.low %v8802_v16, %v8818_v24  ;;  %v8742_v61 = vcombine.low %v13293_v60, %v12471_v6 }
 0x82d   : >> { %v7258_v55 = vpop.permute.xlu0 %7257  ;;  %v6955_v28 = vsel %vm408_vm6, %v6954_v58, %v6916_v56 }
 0x82e   : >> { %8235 = vrot.lane.b32.xlu1 %v8141_v52, %s9817_s5  ;;  %v7291_v18 = vsel %vm398_vm1, %v13292_v15, %v7258_v55  ;;  %v8726_v52 = vcombine.low %v12469_v12, %v12489_v42  ;;  %v8750_v56 = vrot.slane %v8742_v61, %v9947_v13  ;;  %v12855_v9 = vrot.slane %v8826_v49, %v9980_v29 }
 0x82f   : >> { %8569 = vrot.lane.b32.xlu0 %v8515_v51, %s9812_s23  ;;  %v8449_v51 = vcombine.high %v8415_v44, %v8431_v39 }
 0x830   : >> { %v6920_v3 = vpop.permute.xlu1 %6919  ;;  %v8734_v55 = vrot.slane %v8726_v52, %v9947_v13 }
 0x831   : >> { %v7262_v26 = vpop.permute.xlu0 %7261  ;;  %v6956_v53 = vsel %vm410_vm7, %v6955_v28, %v6920_v3  ;;  %v8827_v28 = vcombine.high %v8802_v16, %v8818_v24  ;;  %v8463_v39 = vrot.slane %v8449_v51, %v9980_v29  ;;  %v8743_v24 = vcombine.high %v13293_v60, %v12471_v6  ;;  %v9445_v6 = vld [vmem:[%s13168_s1 + $0x150] sm:$0xff] }
 0x832   : >> { %8537 = vrot.lane.b32.xlu1 %v8464_v38, %s9815_s29  ;;  %9442 = vmatpush1.msk.msra.mxu0 %vm669_vm8, %v6956_v53  ;;  %v7292_v33 = vsel %vm400_vm2, %v7291_v18, %v7262_v26  ;;  %v8758_v26 = vcombine.low %v8734_v55, %v8750_v56 }
 0x833   : >> { %8573 = vrot.lane.b32.xlu0 %v8533_v41, %s9814_s28  ;;  %9443 = vmatmul.mubr.msk.f32.vlgmr.msra.gmra.mrb[0].mxu0 %vm662_vm9, %v9439_v11  ;;  %v8841_v14 = vrot.slane %v8827_v28, %v9980_v29 }
 0x834   : >> { %v7230_v5 = vpop.permute.xlu1 %7229  ;;  %7049 = vmatprep.mubr.f32.mxu0 %v13226_v37  ;;  %v12882_v22 = vrot.slane %v8758_v26, %v9980_v29 }
 0x835   : >> { %v7266_v62 = vpop.permute.xlu0 %7265  ;;  %v7284_v40 = vsel %vm398_vm1, %v13294_v17, %v7230_v5  ;;  %v8842_v5 = vcombine.low %v8809_v36, %v8825_v25  ;;  %v9820_v17 = vmov 0  }
 0x836   : >> { %8541 = vrot.lane.b32.xlu1 %v8447_v54, %s9812_s23  ;;  %v7293_v58 = vsel %vm402_vm3, %v7292_v33, %v7266_v62  ;;  %v8790_v49 = vcombine.high %v12882_v22, %v13226_v37  ;;  %v8843_v33 = vcombine.high %v8809_v36, %v8825_v25  ;;  %9690 = vset.pattern.permute.xlu0 %v9820_v17 }
 0x837   : >> { %8577 = vrot.lane.b32.xlu0 %v8524_v43, %s9811_s21  ;;  %9444 = vmatmul.mubr.msk.f32.gmra.mrb[2].mxu0 %vm662_vm9, %v9440_v32  ;;  %v8858_v43 = vcombine.high %v12855_v9, %v13226_v37  ;;  %v8467_v32 = vcombine.high %v8463_v39, %v13226_v37 }
 0x838   : >> { %v7234_v8 = vpop.permute.xlu1 %7233  ;;  %7377 = vmatprep.mubr.f32.mxu0 %v13226_v37  ;;  %9691 = vset.pattern.permute.xlu1 %v9820_v17 }
 0x839   : >> { %v7270_v23 = vpop.permute.xlu0 %7269  ;;  %v7285_v50 = vsel %vm400_vm2, %v7284_v40, %v7234_v8  ;;  %v8859_v8 = vcombine.high %v8841_v14, %v13226_v37 }
 0x83a   : >> { %8545 = vrot.lane.b32.xlu1 %v8465_v10, %s9814_s28  ;;  %v7294_v41 = vsel %vm404_vm4, %v7293_v58, %v7270_v23  ;;  %v8727_v23 = vcombine.high %v12469_v12, %v12489_v42  ;;  %v8759_v10 = vcombine.high %v8734_v55, %v8750_v56  ;;  %v8757_v12 = vrot.slane %v8743_v24, %v9947_v13 }
 0x83b   : >> { %8581 = vrot.lane.b32.xlu0 %v8534_v30, %s9816_s30  ;;  %v8857_v58 = vrot.slane %v8843_v33, %v9980_v29 }
 0x83c   : >> { %v7238_v21 = vpop.permute.xlu1 %7237  ;;  %v8741_v42 = vrot.slane %v8727_v23, %v9947_v13  ;;  %v9451_v23 = vld [vmem:[%s13168_s1 + $0x160] sm:$0xff] }
 0x83d   : >> { %v7274_v4 = vpop.permute.xlu0 %7273  ;;  %v7286_v30 = vsel %vm402_vm3, %v7285_v50, %v7238_v21  ;;  %v8773_v21 = vrot.slane %v8759_v10, %v9980_v29 }
 0x83e   : >> { %8549 = vrot.lane.b32.xlu1 %v8456_v63, %s9811_s21  ;;  %v7295_v3 = vsel %vm406_vm5, %v7294_v41, %v7274_v4  ;;  %v8850_v4 = vrot.slane %v8842_v5, %v9980_v29  ;;  %v9446_v63 = vld [vmem:[%s13168_s1 + $0x158] sm:$0xff]  ;;  %v8774_v13 = vcombine.low %v8741_v42, %v8757_v12  ;;  %v8775_v47 = vcombine.high %v8741_v42, %v8757_v12 }
 0x83f   : >> { %8585 = vrot.lane.b32.xlu0 %v8531_v48, %s9813_s27  ;;  %v8791_v56 = vcombine.high %v8773_v21, %v13226_v37 }
 0x840   : >> { %v7242_v59 = vpop.permute.xlu1 %7241  ;;  %v8860_v55 = vcombine.high %v8850_v4, %v13226_v37  ;;  %v8789_v36 = vrot.slane %v8775_v47, %v9980_v29 }
 0x841   : >> { %v7278_v45 = vpop.permute.xlu0 %7277  ;;  %v7287_v57 = vsel %vm404_vm4, %v7286_v30, %v7242_v59 }
 0x842   : >> { %8553 = vrot.lane.b32.xlu1 %v8466_v27, %s9816_s30  ;;  %v7296_v38 = vsel %vm408_vm6, %v7295_v3, %v7278_v45  ;;  %v8782_v27 = vrot.slane %v8774_v13, %v9980_v29  ;;  %v8793_v30 = vcombine.high %v8789_v36, %v13226_v37 }
 0x843   : >> { %8589 = vrot.lane.b32.xlu0 %v8535_v34, %s9817_s5 }
 0x844   : >> { %v7246_v53 = vpop.permute.xlu1 %7245  ;;  %v8792_v26 = vcombine.high %v8782_v27, %v13226_v37 }
 0x845   : >> { %v7282_v11 = vpop.permute.xlu0 %7281  ;;  %v7288_v16 = vsel %vm406_vm5, %v7287_v57, %v7246_v53 }
 0x846   : >> { %v7297_v44 = vsel %vm410_vm7, %v7296_v38, %v7282_v11  ;;  %8557 = vrot.lane.b32.xlu1 %v8463_v39, %s9813_s27  ;;  %v8861_v38 = vcombine.high %v8857_v58, %v13226_v37 }
 0x847   : >> { %8891 = vrot.lane.b32.xlu0 %v8858_v43, %s9815_s29  ;;  %9447 = vmatprep.subr.msk.mxu0 %vm669_vm8, %v7297_v44 }
 0x848   : >> { %v7250_v62 = vpop.permute.xlu1 %7249 }
 0x849   : >> { %v7584_v54 = vpop.permute.xlu0 %7583  ;;  %v7289_v15 = vsel %vm408_vm6, %v7288_v16, %v7250_v62  ;;  %v13295_v62 = vld [vmem:[#allocation6_spill] sm:$0xff] }
 0x84a   : >> { %8561 = vrot.lane.b32.xlu1 %v8467_v32, %s9817_s5  ;;  %v7617_v41 = vsel %vm398_vm1, %v12474_v46, %v7584_v54  ;;  %v12935_v46 = vpop.f32.mrb[0].mxu1 }
 0x84b   : >> { %8895 = vrot.lane.b32.xlu0 %v8841_v14, %s9812_s23  ;;  %v12940_v14 = vpop.f32.mrb[1].mxu1 }
 0x84c   : >> { %v7254_v18 = vpop.permute.xlu1 %7253 }
 0x84d   : >> { %v7588_v48 = vpop.permute.xlu0 %7587  ;;  %v7290_v61 = vsel %vm410_vm7, %v7289_v15, %v7254_v18  ;;  %v13296_v15 = vld [vmem:[#allocation5_spill] sm:$0xff] }
 0x84e   : >> { %8863 = vrot.lane.b32.xlu1 %v8790_v49, %s9815_s29  ;;  %9448 = vmatpush1.msk.msra.mxu0 %vm669_vm8, %v7290_v61  ;;  %v7618_v35 = vsel %vm400_vm2, %v7617_v41, %v7588_v48  ;;  %v9452_v49 = vld [vmem:[%s13168_s1 + $0x168] sm:$0xff] }
 0x84f   : >> { %8899 = vrot.lane.b32.xlu0 %v8859_v8, %s9814_s28  ;;  %9449 = vmatmul.mubr.msk.f32.vlgmr.msra.gmra.mrb[0].mxu0 %vm662_vm9, %v9445_v6 }
 0x850   : >> { %v7556_v60 = vpop.permute.xlu1 %7555  ;;  %7383 = vmatprep.mubr.f32.mxu0 %v13226_v37 }
 0x851   : >> { %v7592_v52 = vpop.permute.xlu0 %7591  ;;  %v7610_v50 = vsel %vm398_vm1, %v12507_v19, %v7556_v60 }
 0x852   : >> { %8867 = vrot.lane.b32.xlu1 %v8773_v21, %s9812_s23  ;;  %v7619_v53 = vsel %vm402_vm3, %v7618_v35, %v7592_v52  ;;  %s13113_s23 = scalar_lea.hbm (%p188_p12), %s13170_s3, %s9503_s26 }
 0x853   : >> { %8903 = vrot.lane.b32.xlu0 %v8850_v4, %s9811_s21  ;;  %9450 = vmatmul.mubr.msk.f32.gmra.mrb[2].mxu0 %vm662_vm9, %v9446_v63 }
 0x854   : >> { %v7560_v51 = vpop.permute.xlu1 %7559  ;;  %7703 = vmatprep.mubr.f32.mxu0 %v13226_v37 }
 0x855   : >> { %v7596_v34 = vpop.permute.xlu0 %7595  ;;  %v7611_v54 = vsel %vm400_vm2, %v7610_v50, %v7560_v51 }
 0x856   : >> { %8871 = vrot.lane.b32.xlu1 %v8791_v56, %s9814_s28  ;;  %v7620_v11 = vsel %vm404_vm4, %v7619_v53, %v7596_v34 }
 0x857   : >> { %8907 = vrot.lane.b32.xlu0 %v8860_v55, %s9816_s30 }
 0x858   : >> { %v7564_v59 = vpop.permute.xlu1 %7563 }
 0x859   : >> { %v7600_v45 = vpop.permute.xlu0 %7599  ;;  %v7612_v57 = vsel %vm402_vm3, %v7611_v54, %v7564_v59 }
 0x85a   : >> { %8875 = vrot.lane.b32.xlu1 %v8782_v27, %s9811_s21  ;;  %v7621_v39 = vsel %vm406_vm5, %v7620_v11, %v7600_v45  ;;  %v9458_v11 = vld [vmem:[%s13168_s1 + $0x178] sm:$0xff] }
 0x85b   : >> { %8911 = vrot.lane.b32.xlu0 %v8857_v58, %s9813_s27 }
 0x85c   : >> { %v7568_v28 = vpop.permute.xlu1 %7567 }
 0x85d   : >> { %v7604_v3 = vpop.permute.xlu0 %7603  ;;  %v7613_v5 = vsel %vm404_vm4, %v7612_v57, %v7568_v28 }
 0x85e   : >> { %8879 = vrot.lane.b32.xlu1 %v8792_v26, %s9816_s30  ;;  %v7622_v43 = vsel %vm408_vm6, %v7621_v39, %v7604_v3  ;;  %v9457_v26 = vld [vmem:[%s13168_s1 + $0x170] sm:$0xff]  ;;  %s13303_s30 = sand.u32 (%p188_p12), 1, %s9786_s13  }
 0x85f   : >> { %8915 = vrot.lane.b32.xlu0 %v8861_v38, %s9817_s5  ;;  %s13121_s11 = scalar_lea.sflag (%p188_p12), [#allocation3], %s13303_s30 }
 0x860   : >> { %v7572_v44 = vpop.permute.xlu1 %7571 }
 0x861   : >> { %v7608_v25 = vpop.permute.xlu0 %7607  ;;  %v7614_v24 = vsel %vm406_vm5, %v7613_v5, %v7572_v44 }
 0x862   : >> { %v7623_v40 = vsel %vm410_vm7, %v7622_v43, %v7608_v25  ;;  %8883 = vrot.lane.b32.xlu1 %v8789_v36, %s9813_s27  ;;  %s13302_s27 = scalar_lea.vmem (%p188_p12), [#allocation2], %s9914_s4 }
 0x863   : >> { %9453 = vmatprep.subr.msk.mxu0 %vm669_vm8, %v7623_v40  ;;  %9035 = vperm.xlu0 %9690, %v13295_v62   ;;  %s9173_s28 = sshll.u32 (%p188_p12), %s13302_s27, 4  ;;  %s13117_s28 = int_to_ptr.vmem [resolvable:$true] %s9173_s28 }
 0x864   : >> { %v7576_v32 = vpop.permute.xlu1 %7575  ;;  %s9720_s9 = scalar_lea.vmem (%p188_p12), %s13117_s28, 4096 }
 0x865   : >> { %v7910_v29 = vpop.permute.xlu0 %7909  ;;  %v7615_v16 = vsel %vm408_vm6, %v7614_v24, %v7576_v32  ;;  %p9721_p13 = scmp.ne.s32.totalorder (%p188_p12), %s13117_s28, %s9720_s9 }
 0x866   : >> { %8887 = vrot.lane.b32.xlu1 %v8793_v30, %s9817_s5  ;;  %v7943_v60 = vsel %vm398_vm1, %v12574_v7, %v7910_v29  ;;  %s9724_s5 = sshll.u32 (%p188_p12), %s9822_s15, 4  ;;  %s9725_s5 = int_to_ptr.vmem [resolvable:$false] %s9724_s5 }
 0x867   : > { %p9722_p0 = pnand (%p188_p12), %p9721_p13, %p9885_p4  ;;  %s9726_s6 = scalar_lea.vmem (%p188_p12), %s9725_s5, 8192 }
 0x868   : >> { %v7580_v8 = vpop.permute.xlu1 %7579  ;;  %p9727_p2 = scmp.lt.s32.totalorder (%p188_p12), %s13117_s28, %s9725_s5  ;;  %p9728_p3 = scmp.lt.s32.totalorder (%p188_p12), %s9726_s6, %s9720_s9 }
 0x869   : >> { %v7914_v19 = vpop.permute.xlu0 %7913  ;;  %v7616_v10 = vsel %vm410_vm7, %v7615_v16, %v7580_v8  ;;  %p9723_p1 = pneg (%p188_p12), %p9722_p0 }
 0x86a   : >> { %9454 = vmatpush1.msk.msra.mxu0 %vm669_vm8, %v7616_v10  ;;  %9030 = vperm.xlu1 %9691, %v13296_v15   ;;  %v7944_v52 = vsel %vm400_vm2, %v7943_v60, %v7914_v19  ;;  %p9729_p5 = por (%p188_p12), %p9728_p3, %p9727_p2 }
 0x86b   : >> { %9455 = vmatmul.mubr.msk.f32.vlgmr.msra.gmra.mrb[0].mxu0 %vm662_vm9, %v9451_v23 }
 0x86c   : >> { %v7882_v18 = vpop.permute.xlu1 %7881  ;;  %7709 = vmatprep.mubr.f32.mxu0 %v13226_v37  ;;  %p9730_p6 = pnand (%p188_p12), %p9729_p5, %p9723_p1 }
 0x86d   : >> { %v7918_v48 = vpop.permute.xlu0 %7917  ;;  %v7936_v7 = vsel %vm398_vm1, %v12610_v31, %v7882_v18 }
 0x86e   : >> { %v7945_v63 = vsel %vm402_vm3, %v7944_v52, %v7918_v48 }
 0x86f   : >> { %9456 = vmatmul.mubr.msk.f32.gmra.mrb[2].mxu0 %vm662_vm9, %v9452_v49  ;;  %v9463_v49 = vld [vmem:[%s13168_s1 + $0x180] sm:$0xff] }
 0x870   : >> { %v7886_v61 = vpop.permute.xlu1 %7885  ;;  %8029 = vmatprep.mubr.f32.mxu0 %v13226_v37 }
 0x871   : >> { %v7922_v6 = vpop.permute.xlu0 %7921  ;;  %v7937_v59 = vsel %vm400_vm2, %v7936_v7, %v7886_v61 }
 0x872   : >> { %v7946_v33 = vsel %vm404_vm4, %v7945_v63, %v7922_v6 }
 0x874   : >> { %v7890_v12 = vpop.permute.xlu1 %7889 }
 0x875   : >> { %v7926_v42 = vpop.permute.xlu0 %7925  ;;  %v7938_v58 = vsel %vm402_vm3, %v7937_v59, %v7890_v12  ;;  %v9464_v12 = vld [vmem:[%s13168_s1 + $0x188] sm:$0xff] }
 0x876   : >> { %v7947_v13 = vsel %vm406_vm5, %v7946_v33, %v7926_v42 }
 0x878   : >> { %v7894_v21 = vpop.permute.xlu1 %7893 }
 0x879   : >> { %v7930_v4 = vpop.permute.xlu0 %7929  ;;  %v7939_v41 = vsel %vm404_vm4, %v7938_v58, %v7894_v21 }
 0x87a   : >> { %v7948_v51 = vsel %vm408_vm6, %v7947_v13, %v7930_v4 }
 0x87c   : >> { %v7898_v34 = vpop.permute.xlu1 %7897 }
 0x87d   : >> { %v7934_v56 = vpop.permute.xlu0 %7933  ;;  %v7940_v47 = vsel %vm406_vm5, %v7939_v41, %v7898_v34 }
 0x87e   : >> { %v7949_v55 = vsel %vm410_vm7, %v7948_v51, %v7934_v56 }
 0x87f   : >> { %9459 = vmatprep.subr.msk.mxu0 %vm669_vm8, %v7949_v55 }
 0x880   : >> { %v7902_v45 = vpop.permute.xlu1 %7901 }
 0x881   : >> { %v8240_v27 = vpop.permute.xlu0 %8239  ;;  %v7941_v35 = vsel %vm408_vm6, %v7940_v47, %v7902_v45 }
 0x882   : >> { %v8273_v44 = vsel %vm398_vm1, %v12674_v1, %v8240_v27 }
 0x884   : >> { %v7906_v28 = vpop.permute.xlu1 %7905 }
 0x885   : >> { %v8244_v3 = vpop.permute.xlu0 %8243  ;;  %v7942_v31 = vsel %vm410_vm7, %v7941_v35, %v7906_v28 }
 0x886   : >> { %9460 = vmatpush1.msk.msra.mxu0 %vm669_vm8, %v7942_v31  ;;  %v8274_v17 = vsel %vm400_vm2, %v8273_v44, %v8244_v3 }
 0x887   : >> { %9461 = vmatmul.mubr.msk.f32.vlgmr.msra.gmra.mrb[0].mxu0 %vm662_vm9, %v9457_v26 }
 0x888   : >> { %v8212_v38 = vpop.permute.xlu1 %8211  ;;  %8035 = vmatprep.mubr.f32.mxu0 %v13226_v37 }
 0x889   : >> { %v8248_v53 = vpop.permute.xlu0 %8247  ;;  %v8266_v1 = vsel %vm398_vm1, %v12696_v2, %v8212_v38  ;;  %v9469_v38 = vld [vmem:[%s13168_s1 + $0x190] sm:$0xff] }
 0x88a   : >> { %v8275_v62 = vsel %vm402_vm3, %v8274_v17, %v8248_v53 }
 0x88b   : >> { %9462 = vmatmul.mubr.msk.f32.gmra.mrb[2].mxu0 %vm662_vm9, %v9458_v11 }
 0x88c   : >> { %v8216_v39 = vpop.permute.xlu1 %8215  ;;  %8359 = vmatprep.mubr.f32.mxu0 %v13226_v37 }
 0x88d   : >> { %v8252_v43 = vpop.permute.xlu0 %8251  ;;  %v8267_v24 = vsel %vm400_vm2, %v8266_v1, %v8216_v39  ;;  %v9470_v39 = vld [vmem:[%s13168_s1 + $0x198] sm:$0xff] }
 0x88e   : >> { %v8276_v54 = vsel %vm404_vm4, %v8275_v62, %v8252_v43 }
 0x890   : >> { %v8220_v25 = vpop.permute.xlu1 %8219 }
 0x891   : >> { %v8256_v36 = vpop.permute.xlu0 %8255  ;;  %v8268_v19 = vsel %vm402_vm3, %v8267_v24, %v8220_v25 }
 0x892   : >> { %v8277_v32 = vsel %vm406_vm5, %v8276_v54, %v8256_v36 }
 0x894   : >> { %v8224_v40 = vpop.permute.xlu1 %8223 }
 0x895   : >> { %v8260_v50 = vpop.permute.xlu0 %8259  ;;  %v8269_v23 = vsel %vm404_vm4, %v8268_v19, %v8224_v40 }
 0x896   : >> { %v8278_v29 = vsel %vm408_vm6, %v8277_v32, %v8260_v50 }
 0x898   : >> { %v8228_v30 = vpop.permute.xlu1 %8227 }
 0x899   : >> { %v8264_v57 = vpop.permute.xlu0 %8263  ;;  %v8270_v10 = vsel %vm406_vm5, %v8269_v23, %v8228_v30 }
 0x89a   : >> { %v8279_v5 = vsel %vm410_vm7, %v8278_v29, %v8264_v57 }
 0x89b   : >> { %9465 = vmatprep.subr.msk.mxu0 %vm669_vm8, %v8279_v5 }
 0x89c   : >> { %v8232_v16 = vpop.permute.xlu1 %8231 }
 0x89d   : >> { %v8566_v8 = vpop.permute.xlu0 %8565  ;;  %v8271_v15 = vsel %vm408_vm6, %v8270_v10, %v8232_v16 }
 0x89e   : >> { %v8599_v4 = vsel %vm398_vm1, %v12767_v0, %v8566_v8 }
 0x8a0   : >> { %v8236_v18 = vpop.permute.xlu1 %8235 }
 0x8a1   : >> { %v8570_v48 = vpop.permute.xlu0 %8569  ;;  %v8272_v2 = vsel %vm410_vm7, %v8271_v15, %v8236_v18 }
 0x8a2   : >> { %9466 = vmatpush1.msk.msra.mxu0 %vm669_vm8, %v8272_v2  ;;  %v8600_v63 = vsel %vm400_vm2, %v8599_v4, %v8570_v48 }
 0x8a3   : >> { %9467 = vmatmul.mubr.msk.f32.vlgmr.msra.gmra.mrb[0].mxu0 %vm662_vm9, %v9463_v49  ;;  %v9475_v49 = vld [vmem:[%s13168_s1 + $0x1a0] sm:$0xff] }
 0x8a4   : >> { %v8538_v61 = vpop.permute.xlu1 %8537  ;;  %8365 = vmatprep.mubr.f32.mxu0 %v13226_v37 }
 0x8a5   : >> { %v8574_v6 = vpop.permute.xlu0 %8573  ;;  %v8592_v0 = vsel %vm398_vm1, %v12794_v20, %v8538_v61 }
 0x8a6   : >> { %v8601_v51 = vsel %vm402_vm3, %v8600_v63, %v8574_v6 }
 0x8a7   : >> { %9468 = vmatmul.mubr.msk.f32.gmra.mrb[2].mxu0 %vm662_vm9, %v9464_v12 }
 0x8a8   : >> { %v8542_v42 = vpop.permute.xlu1 %8541  ;;  %8685 = vmatprep.mubr.f32.mxu0 %v13226_v37 }
 0x8a9   : >> { %v8578_v60 = vpop.permute.xlu0 %8577  ;;  %v8593_v27 = vsel %vm400_vm2, %v8592_v0, %v8542_v42 }
 0x8aa   : >> { %v8602_v34 = vsel %vm404_vm4, %v8601_v51, %v8578_v60 }
 0x8ac   : >> { %v8546_v52 = vpop.permute.xlu1 %8545 }
 0x8ad   : >> { %v8582_v21 = vpop.permute.xlu0 %8581  ;;  %v8594_v47 = vsel %vm402_vm3, %v8593_v27, %v8546_v52 }
 0x8ae   : >> { %v8603_v56 = vsel %vm406_vm5, %v8602_v34, %v8582_v21 }
 0x8b0   : >> { %v8550_v33 = vpop.permute.xlu1 %8549 }
 0x8b1   : >> { %v8586_v13 = vpop.permute.xlu0 %8585  ;;  %v8595_v35 = vsel %vm404_vm4, %v8594_v47, %v8550_v33 }
 0x8b2   : >> { %v8604_v55 = vsel %vm408_vm6, %v8603_v56, %v8586_v13 }
 0x8b4   : >> { %v8554_v7 = vpop.permute.xlu1 %8553 }
 0x8b5   : >> { %v8590_v59 = vpop.permute.xlu0 %8589  ;;  %v8596_v28 = vsel %vm406_vm5, %v8595_v35, %v8554_v7 }
 0x8b6   : >> { %v8605_v45 = vsel %vm410_vm7, %v8604_v55, %v8590_v59 }
 0x8b7   : >> { %9471 = vmatprep.subr.msk.mxu0 %vm669_vm8, %v8605_v45 }
 0x8b8   : >> { %v8558_v58 = vpop.permute.xlu1 %8557 }
 0x8b9   : >> { %v8892_v41 = vpop.permute.xlu0 %8891  ;;  %v8597_v3 = vsel %vm408_vm6, %v8596_v28, %v8558_v58 }
 0x8ba   : >> { %v8925_v17 = vsel %vm398_vm1, %v12855_v9, %v8892_v41 }
 0x8bc   : >> { %v8562_v26 = vpop.permute.xlu1 %8561 }
 0x8bd   : >> { %v8896_v31 = vpop.permute.xlu0 %8895  ;;  %v8598_v20 = vsel %vm410_vm7, %v8597_v3, %v8562_v26  ;;  %v13297_v3 = vld [vmem:[#allocation7_spill] sm:$0xff] }
 0x8be   : >> { %9472 = vmatpush1.msk.msra.mxu0 %vm669_vm8, %v8598_v20  ;;  %v8926_v50 = vsel %vm400_vm2, %v8925_v17, %v8896_v31 }
 0x8bf   : >> { %9473 = vmatmul.mubr.msk.f32.vlgmr.msra.gmra.mrb[0].mxu0 %vm662_vm9, %v9469_v38  ;;  %v4766_v40 = vpop.f32.mrb[2].mxu1 }
 0x8c0   : >> { %v8864_v53 = vpop.permute.xlu1 %8863  ;;  %8691 = vmatprep.mubr.f32.mxu0 %v13226_v37  ;;  %v4768_v29 = vpop.f32.mrb[3].mxu1 }
 0x8c1   : >> { %v8900_v11 = vpop.permute.xlu0 %8899  ;;  %v8918_v9 = vsel %vm398_vm1, %v12882_v22, %v8864_v53  ;;  %v9476_v22 = vld [vmem:[%s13168_s1 + $0x1a8] sm:$0xff] }
 0x8c2   : >> { %v8927_v32 = vsel %vm402_vm3, %v8926_v50, %v8900_v11 }
 0x8c3   : >> { %9474 = vmatmul.mubr.msk.f32.gmra.mrb[2].mxu0 %vm662_vm9, %v9470_v39  ;;  %v13298_v39 = vlaneseq }
 0x8c4   : >> { %v8868_v43 = vpop.permute.xlu1 %8867  ;;  %9011 = vmatprep.mubr.f32.mxu0 %v13226_v37 }
 0x8c5   : >> { %v8904_v44 = vpop.permute.xlu0 %8903  ;;  %v8919_v8 = vsel %vm400_vm2, %v8918_v9, %v8868_v43  ;;  %vm13084_vm11 = vcmp.lt.s32.totalorder %v13298_v39, 256 }
 0x8c6   : >> { %v8928_v30 = vsel %vm404_vm4, %v8927_v32, %v8904_v44 }
 0x8c8   : >> { %v8872_v25 = vpop.permute.xlu1 %8871 }
 0x8c9   : >> { %v8908_v36 = vpop.permute.xlu0 %8907  ;;  %v8920_v23 = vsel %vm402_vm3, %v8919_v8, %v8872_v25 }
 0x8ca   : >> { %v8929_v57 = vsel %vm406_vm5, %v8928_v30, %v8908_v36 }
 0x8cc   : >> { %v8876_v62 = vpop.permute.xlu1 %8875 }
 0x8cd   : >> { %v8912_v54 = vpop.permute.xlu0 %8911  ;;  %v8921_v10 = vsel %vm404_vm4, %v8920_v23, %v8876_v62 }
 0x8ce   : >> { %v8930_v5 = vsel %vm408_vm6, %v8929_v57, %v8912_v54 }
 0x8d0   : >> { %v8880_v1 = vpop.permute.xlu1 %8879 }
 0x8d1   : >> { %v8916_v24 = vpop.permute.xlu0 %8915  ;;  %v8922_v15 = vsel %vm406_vm5, %v8921_v10, %v8880_v1 }
 0x8d2   : >> { %v8931_v16 = vsel %vm410_vm7, %v8930_v5, %v8916_v24 }
 0x8d3   : >> { %9477 = vmatprep.subr.msk.mxu0 %vm669_vm8, %v8931_v16 }
 0x8d4   : >> { %v8884_v19 = vpop.permute.xlu1 %8883 }
 0x8d5   : >> { %v8923_v18 = vsel %vm408_vm6, %v8922_v15, %v8884_v19 }
 0x8d8   : >> { %v8888_v48 = vpop.permute.xlu1 %8887 }
 0x8d9   : >> { %v8924_v2 = vsel %vm410_vm7, %v8923_v18, %v8888_v48 }
 0x8da   : >> { %9478 = vmatpush1.msk.msra.mxu0 %vm669_vm8, %v8924_v2 }
 0x8db   : >> { %9479 = vmatmul.mubr.msk.f32.vlgmr.msra.gmra.mrb[0].mxu0 %vm662_vm9, %v9475_v49 }
 0x8dc   : >> { %9017 = vmatprep.mubr.f32.mxu0 %v13226_v37 }
 0x8df   : >> { %9480 = vmatmul.mubr.msk.f32.gmra.mrb[2].mxu0 %vm662_vm9, %v9476_v22 }
 0x8e2   : >> { %v9036_v52 = vpop.permute.xlu0 %9035 }
 0x8e9   : >> { %v9031_v0 = vpop.permute.xlu1 %9030 }
 0x9ae   : >> { %v9013_v61 = vpop.f32.mrb[0].mxu0 }
 0x9af   : >> { %v9506_v6 = vadd.f32 %v9013_v61, %v12935_v46  ;;  %v9015_v12 = vpop.f32.mrb[1].mxu0 }
 0x9b0   : >> { %v9507_v42 = vadd.f32 %v9015_v12, %v12940_v14  ;;  %v9821_v14 = vmov 1966171168  }
 0x9b1   : >> { %v9059_v45 = vunpack.c.l.s4 %v9821_v14  ;;  %v9038_v58 = vadd.f32 %v9506_v6, %v9031_v0 }
 0x9b2   : >> { %v9019_v60 = vpop.f32.mrb[2].mxu0  ;;  %v9039_v47 = vadd.f32 %v9507_v42, %v9031_v0 }
 0x9b3   : >> { %v9508_v21 = vadd.f32 %v9019_v60, %v4766_v40  ;;  %v9021_v4 = vpop.f32.mrb[3].mxu0  ;;  %v9060_v27 = vunpack.c.0.s8 %v9059_v45 }
 0x9b4   : >> { %v9509_v63 = vadd.f32 %v9021_v4, %v4768_v29 }
 0x9b5   : >> { %v9040_v33 = vadd.f32 %v9508_v21, %v9036_v52  ;;  %v9063_v26 = vsub.s32 %v9060_v27, %v13297_v3 }
 0x9b6   : >> { %v9041_v13 = vadd.f32 %v9509_v63, %v9036_v52 }
 0x9b7   : >> { %v9042_v37 = vsub.f32 0.0, %v9040_v33 }
 0x9b8   : >> { %v9043_v51 = vsub.f32 0.0, %v9041_v13 }
 0x9b9   : >> { %v9044_v34 = vmul.f32 1.442695, %v9042_v37 }
 0x9ba   : >> { %v9046_v56 = vmul.f32 1.442695, %v9043_v51 }
 0x9bb   : >> { %9692 = vpow2.f32 %v9044_v34 }
 0x9bc   : >> { %9694 = vpow2.f32 %v9046_v56 }
 0x9c5   : >> { %v9693_v55 = vpop.eup %9692 }
 0x9c6   : >> { %v9695_v46 = vpop.eup %9694  ;;  %v9048_v7 = vadd.f32 1.0, %v9693_v55 }
 0x9c7   : >> { %v9049_v59 = vadd.f32 1.0, %v9695_v46 }
 0x9c8   : >> { %9696 = vrcp.f32 %v9048_v7 }
 0x9c9   : >> { %9698 = vrcp.f32 %v9049_v59 }
 0x9d2   : >> { %v9697_v41 = vpop.eup %9696 }
 0x9d3   : >> { %v9699_v35 = vpop.eup %9698  ;;  %v9052_v28 = vmul.f32 %v9697_v41, %v9038_v58 }
 0x9d4   : >> { %v9053_v31 = vmul.f32 %v9699_v35, %v9039_v47 }
 0x9d6   : >> { %v9056_v38 = vcombine.low %v9052_v28, %v9053_v31  ;;  %v9057_v20 = vcombine.high %v9052_v28, %v9053_v31 }
 0x9d8   : >> { %v9064_v53 = vrot.slane %v9056_v38, %v9063_v26  ;;  %v9071_v11 = vrot.slane %v9057_v20, %v9063_v26 }
 0x9da   : >> { %v9072_v44 = vcombine.high %v9064_v53, %v9064_v53  ;;  %v9073_v25 = vcombine.high %v9071_v11, %v9071_v11  ;;  %v9080_v36 = vrot.slane %v9064_v53, %v9063_v26  ;;  %v9087_v17 = vrot.slane %v9071_v11, %v9063_v26  ;;  %190 = sbr.rel (!%p188_p12) target bundleno = 29 (0x1d), region = 111 }
 0x9dc   : >> { %v9094_v40 = vrot.slane %v9072_v44, %v9063_v26  ;;  %v9101_v50 = vrot.slane %v9073_v25, %v9063_v26  ;;  %v9102_v62 = vcombine.high %v9080_v36, %v9080_v36  ;;  %v9103_v54 = vcombine.high %v9087_v17, %v9087_v17  ;;  %9126 = vst.msk [vmem:[%s9125_s19] ss:$8 sm:$0x3] %vm13084_vm11, %v9080_v36 }
 0x9dd   : >> { %9490 = vst.msk [vmem:[%s9125_s19 + $0x80] ss:$8 sm:$0x3] %vm13084_vm11, %v9087_v17 }
 0x9de   : >> { %v9104_v32 = vcombine.high %v9094_v40, %v9094_v40  ;;  %v9105_v29 = vcombine.high %v9101_v50, %v9101_v50  ;;  %9484 = vst.msk [vmem:[%s9125_s19 + $0x20] ss:$8 sm:$0x3] %vm13084_vm11, %v9094_v40  ;;  %9486 = vst.msk [vmem:[%s9125_s19 + $0x40] ss:$8 sm:$0x3] %vm13084_vm11, %v9102_v62 }
 0x9df   : >> { %9492 = vst.msk [vmem:[%s9125_s19 + $0xa0] ss:$8 sm:$0x3] %vm13084_vm11, %v9101_v50  ;;  %9494 = vst.msk [vmem:[%s9125_s19 + $0xc0] ss:$8 sm:$0x3] %vm13084_vm11, %v9103_v54 }
 0x9e0   : >> { %9488 = vst.msk [vmem:[%s9125_s19 + $0x60] ss:$8 sm:$0x3] %vm13084_vm11, %v9104_v32  ;;  %9496 = vst.msk [vmem:[%s9125_s19 + $0xe0] ss:$8 sm:$0x3] %vm13084_vm11, %v9105_v29 }
 0x9e1   : > { %9733 = shalt.err (!%p9730_p6)
}
 0x9e2   : > { %s9734_s4 = scalar_lea.hbm %s13113_s23, 4096  ;;  %s9738_s18 = scalar_lea.hbm %s13170_s3, 8192 }
 0x9e3   : > { %p9735_p7 = scmp.ne.s32.totalorder %s13113_s23, %s9734_s4  ;;  %p9739_p11 = scmp.lt.u32.totalorder %s13113_s23, %s13170_s3 }
 0x9e4   : > { %p9740_p12 = scmp.lt.u32.totalorder %s9738_s18, %s9734_s4  ;;  %p9742_p0 = scmp.lt.u32.totalorder %s9734_s4, %s13113_s23 }
 0x9e5   : > { %p9736_p9 = pnand %p9735_p7, %p9885_p4 }
 0x9e6   : > { %p9741_p13 = por %p9740_p12, %p9739_p11 }
 0x9e7   : > { %p9737_p10 = pneg %p9736_p9 }
 0x9e8   : > { %p9743_p1 = por %p9742_p0, %p9741_p13 }
 0x9ea   : > { %p9744_p2 = pnand %p9743_p1, %p9737_p10 }
 0x9ec   : > { %9747 = shalt.err (!%p9744_p2)
}
 0x9ed   : > { %s9823_s26 = smov 256   ;;  %s9824_s29 = smov 16  }
 0x9ee   : > { %9611 = dma.vmem_to_hbm [thread:$0]  (%p9885_p4), %s13117_s28, 4096, %s13113_s23, %s13121_s11, %s9823_s26, %s9823_s26, %s9824_s29  }
 0x9ef PF: > { %p9617_p3 = scmp.ge.s32.totalorder %s9802_s17, 2  ;;  %s9188_s21 = sand.u32 1, %s9782_s12  }
 0x9f0   : > { %s9189_s27 = scalar_lea.sflag [#allocation3], %s9188_s21 }
 0x9f1   : > { %p9614_p5 = pnand %p9617_p3, %p9892_p8 }
 0x9f3   : > { %9777 = dma.done.wait (!%p9614_p5), %s9189_s27, 4096  }
 0x9f4   : > { %9779 = vsyncadd (!%p9614_p5), %s9189_s27, 4294963200  ;;  %s16_s17 = sadd.s32 1, %s9802_s17   ;;  %s13304_s12 = smov %s9786_s13 }
 0x9f5   : > { %p13_p6 = scmp.ge.s32.totalorder %s16_s17, 4   ;;  %s13305_s13 = smov %s9790_s14 }
 0x9f6   : > { %s13306_s14 = smov %s9898_s25  ;;  %s13307_s15 = smov %s9798_s16 }
 0x9f7   : > { %s13308_s16 = smov %s13310_s20  ;;  %15 = sbr.rel (!%p13_p6) target bundleno = 4 (0x4), region = 122 }
 0x9fe   :  { %9194 = vsyncpa [#allocation3], 1 }
 0x9ff   :  { %9196 = vsyncpa [#allocation3 + $0x1], 1 }

</bundles_post_ra>
